<compile_context>
chip_gen: v6e
topology: v6e:2x2x1
jax: 0.10.0
libtpu: 0.0.40
codegen_flags: <defaults>
</compile_context>

<pallas_src>
import math

import jax
import jax.numpy as jnp
from jax import lax
from jax.experimental import pallas as pl
from jax.experimental.pallas import tpu as pltpu


# ----------------------------------------------------------------------------
# Pallas kernel: 4-layer LSTM recurrence + Linear over all timesteps.
# seq_ref holds the current layer's output sequence (overwritten in place,
# layer by layer); pre_ref holds the hoisted input-projection + bias.
# ----------------------------------------------------------------------------
def _generator_kernel(x_ref,       # (T, Bp, C)     f32  time-major input
                      w_ih0_ref,   # (C, 4H)        bf16 layer-0 input weights
                      w_ih_ref,    # (L-1, H, 4H)   bf16 input weights, layers 1..L-1
                      w_hh_ref,    # (L, H, 4H)     bf16 hidden weights
                      b_ref,       # (L, 1, 4H)     f32  b_ih + b_hh (combined)
                      w_fc_ref,    # (H, C)         bf16 fc weight
                      b_fc_ref,    # (1, C)         f32  fc bias
                      out_ref,     # (T, Bp, C)     f32  output
                      seq_ref,     # scratch VMEM (T, Bp, H)  f32
                      pre_ref):    # scratch VMEM (T, Bp, 4H) f32
    T, Bp, _C = x_ref.shape
    L, H, H4 = w_hh_ref.shape

    for l in range(L):                          # static unroll over layers
        # ---- hoisted input projection for the whole sequence (1 MXU call) --
        if l == 0:
            xin = x_ref[...].reshape(T * Bp, _C).astype(jnp.bfloat16)
            w_ih = w_ih0_ref[...]               # (C, 4H) bf16
        else:
            xin = seq_ref[...].reshape(T * Bp, H).astype(jnp.bfloat16)
            w_ih = w_ih_ref[l - 1]              # (H, 4H) bf16
        pre = jnp.dot(xin, w_ih, preferred_element_type=jnp.float32)
        pre_ref[...] = pre.reshape(T, Bp, H4) + b_ref[l]   # bias folded once

        w_hh = w_hh_ref[l]                      # (H, 4H) bf16, hoisted load

        # ---- serial recurrence: one small matmul per step ------------------
        def step(t, carry, *, w_hh=w_hh):
            h, c = carry
            gates = pre_ref[t] + jnp.dot(h.astype(jnp.bfloat16), w_hh,
                                         preferred_element_type=jnp.float32)
            # two full-vreg EUP ops over the whole (Bp, 4H=128) tile
            sig = jax.nn.sigmoid(gates)
            th = jnp.tanh(gates)
            i_g = sig[:, 0 * H:1 * H]           # PyTorch gate order i, f, g, o
            f_g = sig[:, 1 * H:2 * H]
            g_g = th[:, 2 * H:3 * H]
            o_g = sig[:, 3 * H:4 * H]
            c_new = f_g * c + i_g * g_g
            h_new = o_g * jnp.tanh(c_new)
            seq_ref[t] = h_new                  # next layer reads this in place
            return (h_new, c_new)

        h0 = jnp.zeros((Bp, H), jnp.float32)
        c0 = jnp.zeros((Bp, H), jnp.float32)
        lax.fori_loop(0, T, step, (h0, c0), unroll=True)   # T is static

    # ---- fc on every timestep of the last layer: (T*Bp, H) @ (H, C) --------
    y = jnp.dot(seq_ref[...].reshape(T * Bp, H).astype(jnp.bfloat16),
                w_fc_ref[...], preferred_element_type=jnp.float32)
    out_ref[...] = y.reshape(T, Bp, -1) + b_fc_ref[...]


def generator_forward(x, params):
    """x: (B, T, C) float32.  params: dict of kernel-layout weights."""
    B, T, C = x.shape
    L, H, _ = params["w_hh"].shape

    # pad batch to the 8-sublane hardware minimum (avoids masked vreg ops)
    Bp = max(8, ((B + 7) // 8) * 8)
    x_tm = jnp.transpose(x, (1, 0, 2))          # time-major (T, B, C)
    if Bp != B:
        x_tm = jnp.pad(x_tm, ((0, 0), (0, Bp - B), (0, 0)))

    vmem = pl.BlockSpec(memory_space=pltpu.MemorySpace.VMEM)
    out_tm = pl.pallas_call(
        _generator_kernel,
        out_shape=jax.ShapeDtypeStruct((T, Bp, C), jnp.float32),
        in_specs=[vmem] * 7,
        out_specs=vmem,
        scratch_shapes=[pltpu.VMEM((T, Bp, H), jnp.float32),
                        pltpu.VMEM((T, Bp, 4 * H), jnp.float32)],
    )(x_tm, params["w_ih0"], params["w_ih_rest"], params["w_hh"],
      params["b"], params["w_fc"], params["b_fc"])

    return jnp.transpose(out_tm[:, :B, :], (1, 0, 2))      # back to (B, T, C)


# ----------------------------------------------------------------------------
# Deterministic parameter construction (same shapes/init style as nn.LSTM).
# ----------------------------------------------------------------------------
def make_params(key, input_channel, hidden_channel, num_layers=4):
    C, H, L = input_channel, hidden_channel, num_layers
    stdv = 1.0 / math.sqrt(H)
    keys = jax.random.split(key, 4 * L + 2)

    w_ih, w_hh, b_ih, b_hh = [], [], [], []
    ki = 0
    for l in range(L):
        in_size = C if l == 0 else H
        w_ih.append(jax.random.uniform(keys[ki], (4 * H, in_size),
                                       minval=-stdv, maxval=stdv)); ki += 1
        w_hh.append(jax.random.uniform(keys[ki], (4 * H, H),
                                       minval=-stdv, maxval=stdv)); ki += 1
        b_ih.append(jax.random.uniform(keys[ki], (4 * H,),
                                       minval=-stdv, maxval=stdv)); ki += 1
        b_hh.append(jax.random.uniform(keys[ki], (4 * H,),
                                       minval=-stdv, maxval=stdv)); ki += 1
    fc_w = jax.random.uniform(keys[ki], (C, H), minval=-stdv, maxval=stdv); ki += 1
    fc_b = jax.random.uniform(keys[ki], (C,), minval=-stdv, maxval=stdv)

    torch_layout = dict(w_ih=w_ih, w_hh=w_hh, b_ih=b_ih, b_hh=b_hh,
                        fc_w=fc_w, fc_b=fc_b)
    kernel_layout = dict(
        # matmul weights stored bf16 (MXU fast path); biases stay f32
        w_ih0=w_ih[0].T.astype(jnp.bfloat16),                               # (C, 4H)
        w_ih_rest=jnp.stack([w.T for w in w_ih[1:]]).astype(jnp.bfloat16),  # (L-1, H, 4H)
        w_hh=jnp.stack([w.T for w in w_hh]).astype(jnp.bfloat16),           # (L, H, 4H)
        b=jnp.stack([bi + bh for bi, bh in zip(b_ih, b_hh)])[:, None, :]
            .astype(jnp.float32),                                           # (L, 1, 4H)
        w_fc=fc_w.T.astype(jnp.bfloat16),                                   # (H, C)
        b_fc=fc_b.reshape(1, C).astype(jnp.float32),                        # (1, C)
    )
    return torch_layout, kernel_layout


# Pure-JAX f32 reference matching PyTorch nn.LSTM + nn.Linear semantics.
def reference_forward(x, tp):
    B, T, C = x.shape
    L = len(tp["w_ih"])
    H = tp["w_hh"][0].shape[1]
    out = x
    for l in range(L):
        h = jnp.zeros((B, H), jnp.float32)
        c = jnp.zeros((B, H), jnp.float32)
        ys = []
        for t in range(T):
            xt = out[:, t, :]
            gates = (xt @ tp["w_ih"][l].T + h @ tp["w_hh"][l].T
                     + tp["b_ih"][l] + tp["b_hh"][l])
            i_g = jax.nn.sigmoid(gates[:, 0 * H:1 * H])
            f_g = jax.nn.sigmoid(gates[:, 1 * H:2 * H])
            g_g = jnp.tanh(gates[:, 2 * H:3 * H])
            o_g = jax.nn.sigmoid(gates[:, 3 * H:4 * H])
            c = f_g * c + i_g * g_g
            h = o_g * jnp.tanh(c)
            ys.append(h)
        out = jnp.stack(ys, axis=1)
    return out @ tp["fc_w"].T + tp["fc_b"]      # (B, T, C)


if __name__ == "__main__":
    B, T, C, H, L = 4, 8, 8, 32, 4

    key = jax.random.PRNGKey(0)
    k_param, k_x = jax.random.split(key)
    torch_params, kernel_params = make_params(k_param, C, H, L)

    x = jax.random.normal(k_x, (B, T, C), dtype=jnp.float32)

    out = generator_forward(x, kernel_params)
    out = jax.block_until_ready(out)

    ref = reference_forward(x, torch_params)
    assert out.shape == (B, T, C), out.shape
    # tolerance widened vs. pure-f32 because MXU operands are bf16
    # (f32 accumulation); drift over T*L = 32 serial steps is ~1e-2 level.
    assert jnp.allclose(out, ref, atol=5e-2, rtol=5e-2), (out, ref)

    print("KERNEL_OK")
</pallas_src>

<mosaic_0001>
module attributes {stable_mosaic.version = 11 : i64} {
  func.func @_generator_kernel(%arg0: memref<8x8x8xf32, #tpu.memory_space<vmem>>, %arg1: memref<8x128xbf16, #tpu.memory_space<vmem>>, %arg2: memref<3x32x128xbf16, #tpu.memory_space<vmem>>, %arg3: memref<4x32x128xbf16, #tpu.memory_space<vmem>>, %arg4: memref<4x1x128xf32, #tpu.memory_space<vmem>>, %arg5: memref<32x8xbf16, #tpu.memory_space<vmem>>, %arg6: memref<1x8xf32, #tpu.memory_space<vmem>>, %arg7: memref<8x8x8xf32, #tpu.memory_space<vmem>>, %arg8: memref<8x8x32xf32, #tpu.memory_space<vmem>>, %arg9: memref<8x8x128xf32, #tpu.memory_space<vmem>>) attributes {dimension_semantics = [], scalar_prefetch = 0 : i64, scratch_operands = 2 : i64, tpu.core_type = #tpu.core_type<tc>} {
    %c0 = arith.constant 0 : index
    %c0_0 = arith.constant 0 : index
    %c0_1 = arith.constant 0 : index
    %0 = vector.load %arg0[%c0, %c0_0, %c0_1] : memref<8x8x8xf32, #tpu.memory_space<vmem>>, vector<8x8x8xf32>
    %1 = vector.shape_cast %0 : vector<8x8x8xf32> to vector<64x8xf32>
    %2 = arith.truncf %1 : vector<64x8xf32> to vector<64x8xbf16>
    %c0_2 = arith.constant 0 : index
    %c0_3 = arith.constant 0 : index
    %3 = vector.load %arg1[%c0_2, %c0_3] : memref<8x128xbf16, #tpu.memory_space<vmem>>, vector<8x128xbf16>
    %cst = arith.constant dense<0.000000e+00> : vector<64x128xf32>
    %4 = tpu.matmul %2, %3, %cst {dimension_numbers = #tpu.dot_dimension_numbers<[1], [0], [0], [1], [0, 0, 1, 1], [], []>} : vector<64x8xbf16>, vector<8x128xbf16>, vector<64x128xf32> -> vector<64x128xf32>
    %5 = vector.shape_cast %4 : vector<64x128xf32> to vector<8x8x128xf32>
    %c0_4 = arith.constant 0 : index
    %c0_5 = arith.constant 0 : index
    %c0_6 = arith.constant 0 : index
    %6 = vector.load %arg4[%c0_4, %c0_5, %c0_6] : memref<4x1x128xf32, #tpu.memory_space<vmem>>, vector<1x1x128xf32>
    %7 = vector.shape_cast %6 : vector<1x1x128xf32> to vector<1x128xf32>
    %8 = vector.shape_cast %7 : vector<1x128xf32> to vector<1x1x128xf32>
    %9 = vector.broadcast %8 : vector<1x1x128xf32> to vector<8x8x128xf32>
    %10 = arith.addf %5, %9 : vector<8x8x128xf32>
    %c0_7 = arith.constant 0 : index
    %c0_8 = arith.constant 0 : index
    %c0_9 = arith.constant 0 : index
    %11 = vector.load %arg9[%c0_7, %c0_8, %c0_9] : memref<8x8x128xf32, #tpu.memory_space<vmem>>, vector<8x8x128xf32>
    tpu.vector_store %arg9[%c0_7, %c0_8, %c0_9], %10 {strides = array<i32>} : memref<8x8x128xf32, #tpu.memory_space<vmem>>, vector<8x8x128xf32>,
    %c0_10 = arith.constant 0 : index
    %c0_11 = arith.constant 0 : index
    %c0_12 = arith.constant 0 : index
    %12 = vector.load %arg3[%c0_10, %c0_11, %c0_12] : memref<4x32x128xbf16, #tpu.memory_space<vmem>>, vector<1x32x128xbf16>
    %13 = vector.shape_cast %12 : vector<1x32x128xbf16> to vector<32x128xbf16>
    %cst_13 = arith.constant 0.000000e+00 : f32
    %14 = vector.broadcast %cst_13 : f32 to vector<8x32xf32>
    %cst_14 = arith.constant 0.000000e+00 : f32
    %15 = vector.broadcast %cst_14 : f32 to vector<8x32xf32>
    %c0_i32 = arith.constant 0 : i32
    %16 = arith.index_cast %c0_i32 : i32 to index
    %c0_15 = arith.constant 0 : index
    %c0_16 = arith.constant 0 : index
    %17 = vector.load %arg9[%16, %c0_15, %c0_16] : memref<8x8x128xf32, #tpu.memory_space<vmem>>, vector<1x8x128xf32>
    %18 = vector.shape_cast %17 : vector<1x8x128xf32> to vector<8x128xf32>
    %19 = arith.truncf %14 : vector<8x32xf32> to vector<8x32xbf16>
    %cst_17 = arith.constant dense<0.000000e+00> : vector<8x128xf32>
    %20 = tpu.matmul %19, %13, %cst_17 {dimension_numbers = #tpu.dot_dimension_numbers<[1], [0], [0], [1], [0, 0, 1, 1], [], []>} : vector<8x32xbf16>, vector<32x128xbf16>, vector<8x128xf32> -> vector<8x128xf32>
    %21 = arith.addf %18, %20 : vector<8x128xf32>
    %22 = arith.negf %21 : vector<8x128xf32>
    %23 = math.exp %22 : vector<8x128xf32>
    %cst_18 = arith.constant 1.000000e+00 : f32
    %24 = vector.broadcast %cst_18 : f32 to vector<8x128xf32>
    %25 = arith.addf %24, %23 : vector<8x128xf32>
    %26 = arith.divf %24, %25 : vector<8x128xf32>
    %27 = math.tanh %21 : vector<8x128xf32>
    %28 = vector.extract_strided_slice %26 {offsets = [0, 0], sizes = [8, 32], strides = [1, 1]} : vector<8x128xf32> to vector<8x32xf32>
    %29 = vector.extract_strided_slice %26 {offsets = [0, 32], sizes = [8, 32], strides = [1, 1]} : vector<8x128xf32> to vector<8x32xf32>
    %30 = vector.extract_strided_slice %27 {offsets = [0, 64], sizes = [8, 32], strides = [1, 1]} : vector<8x128xf32> to vector<8x32xf32>
    %31 = vector.extract_strided_slice %26 {offsets = [0, 96], sizes = [8, 32], strides = [1, 1]} : vector<8x128xf32> to vector<8x32xf32>
    %32 = arith.mulf %29, %15 : vector<8x32xf32>
    %33 = arith.mulf %28, %30 : vector<8x32xf32>
    %34 = arith.addf %32, %33 : vector<8x32xf32>
    %35 = math.tanh %34 : vector<8x32xf32>
    %36 = arith.mulf %31, %35 : vector<8x32xf32>
    %37 = arith.index_cast %c0_i32 : i32 to index
    %c0_19 = arith.constant 0 : index
    %c0_20 = arith.constant 0 : index
    %38 = vector.load %arg8[%37, %c0_19, %c0_20] : memref<8x8x32xf32, #tpu.memory_space<vmem>>, vector<1x8x32xf32>
    %39 = vector.shape_cast %38 : vector<1x8x32xf32> to vector<8x32xf32>
    %40 = vector.shape_cast %36 : vector<8x32xf32> to vector<1x8x32xf32>
    tpu.vector_store %arg8[%37, %c0_19, %c0_20], %40 {strides = array<i32>} : memref<8x8x32xf32, #tpu.memory_space<vmem>>, vector<1x8x32xf32>,
    %c1_i32 = arith.constant 1 : i32
    %41 = arith.index_cast %c1_i32 : i32 to index
    %c0_21 = arith.constant 0 : index
    %c0_22 = arith.constant 0 : index
    %42 = vector.load %arg9[%41, %c0_21, %c0_22] : memref<8x8x128xf32, #tpu.memory_space<vmem>>, vector<1x8x128xf32>
    %43 = vector.shape_cast %42 : vector<1x8x128xf32> to vector<8x128xf32>
    %44 = arith.truncf %36 : vector<8x32xf32> to vector<8x32xbf16>
    %cst_23 = arith.constant dense<0.000000e+00> : vector<8x128xf32>
    %45 = tpu.matmul %44, %13, %cst_23 {dimension_numbers = #tpu.dot_dimension_numbers<[1], [0], [0], [1], [0, 0, 1, 1], [], []>} : vector<8x32xbf16>, vector<32x128xbf16>, vector<8x128xf32> -> vector<8x128xf32>
    %46 = arith.addf %43, %45 : vector<8x128xf32>
    %47 = arith.negf %46 : vector<8x128xf32>
    %48 = math.exp %47 : vector<8x128xf32>
    %cst_24 = arith.constant 1.000000e+00 : f32
    %49 = vector.broadcast %cst_24 : f32 to vector<8x128xf32>
    %50 = arith.addf %49, %48 : vector<8x128xf32>
    %51 = arith.divf %49, %50 : vector<8x128xf32>
    %52 = math.tanh %46 : vector<8x128xf32>
    %53 = vector.extract_strided_slice %51 {offsets = [0, 0], sizes = [8, 32], strides = [1, 1]} : vector<8x128xf32> to vector<8x32xf32>
    %54 = vector.extract_strided_slice %51 {offsets = [0, 32], sizes = [8, 32], strides = [1, 1]} : vector<8x128xf32> to vector<8x32xf32>
    %55 = vector.extract_strided_slice %52 {offsets = [0, 64], sizes = [8, 32], strides = [1, 1]} : vector<8x128xf32> to vector<8x32xf32>
    %56 = vector.extract_strided_slice %51 {offsets = [0, 96], sizes = [8, 32], strides = [1, 1]} : vector<8x128xf32> to vector<8x32xf32>
    %57 = arith.mulf %54, %34 : vector<8x32xf32>
    %58 = arith.mulf %53, %55 : vector<8x32xf32>
    %59 = arith.addf %57, %58 : vector<8x32xf32>
    %60 = math.tanh %59 : vector<8x32xf32>
    %61 = arith.mulf %56, %60 : vector<8x32xf32>
    %62 = arith.index_cast %c1_i32 : i32 to index
    %c0_25 = arith.constant 0 : index
    %c0_26 = arith.constant 0 : index
    %63 = vector.load %arg8[%62, %c0_25, %c0_26] : memref<8x8x32xf32, #tpu.memory_space<vmem>>, vector<1x8x32xf32>
    %64 = vector.shape_cast %63 : vector<1x8x32xf32> to vector<8x32xf32>
    %65 = vector.shape_cast %61 : vector<8x32xf32> to vector<1x8x32xf32>
    tpu.vector_store %arg8[%62, %c0_25, %c0_26], %65 {strides = array<i32>} : memref<8x8x32xf32, #tpu.memory_space<vmem>>, vector<1x8x32xf32>,
    %c2_i32 = arith.constant 2 : i32
    %66 = arith.index_cast %c2_i32 : i32 to index
    %c0_27 = arith.constant 0 : index
    %c0_28 = arith.constant 0 : index
    %67 = vector.load %arg9[%66, %c0_27, %c0_28] : memref<8x8x128xf32, #tpu.memory_space<vmem>>, vector<1x8x128xf32>
    %68 = vector.shape_cast %67 : vector<1x8x128xf32> to vector<8x128xf32>
    %69 = arith.truncf %61 : vector<8x32xf32> to vector<8x32xbf16>
    %cst_29 = arith.constant dense<0.000000e+00> : vector<8x128xf32>
    %70 = tpu.matmul %69, %13, %cst_29 {dimension_numbers = #tpu.dot_dimension_numbers<[1], [0], [0], [1], [0, 0, 1, 1], [], []>} : vector<8x32xbf16>, vector<32x128xbf16>, vector<8x128xf32> -> vector<8x128xf32>
    %71 = arith.addf %68, %70 : vector<8x128xf32>
    %72 = arith.negf %71 : vector<8x128xf32>
    %73 = math.exp %72 : vector<8x128xf32>
    %cst_30 = arith.constant 1.000000e+00 : f32
    %74 = vector.broadcast %cst_30 : f32 to vector<8x128xf32>
    %75 = arith.addf %74, %73 : vector<8x128xf32>
    %76 = arith.divf %74, %75 : vector<8x128xf32>
    %77 = math.tanh %71 : vector<8x128xf32>
    %78 = vector.extract_strided_slice %76 {offsets = [0, 0], sizes = [8, 32], strides = [1, 1]} : vector<8x128xf32> to vector<8x32xf32>
    %79 = vector.extract_strided_slice %76 {offsets = [0, 32], sizes = [8, 32], strides = [1, 1]} : vector<8x128xf32> to vector<8x32xf32>
    %80 = vector.extract_strided_slice %77 {offsets = [0, 64], sizes = [8, 32], strides = [1, 1]} : vector<8x128xf32> to vector<8x32xf32>
    %81 = vector.extract_strided_slice %76 {offsets = [0, 96], sizes = [8, 32], strides = [1, 1]} : vector<8x128xf32> to vector<8x32xf32>
    %82 = arith.mulf %79, %59 : vector<8x32xf32>
    %83 = arith.mulf %78, %80 : vector<8x32xf32>
    %84 = arith.addf %82, %83 : vector<8x32xf32>
    %85 = math.tanh %84 : vector<8x32xf32>
    %86 = arith.mulf %81, %85 : vector<8x32xf32>
    %87 = arith.index_cast %c2_i32 : i32 to index
    %c0_31 = arith.constant 0 : index
    %c0_32 = arith.constant 0 : index
    %88 = vector.load %arg8[%87, %c0_31, %c0_32] : memref<8x8x32xf32, #tpu.memory_space<vmem>>, vector<1x8x32xf32>
    %89 = vector.shape_cast %88 : vector<1x8x32xf32> to vector<8x32xf32>
    %90 = vector.shape_cast %86 : vector<8x32xf32> to vector<1x8x32xf32>
    tpu.vector_store %arg8[%87, %c0_31, %c0_32], %90 {strides = array<i32>} : memref<8x8x32xf32, #tpu.memory_space<vmem>>, vector<1x8x32xf32>,
    %c3_i32 = arith.constant 3 : i32
    %91 = arith.index_cast %c3_i32 : i32 to index
    %c0_33 = arith.constant 0 : index
    %c0_34 = arith.constant 0 : index
    %92 = vector.load %arg9[%91, %c0_33, %c0_34] : memref<8x8x128xf32, #tpu.memory_space<vmem>>, vector<1x8x128xf32>
    %93 = vector.shape_cast %92 : vector<1x8x128xf32> to vector<8x128xf32>
    %94 = arith.truncf %86 : vector<8x32xf32> to vector<8x32xbf16>
    %cst_35 = arith.constant dense<0.000000e+00> : vector<8x128xf32>
    %95 = tpu.matmul %94, %13, %cst_35 {dimension_numbers = #tpu.dot_dimension_numbers<[1], [0], [0], [1], [0, 0, 1, 1], [], []>} : vector<8x32xbf16>, vector<32x128xbf16>, vector<8x128xf32> -> vector<8x128xf32>
    %96 = arith.addf %93, %95 : vector<8x128xf32>
    %97 = arith.negf %96 : vector<8x128xf32>
    %98 = math.exp %97 : vector<8x128xf32>
    %cst_36 = arith.constant 1.000000e+00 : f32
    %99 = vector.broadcast %cst_36 : f32 to vector<8x128xf32>
    %100 = arith.addf %99, %98 : vector<8x128xf32>
    %101 = arith.divf %99, %100 : vector<8x128xf32>
    %102 = math.tanh %96 : vector<8x128xf32>
    %103 = vector.extract_strided_slice %101 {offsets = [0, 0], sizes = [8, 32], strides = [1, 1]} : vector<8x128xf32> to vector<8x32xf32>
    %104 = vector.extract_strided_slice %101 {offsets = [0, 32], sizes = [8, 32], strides = [1, 1]} : vector<8x128xf32> to vector<8x32xf32>
    %105 = vector.extract_strided_slice %102 {offsets = [0, 64], sizes = [8, 32], strides = [1, 1]} : vector<8x128xf32> to vector<8x32xf32>
    %106 = vector.extract_strided_slice %101 {offsets = [0, 96], sizes = [8, 32], strides = [1, 1]} : vector<8x128xf32> to vector<8x32xf32>
    %107 = arith.mulf %104, %84 : vector<8x32xf32>
    %108 = arith.mulf %103, %105 : vector<8x32xf32>
    %109 = arith.addf %107, %108 : vector<8x32xf32>
    %110 = math.tanh %109 : vector<8x32xf32>
    %111 = arith.mulf %106, %110 : vector<8x32xf32>
    %112 = arith.index_cast %c3_i32 : i32 to index
    %c0_37 = arith.constant 0 : index
    %c0_38 = arith.constant 0 : index
    %113 = vector.load %arg8[%112, %c0_37, %c0_38] : memref<8x8x32xf32, #tpu.memory_space<vmem>>, vector<1x8x32xf32>
    %114 = vector.shape_cast %113 : vector<1x8x32xf32> to vector<8x32xf32>
    %115 = vector.shape_cast %111 : vector<8x32xf32> to vector<1x8x32xf32>
    tpu.vector_store %arg8[%112, %c0_37, %c0_38], %115 {strides = array<i32>} : memref<8x8x32xf32, #tpu.memory_space<vmem>>, vector<1x8x32xf32>,
    %c4_i32 = arith.constant 4 : i32
    %116 = arith.index_cast %c4_i32 : i32 to index
    %c0_39 = arith.constant 0 : index
    %c0_40 = arith.constant 0 : index
    %117 = vector.load %arg9[%116, %c0_39, %c0_40] : memref<8x8x128xf32, #tpu.memory_space<vmem>>, vector<1x8x128xf32>
    %118 = vector.shape_cast %117 : vector<1x8x128xf32> to vector<8x128xf32>
    %119 = arith.truncf %111 : vector<8x32xf32> to vector<8x32xbf16>
    %cst_41 = arith.constant dense<0.000000e+00> : vector<8x128xf32>
    %120 = tpu.matmul %119, %13, %cst_41 {dimension_numbers = #tpu.dot_dimension_numbers<[1], [0], [0], [1], [0, 0, 1, 1], [], []>} : vector<8x32xbf16>, vector<32x128xbf16>, vector<8x128xf32> -> vector<8x128xf32>
    %121 = arith.addf %118, %120 : vector<8x128xf32>
    %122 = arith.negf %121 : vector<8x128xf32>
    %123 = math.exp %122 : vector<8x128xf32>
    %cst_42 = arith.constant 1.000000e+00 : f32
    %124 = vector.broadcast %cst_42 : f32 to vector<8x128xf32>
    %125 = arith.addf %124, %123 : vector<8x128xf32>
    %126 = arith.divf %124, %125 : vector<8x128xf32>
    %127 = math.tanh %121 : vector<8x128xf32>
    %128 = vector.extract_strided_slice %126 {offsets = [0, 0], sizes = [8, 32], strides = [1, 1]} : vector<8x128xf32> to vector<8x32xf32>
    %129 = vector.extract_strided_slice %126 {offsets = [0, 32], sizes = [8, 32], strides = [1, 1]} : vector<8x128xf32> to vector<8x32xf32>
    %130 = vector.extract_strided_slice %127 {offsets = [0, 64], sizes = [8, 32], strides = [1, 1]} : vector<8x128xf32> to vector<8x32xf32>
    %131 = vector.extract_strided_slice %126 {offsets = [0, 96], sizes = [8, 32], strides = [1, 1]} : vector<8x128xf32> to vector<8x32xf32>
    %132 = arith.mulf %129, %109 : vector<8x32xf32>
    %133 = arith.mulf %128, %130 : vector<8x32xf32>
    %134 = arith.addf %132, %133 : vector<8x32xf32>
    %135 = math.tanh %134 : vector<8x32xf32>
    %136 = arith.mulf %131, %135 : vector<8x32xf32>
    %137 = arith.index_cast %c4_i32 : i32 to index
    %c0_43 = arith.constant 0 : index
    %c0_44 = arith.constant 0 : index
    %138 = vector.load %arg8[%137, %c0_43, %c0_44] : memref<8x8x32xf32, #tpu.memory_space<vmem>>, vector<1x8x32xf32>
    %139 = vector.shape_cast %138 : vector<1x8x32xf32> to vector<8x32xf32>
    %140 = vector.shape_cast %136 : vector<8x32xf32> to vector<1x8x32xf32>
    tpu.vector_store %arg8[%137, %c0_43, %c0_44], %140 {strides = array<i32>} : memref<8x8x32xf32, #tpu.memory_space<vmem>>, vector<1x8x32xf32>,
    %c5_i32 = arith.constant 5 : i32
    %141 = arith.index_cast %c5_i32 : i32 to index
    %c0_45 = arith.constant 0 : index
    %c0_46 = arith.constant 0 : index
    %142 = vector.load %arg9[%141, %c0_45, %c0_46] : memref<8x8x128xf32, #tpu.memory_space<vmem>>, vector<1x8x128xf32>
    %143 = vector.shape_cast %142 : vector<1x8x128xf32> to vector<8x128xf32>
    %144 = arith.truncf %136 : vector<8x32xf32> to vector<8x32xbf16>
    %cst_47 = arith.constant dense<0.000000e+00> : vector<8x128xf32>
    %145 = tpu.matmul %144, %13, %cst_47 {dimension_numbers = #tpu.dot_dimension_numbers<[1], [0], [0], [1], [0, 0, 1, 1], [], []>} : vector<8x32xbf16>, vector<32x128xbf16>, vector<8x128xf32> -> vector<8x128xf32>
    %146 = arith.addf %143, %145 : vector<8x128xf32>
    %147 = arith.negf %146 : vector<8x128xf32>
    %148 = math.exp %147 : vector<8x128xf32>
    %cst_48 = arith.constant 1.000000e+00 : f32
    %149 = vector.broadcast %cst_48 : f32 to vector<8x128xf32>
    %150 = arith.addf %149, %148 : vector<8x128xf32>
    %151 = arith.divf %149, %150 : vector<8x128xf32>
    %152 = math.tanh %146 : vector<8x128xf32>
    %153 = vector.extract_strided_slice %151 {offsets = [0, 0], sizes = [8, 32], strides = [1, 1]} : vector<8x128xf32> to vector<8x32xf32>
    %154 = vector.extract_strided_slice %151 {offsets = [0, 32], sizes = [8, 32], strides = [1, 1]} : vector<8x128xf32> to vector<8x32xf32>
    %155 = vector.extract_strided_slice %152 {offsets = [0, 64], sizes = [8, 32], strides = [1, 1]} : vector<8x128xf32> to vector<8x32xf32>
    %156 = vector.extract_strided_slice %151 {offsets = [0, 96], sizes = [8, 32], strides = [1, 1]} : vector<8x128xf32> to vector<8x32xf32>
    %157 = arith.mulf %154, %134 : vector<8x32xf32>
    %158 = arith.mulf %153, %155 : vector<8x32xf32>
    %159 = arith.addf %157, %158 : vector<8x32xf32>
    %160 = math.tanh %159 : vector<8x32xf32>
    %161 = arith.mulf %156, %160 : vector<8x32xf32>
    %162 = arith.index_cast %c5_i32 : i32 to index
    %c0_49 = arith.constant 0 : index
    %c0_50 = arith.constant 0 : index
    %163 = vector.load %arg8[%162, %c0_49, %c0_50] : memref<8x8x32xf32, #tpu.memory_space<vmem>>, vector<1x8x32xf32>
    %164 = vector.shape_cast %163 : vector<1x8x32xf32> to vector<8x32xf32>
    %165 = vector.shape_cast %161 : vector<8x32xf32> to vector<1x8x32xf32>
    tpu.vector_store %arg8[%162, %c0_49, %c0_50], %165 {strides = array<i32>} : memref<8x8x32xf32, #tpu.memory_space<vmem>>, vector<1x8x32xf32>,
    %c6_i32 = arith.constant 6 : i32
    %166 = arith.index_cast %c6_i32 : i32 to index
    %c0_51 = arith.constant 0 : index
    %c0_52 = arith.constant 0 : index
    %167 = vector.load %arg9[%166, %c0_51, %c0_52] : memref<8x8x128xf32, #tpu.memory_space<vmem>>, vector<1x8x128xf32>
    %168 = vector.shape_cast %167 : vector<1x8x128xf32> to vector<8x128xf32>
    %169 = arith.truncf %161 : vector<8x32xf32> to vector<8x32xbf16>
    %cst_53 = arith.constant dense<0.000000e+00> : vector<8x128xf32>
    %170 = tpu.matmul %169, %13, %cst_53 {dimension_numbers = #tpu.dot_dimension_numbers<[1], [0], [0], [1], [0, 0, 1, 1], [], []>} : vector<8x32xbf16>, vector<32x128xbf16>, vector<8x128xf32> -> vector<8x128xf32>
    %171 = arith.addf %168, %170 : vector<8x128xf32>
    %172 = arith.negf %171 : vector<8x128xf32>
    %173 = math.exp %172 : vector<8x128xf32>
    %cst_54 = arith.constant 1.000000e+00 : f32
    %174 = vector.broadcast %cst_54 : f32 to vector<8x128xf32>
    %175 = arith.addf %174, %173 : vector<8x128xf32>
    %176 = arith.divf %174, %175 : vector<8x128xf32>
    %177 = math.tanh %171 : vector<8x128xf32>
    %178 = vector.extract_strided_slice %176 {offsets = [0, 0], sizes = [8, 32], strides = [1, 1]} : vector<8x128xf32> to vector<8x32xf32>
    %179 = vector.extract_strided_slice %176 {offsets = [0, 32], sizes = [8, 32], strides = [1, 1]} : vector<8x128xf32> to vector<8x32xf32>
    %180 = vector.extract_strided_slice %177 {offsets = [0, 64], sizes = [8, 32], strides = [1, 1]} : vector<8x128xf32> to vector<8x32xf32>
    %181 = vector.extract_strided_slice %176 {offsets = [0, 96], sizes = [8, 32], strides = [1, 1]} : vector<8x128xf32> to vector<8x32xf32>
    %182 = arith.mulf %179, %159 : vector<8x32xf32>
    %183 = arith.mulf %178, %180 : vector<8x32xf32>
    %184 = arith.addf %182, %183 : vector<8x32xf32>
    %185 = math.tanh %184 : vector<8x32xf32>
    %186 = arith.mulf %181, %185 : vector<8x32xf32>
    %187 = arith.index_cast %c6_i32 : i32 to index
    %c0_55 = arith.constant 0 : index
    %c0_56 = arith.constant 0 : index
    %188 = vector.load %arg8[%187, %c0_55, %c0_56] : memref<8x8x32xf32, #tpu.memory_space<vmem>>, vector<1x8x32xf32>
    %189 = vector.shape_cast %188 : vector<1x8x32xf32> to vector<8x32xf32>
    %190 = vector.shape_cast %186 : vector<8x32xf32> to vector<1x8x32xf32>
    tpu.vector_store %arg8[%187, %c0_55, %c0_56], %190 {strides = array<i32>} : memref<8x8x32xf32, #tpu.memory_space<vmem>>, vector<1x8x32xf32>,
    %c7_i32 = arith.constant 7 : i32
    %191 = arith.index_cast %c7_i32 : i32 to index
    %c0_57 = arith.constant 0 : index
    %c0_58 = arith.constant 0 : index
    %192 = vector.load %arg9[%191, %c0_57, %c0_58] : memref<8x8x128xf32, #tpu.memory_space<vmem>>, vector<1x8x128xf32>
    %193 = vector.shape_cast %192 : vector<1x8x128xf32> to vector<8x128xf32>
    %194 = arith.truncf %186 : vector<8x32xf32> to vector<8x32xbf16>
    %cst_59 = arith.constant dense<0.000000e+00> : vector<8x128xf32>
    %195 = tpu.matmul %194, %13, %cst_59 {dimension_numbers = #tpu.dot_dimension_numbers<[1], [0], [0], [1], [0, 0, 1, 1], [], []>} : vector<8x32xbf16>, vector<32x128xbf16>, vector<8x128xf32> -> vector<8x128xf32>
    %196 = arith.addf %193, %195 : vector<8x128xf32>
    %197 = arith.negf %196 : vector<8x128xf32>
    %198 = math.exp %197 : vector<8x128xf32>
    %cst_60 = arith.constant 1.000000e+00 : f32
    %199 = vector.broadcast %cst_60 : f32 to vector<8x128xf32>
    %200 = arith.addf %199, %198 : vector<8x128xf32>
    %201 = arith.divf %199, %200 : vector<8x128xf32>
    %202 = math.tanh %196 : vector<8x128xf32>
    %203 = vector.extract_strided_slice %201 {offsets = [0, 0], sizes = [8, 32], strides = [1, 1]} : vector<8x128xf32> to vector<8x32xf32>
    %204 = vector.extract_strided_slice %201 {offsets = [0, 32], sizes = [8, 32], strides = [1, 1]} : vector<8x128xf32> to vector<8x32xf32>
    %205 = vector.extract_strided_slice %202 {offsets = [0, 64], sizes = [8, 32], strides = [1, 1]} : vector<8x128xf32> to vector<8x32xf32>
    %206 = vector.extract_strided_slice %201 {offsets = [0, 96], sizes = [8, 32], strides = [1, 1]} : vector<8x128xf32> to vector<8x32xf32>
    %207 = arith.mulf %204, %184 : vector<8x32xf32>
    %208 = arith.mulf %203, %205 : vector<8x32xf32>
    %209 = arith.addf %207, %208 : vector<8x32xf32>
    %210 = math.tanh %209 : vector<8x32xf32>
    %211 = arith.mulf %206, %210 : vector<8x32xf32>
    %212 = arith.index_cast %c7_i32 : i32 to index
    %c0_61 = arith.constant 0 : index
    %c0_62 = arith.constant 0 : index
    %213 = vector.load %arg8[%212, %c0_61, %c0_62] : memref<8x8x32xf32, #tpu.memory_space<vmem>>, vector<1x8x32xf32>
    %214 = vector.shape_cast %213 : vector<1x8x32xf32> to vector<8x32xf32>
    %215 = vector.shape_cast %211 : vector<8x32xf32> to vector<1x8x32xf32>
    tpu.vector_store %arg8[%212, %c0_61, %c0_62], %215 {strides = array<i32>} : memref<8x8x32xf32, #tpu.memory_space<vmem>>, vector<1x8x32xf32>,
    %c8_i32 = arith.constant 8 : i32
    %c0_63 = arith.constant 0 : index
    %c0_64 = arith.constant 0 : index
    %c0_65 = arith.constant 0 : index
    %216 = vector.load %arg8[%c0_63, %c0_64, %c0_65] : memref<8x8x32xf32, #tpu.memory_space<vmem>>, vector<8x8x32xf32>
    %217 = vector.shape_cast %216 : vector<8x8x32xf32> to vector<64x32xf32>
    %218 = arith.truncf %217 : vector<64x32xf32> to vector<64x32xbf16>
    %c0_66 = arith.constant 0 : index
    %c0_67 = arith.constant 0 : index
    %c0_68 = arith.constant 0 : index
    %219 = vector.load %arg2[%c0_66, %c0_67, %c0_68] : memref<3x32x128xbf16, #tpu.memory_space<vmem>>, vector<1x32x128xbf16>
    %220 = vector.shape_cast %219 : vector<1x32x128xbf16> to vector<32x128xbf16>
    %cst_69 = arith.constant dense<0.000000e+00> : vector<64x128xf32>
    %221 = tpu.matmul %218, %220, %cst_69 {dimension_numbers = #tpu.dot_dimension_numbers<[1], [0], [0], [1], [0, 0, 1, 1], [], []>} : vector<64x32xbf16>, vector<32x128xbf16>, vector<64x128xf32> -> vector<64x128xf32>
    %222 = vector.shape_cast %221 : vector<64x128xf32> to vector<8x8x128xf32>
    %c1 = arith.constant 1 : index
    %c0_70 = arith.constant 0 : index
    %c0_71 = arith.constant 0 : index
    %223 = vector.load %arg4[%c1, %c0_70, %c0_71] : memref<4x1x128xf32, #tpu.memory_space<vmem>>, vector<1x1x128xf32>
    %224 = vector.shape_cast %223 : vector<1x1x128xf32> to vector<1x128xf32>
    %225 = vector.shape_cast %224 : vector<1x128xf32> to vector<1x1x128xf32>
    %226 = vector.broadcast %225 : vector<1x1x128xf32> to vector<8x8x128xf32>
    %227 = arith.addf %222, %226 : vector<8x8x128xf32>
    %c0_72 = arith.constant 0 : index
    %c0_73 = arith.constant 0 : index
    %c0_74 = arith.constant 0 : index
    %228 = vector.load %arg9[%c0_72, %c0_73, %c0_74] : memref<8x8x128xf32, #tpu.memory_space<vmem>>, vector<8x8x128xf32>
    tpu.vector_store %arg9[%c0_72, %c0_73, %c0_74], %227 {strides = array<i32>} : memref<8x8x128xf32, #tpu.memory_space<vmem>>, vector<8x8x128xf32>,
    %c1_75 = arith.constant 1 : index
    %c0_76 = arith.constant 0 : index
    %c0_77 = arith.constant 0 : index
    %229 = vector.load %arg3[%c1_75, %c0_76, %c0_77] : memref<4x32x128xbf16, #tpu.memory_space<vmem>>, vector<1x32x128xbf16>
    %230 = vector.shape_cast %229 : vector<1x32x128xbf16> to vector<32x128xbf16>
    %cst_78 = arith.constant 0.000000e+00 : f32
    %231 = vector.broadcast %cst_78 : f32 to vector<8x32xf32>
    %cst_79 = arith.constant 0.000000e+00 : f32
    %232 = vector.broadcast %cst_79 : f32 to vector<8x32xf32>
    %c0_i32_80 = arith.constant 0 : i32
    %233 = arith.index_cast %c0_i32_80 : i32 to index
    %c0_81 = arith.constant 0 : index
    %c0_82 = arith.constant 0 : index
    %234 = vector.load %arg9[%233, %c0_81, %c0_82] : memref<8x8x128xf32, #tpu.memory_space<vmem>>, vector<1x8x128xf32>
    %235 = vector.shape_cast %234 : vector<1x8x128xf32> to vector<8x128xf32>
    %236 = arith.truncf %231 : vector<8x32xf32> to vector<8x32xbf16>
    %cst_83 = arith.constant dense<0.000000e+00> : vector<8x128xf32>
    %237 = tpu.matmul %236, %230, %cst_83 {dimension_numbers = #tpu.dot_dimension_numbers<[1], [0], [0], [1], [0, 0, 1, 1], [], []>} : vector<8x32xbf16>, vector<32x128xbf16>, vector<8x128xf32> -> vector<8x128xf32>
    %238 = arith.addf %235, %237 : vector<8x128xf32>
    %239 = arith.negf %238 : vector<8x128xf32>
    %240 = math.exp %239 : vector<8x128xf32>
    %cst_84 = arith.constant 1.000000e+00 : f32
    %241 = vector.broadcast %cst_84 : f32 to vector<8x128xf32>
    %242 = arith.addf %241, %240 : vector<8x128xf32>
    %243 = arith.divf %241, %242 : vector<8x128xf32>
    %244 = math.tanh %238 : vector<8x128xf32>
    %245 = vector.extract_strided_slice %243 {offsets = [0, 0], sizes = [8, 32], strides = [1, 1]} : vector<8x128xf32> to vector<8x32xf32>
    %246 = vector.extract_strided_slice %243 {offsets = [0, 32], sizes = [8, 32], strides = [1, 1]} : vector<8x128xf32> to vector<8x32xf32>
    %247 = vector.extract_strided_slice %244 {offsets = [0, 64], sizes = [8, 32], strides = [1, 1]} : vector<8x128xf32> to vector<8x32xf32>
    %248 = vector.extract_strided_slice %243 {offsets = [0, 96], sizes = [8, 32], strides = [1, 1]} : vector<8x128xf32> to vector<8x32xf32>
    %249 = arith.mulf %246, %232 : vector<8x32xf32>
    %250 = arith.mulf %245, %247 : vector<8x32xf32>
    %251 = arith.addf %249, %250 : vector<8x32xf32>
    %252 = math.tanh %251 : vector<8x32xf32>
    %253 = arith.mulf %248, %252 : vector<8x32xf32>
    %254 = arith.index_cast %c0_i32_80 : i32 to index
    %c0_85 = arith.constant 0 : index
    %c0_86 = arith.constant 0 : index
    %255 = vector.load %arg8[%254, %c0_85, %c0_86] : memref<8x8x32xf32, #tpu.memory_space<vmem>>, vector<1x8x32xf32>
    %256 = vector.shape_cast %255 : vector<1x8x32xf32> to vector<8x32xf32>
    %257 = vector.shape_cast %253 : vector<8x32xf32> to vector<1x8x32xf32>
    tpu.vector_store %arg8[%254, %c0_85, %c0_86], %257 {strides = array<i32>} : memref<8x8x32xf32, #tpu.memory_space<vmem>>, vector<1x8x32xf32>,
    %c1_i32_87 = arith.constant 1 : i32
    %258 = arith.index_cast %c1_i32_87 : i32 to index
    %c0_88 = arith.constant 0 : index
    %c0_89 = arith.constant 0 : index
    %259 = vector.load %arg9[%258, %c0_88, %c0_89] : memref<8x8x128xf32, #tpu.memory_space<vmem>>, vector<1x8x128xf32>
    %260 = vector.shape_cast %259 : vector<1x8x128xf32> to vector<8x128xf32>
    %261 = arith.truncf %253 : vector<8x32xf32> to vector<8x32xbf16>
    %cst_90 = arith.constant dense<0.000000e+00> : vector<8x128xf32>
    %262 = tpu.matmul %261, %230, %cst_90 {dimension_numbers = #tpu.dot_dimension_numbers<[1], [0], [0], [1], [0, 0, 1, 1], [], []>} : vector<8x32xbf16>, vector<32x128xbf16>, vector<8x128xf32> -> vector<8x128xf32>
    %263 = arith.addf %260, %262 : vector<8x128xf32>
    %264 = arith.negf %263 : vector<8x128xf32>
    %265 = math.exp %264 : vector<8x128xf32>
    %cst_91 = arith.constant 1.000000e+00 : f32
    %266 = vector.broadcast %cst_91 : f32 to vector<8x128xf32>
    %267 = arith.addf %266, %265 : vector<8x128xf32>
    %268 = arith.divf %266, %267 : vector<8x128xf32>
    %269 = math.tanh %263 : vector<8x128xf32>
    %270 = vector.extract_strided_slice %268 {offsets = [0, 0], sizes = [8, 32], strides = [1, 1]} : vector<8x128xf32> to vector<8x32xf32>
    %271 = vector.extract_strided_slice %268 {offsets = [0, 32], sizes = [8, 32], strides = [1, 1]} : vector<8x128xf32> to vector<8x32xf32>
    %272 = vector.extract_strided_slice %269 {offsets = [0, 64], sizes = [8, 32], strides = [1, 1]} : vector<8x128xf32> to vector<8x32xf32>
    %273 = vector.extract_strided_slice %268 {offsets = [0, 96], sizes = [8, 32], strides = [1, 1]} : vector<8x128xf32> to vector<8x32xf32>
    %274 = arith.mulf %271, %251 : vector<8x32xf32>
    %275 = arith.mulf %270, %272 : vector<8x32xf32>
    %276 = arith.addf %274, %275 : vector<8x32xf32>
    %277 = math.tanh %276 : vector<8x32xf32>
    %278 = arith.mulf %273, %277 : vector<8x32xf32>
    %279 = arith.index_cast %c1_i32_87 : i32 to index
    %c0_92 = arith.constant 0 : index
    %c0_93 = arith.constant 0 : index
    %280 = vector.load %arg8[%279, %c0_92, %c0_93] : memref<8x8x32xf32, #tpu.memory_space<vmem>>, vector<1x8x32xf32>
    %281 = vector.shape_cast %280 : vector<1x8x32xf32> to vector<8x32xf32>
    %282 = vector.shape_cast %278 : vector<8x32xf32> to vector<1x8x32xf32>
    tpu.vector_store %arg8[%279, %c0_92, %c0_93], %282 {strides = array<i32>} : memref<8x8x32xf32, #tpu.memory_space<vmem>>, vector<1x8x32xf32>,
    %c2_i32_94 = arith.constant 2 : i32
    %283 = arith.index_cast %c2_i32_94 : i32 to index
    %c0_95 = arith.constant 0 : index
    %c0_96 = arith.constant 0 : index
    %284 = vector.load %arg9[%283, %c0_95, %c0_96] : memref<8x8x128xf32, #tpu.memory_space<vmem>>, vector<1x8x128xf32>
    %285 = vector.shape_cast %284 : vector<1x8x128xf32> to vector<8x128xf32>
    %286 = arith.truncf %278 : vector<8x32xf32> to vector<8x32xbf16>
    %cst_97 = arith.constant dense<0.000000e+00> : vector<8x128xf32>
    %287 = tpu.matmul %286, %230, %cst_97 {dimension_numbers = #tpu.dot_dimension_numbers<[1], [0], [0], [1], [0, 0, 1, 1], [], []>} : vector<8x32xbf16>, vector<32x128xbf16>, vector<8x128xf32> -> vector<8x128xf32>
    %288 = arith.addf %285, %287 : vector<8x128xf32>
    %289 = arith.negf %288 : vector<8x128xf32>
    %290 = math.exp %289 : vector<8x128xf32>
    %cst_98 = arith.constant 1.000000e+00 : f32
    %291 = vector.broadcast %cst_98 : f32 to vector<8x128xf32>
    %292 = arith.addf %291, %290 : vector<8x128xf32>
    %293 = arith.divf %291, %292 : vector<8x128xf32>
    %294 = math.tanh %288 : vector<8x128xf32>
    %295 = vector.extract_strided_slice %293 {offsets = [0, 0], sizes = [8, 32], strides = [1, 1]} : vector<8x128xf32> to vector<8x32xf32>
    %296 = vector.extract_strided_slice %293 {offsets = [0, 32], sizes = [8, 32], strides = [1, 1]} : vector<8x128xf32> to vector<8x32xf32>
    %297 = vector.extract_strided_slice %294 {offsets = [0, 64], sizes = [8, 32], strides = [1, 1]} : vector<8x128xf32> to vector<8x32xf32>
    %298 = vector.extract_strided_slice %293 {offsets = [0, 96], sizes = [8, 32], strides = [1, 1]} : vector<8x128xf32> to vector<8x32xf32>
    %299 = arith.mulf %296, %276 : vector<8x32xf32>
    %300 = arith.mulf %295, %297 : vector<8x32xf32>
    %301 = arith.addf %299, %300 : vector<8x32xf32>
    %302 = math.tanh %301 : vector<8x32xf32>
    %303 = arith.mulf %298, %302 : vector<8x32xf32>
    %304 = arith.index_cast %c2_i32_94 : i32 to index
    %c0_99 = arith.constant 0 : index
    %c0_100 = arith.constant 0 : index
    %305 = vector.load %arg8[%304, %c0_99, %c0_100] : memref<8x8x32xf32, #tpu.memory_space<vmem>>, vector<1x8x32xf32>
    %306 = vector.shape_cast %305 : vector<1x8x32xf32> to vector<8x32xf32>
    %307 = vector.shape_cast %303 : vector<8x32xf32> to vector<1x8x32xf32>
    tpu.vector_store %arg8[%304, %c0_99, %c0_100], %307 {strides = array<i32>} : memref<8x8x32xf32, #tpu.memory_space<vmem>>, vector<1x8x32xf32>,
    %c3_i32_101 = arith.constant 3 : i32
    %308 = arith.index_cast %c3_i32_101 : i32 to index
    %c0_102 = arith.constant 0 : index
    %c0_103 = arith.constant 0 : index
    %309 = vector.load %arg9[%308, %c0_102, %c0_103] : memref<8x8x128xf32, #tpu.memory_space<vmem>>, vector<1x8x128xf32>
    %310 = vector.shape_cast %309 : vector<1x8x128xf32> to vector<8x128xf32>
    %311 = arith.truncf %303 : vector<8x32xf32> to vector<8x32xbf16>
    %cst_104 = arith.constant dense<0.000000e+00> : vector<8x128xf32>
    %312 = tpu.matmul %311, %230, %cst_104 {dimension_numbers = #tpu.dot_dimension_numbers<[1], [0], [0], [1], [0, 0, 1, 1], [], []>} : vector<8x32xbf16>, vector<32x128xbf16>, vector<8x128xf32> -> vector<8x128xf32>
    %313 = arith.addf %310, %312 : vector<8x128xf32>
    %314 = arith.negf %313 : vector<8x128xf32>
    %315 = math.exp %314 : vector<8x128xf32>
    %cst_105 = arith.constant 1.000000e+00 : f32
    %316 = vector.broadcast %cst_105 : f32 to vector<8x128xf32>
    %317 = arith.addf %316, %315 : vector<8x128xf32>
    %318 = arith.divf %316, %317 : vector<8x128xf32>
    %319 = math.tanh %313 : vector<8x128xf32>
    %320 = vector.extract_strided_slice %318 {offsets = [0, 0], sizes = [8, 32], strides = [1, 1]} : vector<8x128xf32> to vector<8x32xf32>
    %321 = vector.extract_strided_slice %318 {offsets = [0, 32], sizes = [8, 32], strides = [1, 1]} : vector<8x128xf32> to vector<8x32xf32>
    %322 = vector.extract_strided_slice %319 {offsets = [0, 64], sizes = [8, 32], strides = [1, 1]} : vector<8x128xf32> to vector<8x32xf32>
    %323 = vector.extract_strided_slice %318 {offsets = [0, 96], sizes = [8, 32], strides = [1, 1]} : vector<8x128xf32> to vector<8x32xf32>
    %324 = arith.mulf %321, %301 : vector<8x32xf32>
    %325 = arith.mulf %320, %322 : vector<8x32xf32>
    %326 = arith.addf %324, %325 : vector<8x32xf32>
    %327 = math.tanh %326 : vector<8x32xf32>
    %328 = arith.mulf %323, %327 : vector<8x32xf32>
    %329 = arith.index_cast %c3_i32_101 : i32 to index
    %c0_106 = arith.constant 0 : index
    %c0_107 = arith.constant 0 : index
    %330 = vector.load %arg8[%329, %c0_106, %c0_107] : memref<8x8x32xf32, #tpu.memory_space<vmem>>, vector<1x8x32xf32>
    %331 = vector.shape_cast %330 : vector<1x8x32xf32> to vector<8x32xf32>
    %332 = vector.shape_cast %328 : vector<8x32xf32> to vector<1x8x32xf32>
    tpu.vector_store %arg8[%329, %c0_106, %c0_107], %332 {strides = array<i32>} : memref<8x8x32xf32, #tpu.memory_space<vmem>>, vector<1x8x32xf32>,
    %c4_i32_108 = arith.constant 4 : i32
    %333 = arith.index_cast %c4_i32_108 : i32 to index
    %c0_109 = arith.constant 0 : index
    %c0_110 = arith.constant 0 : index
    %334 = vector.load %arg9[%333, %c0_109, %c0_110] : memref<8x8x128xf32, #tpu.memory_space<vmem>>, vector<1x8x128xf32>
    %335 = vector.shape_cast %334 : vector<1x8x128xf32> to vector<8x128xf32>
    %336 = arith.truncf %328 : vector<8x32xf32> to vector<8x32xbf16>
    %cst_111 = arith.constant dense<0.000000e+00> : vector<8x128xf32>
    %337 = tpu.matmul %336, %230, %cst_111 {dimension_numbers = #tpu.dot_dimension_numbers<[1], [0], [0], [1], [0, 0, 1, 1], [], []>} : vector<8x32xbf16>, vector<32x128xbf16>, vector<8x128xf32> -> vector<8x128xf32>
    %338 = arith.addf %335, %337 : vector<8x128xf32>
    %339 = arith.negf %338 : vector<8x128xf32>
    %340 = math.exp %339 : vector<8x128xf32>
    %cst_112 = arith.constant 1.000000e+00 : f32
    %341 = vector.broadcast %cst_112 : f32 to vector<8x128xf32>
    %342 = arith.addf %341, %340 : vector<8x128xf32>
    %343 = arith.divf %341, %342 : vector<8x128xf32>
    %344 = math.tanh %338 : vector<8x128xf32>
    %345 = vector.extract_strided_slice %343 {offsets = [0, 0], sizes = [8, 32], strides = [1, 1]} : vector<8x128xf32> to vector<8x32xf32>
    %346 = vector.extract_strided_slice %343 {offsets = [0, 32], sizes = [8, 32], strides = [1, 1]} : vector<8x128xf32> to vector<8x32xf32>
    %347 = vector.extract_strided_slice %344 {offsets = [0, 64], sizes = [8, 32], strides = [1, 1]} : vector<8x128xf32> to vector<8x32xf32>
    %348 = vector.extract_strided_slice %343 {offsets = [0, 96], sizes = [8, 32], strides = [1, 1]} : vector<8x128xf32> to vector<8x32xf32>
    %349 = arith.mulf %346, %326 : vector<8x32xf32>
    %350 = arith.mulf %345, %347 : vector<8x32xf32>
    %351 = arith.addf %349, %350 : vector<8x32xf32>
    %352 = math.tanh %351 : vector<8x32xf32>
    %353 = arith.mulf %348, %352 : vector<8x32xf32>
    %354 = arith.index_cast %c4_i32_108 : i32 to index
    %c0_113 = arith.constant 0 : index
    %c0_114 = arith.constant 0 : index
    %355 = vector.load %arg8[%354, %c0_113, %c0_114] : memref<8x8x32xf32, #tpu.memory_space<vmem>>, vector<1x8x32xf32>
    %356 = vector.shape_cast %355 : vector<1x8x32xf32> to vector<8x32xf32>
    %357 = vector.shape_cast %353 : vector<8x32xf32> to vector<1x8x32xf32>
    tpu.vector_store %arg8[%354, %c0_113, %c0_114], %357 {strides = array<i32>} : memref<8x8x32xf32, #tpu.memory_space<vmem>>, vector<1x8x32xf32>,
    %c5_i32_115 = arith.constant 5 : i32
    %358 = arith.index_cast %c5_i32_115 : i32 to index
    %c0_116 = arith.constant 0 : index
    %c0_117 = arith.constant 0 : index
    %359 = vector.load %arg9[%358, %c0_116, %c0_117] : memref<8x8x128xf32, #tpu.memory_space<vmem>>, vector<1x8x128xf32>
    %360 = vector.shape_cast %359 : vector<1x8x128xf32> to vector<8x128xf32>
    %361 = arith.truncf %353 : vector<8x32xf32> to vector<8x32xbf16>
    %cst_118 = arith.constant dense<0.000000e+00> : vector<8x128xf32>
    %362 = tpu.matmul %361, %230, %cst_118 {dimension_numbers = #tpu.dot_dimension_numbers<[1], [0], [0], [1], [0, 0, 1, 1], [], []>} : vector<8x32xbf16>, vector<32x128xbf16>, vector<8x128xf32> -> vector<8x128xf32>
    %363 = arith.addf %360, %362 : vector<8x128xf32>
    %364 = arith.negf %363 : vector<8x128xf32>
    %365 = math.exp %364 : vector<8x128xf32>
    %cst_119 = arith.constant 1.000000e+00 : f32
    %366 = vector.broadcast %cst_119 : f32 to vector<8x128xf32>
    %367 = arith.addf %366, %365 : vector<8x128xf32>
    %368 = arith.divf %366, %367 : vector<8x128xf32>
    %369 = math.tanh %363 : vector<8x128xf32>
    %370 = vector.extract_strided_slice %368 {offsets = [0, 0], sizes = [8, 32], strides = [1, 1]} : vector<8x128xf32> to vector<8x32xf32>
    %371 = vector.extract_strided_slice %368 {offsets = [0, 32], sizes = [8, 32], strides = [1, 1]} : vector<8x128xf32> to vector<8x32xf32>
    %372 = vector.extract_strided_slice %369 {offsets = [0, 64], sizes = [8, 32], strides = [1, 1]} : vector<8x128xf32> to vector<8x32xf32>
    %373 = vector.extract_strided_slice %368 {offsets = [0, 96], sizes = [8, 32], strides = [1, 1]} : vector<8x128xf32> to vector<8x32xf32>
    %374 = arith.mulf %371, %351 : vector<8x32xf32>
    %375 = arith.mulf %370, %372 : vector<8x32xf32>
    %376 = arith.addf %374, %375 : vector<8x32xf32>
    %377 = math.tanh %376 : vector<8x32xf32>
    %378 = arith.mulf %373, %377 : vector<8x32xf32>
    %379 = arith.index_cast %c5_i32_115 : i32 to index
    %c0_120 = arith.constant 0 : index
    %c0_121 = arith.constant 0 : index
    %380 = vector.load %arg8[%379, %c0_120, %c0_121] : memref<8x8x32xf32, #tpu.memory_space<vmem>>, vector<1x8x32xf32>
    %381 = vector.shape_cast %380 : vector<1x8x32xf32> to vector<8x32xf32>
    %382 = vector.shape_cast %378 : vector<8x32xf32> to vector<1x8x32xf32>
    tpu.vector_store %arg8[%379, %c0_120, %c0_121], %382 {strides = array<i32>} : memref<8x8x32xf32, #tpu.memory_space<vmem>>, vector<1x8x32xf32>,
    %c6_i32_122 = arith.constant 6 : i32
    %383 = arith.index_cast %c6_i32_122 : i32 to index
    %c0_123 = arith.constant 0 : index
    %c0_124 = arith.constant 0 : index
    %384 = vector.load %arg9[%383, %c0_123, %c0_124] : memref<8x8x128xf32, #tpu.memory_space<vmem>>, vector<1x8x128xf32>
    %385 = vector.shape_cast %384 : vector<1x8x128xf32> to vector<8x128xf32>
    %386 = arith.truncf %378 : vector<8x32xf32> to vector<8x32xbf16>
    %cst_125 = arith.constant dense<0.000000e+00> : vector<8x128xf32>
    %387 = tpu.matmul %386, %230, %cst_125 {dimension_numbers = #tpu.dot_dimension_numbers<[1], [0], [0], [1], [0, 0, 1, 1], [], []>} : vector<8x32xbf16>, vector<32x128xbf16>, vector<8x128xf32> -> vector<8x128xf32>
    %388 = arith.addf %385, %387 : vector<8x128xf32>
    %389 = arith.negf %388 : vector<8x128xf32>
    %390 = math.exp %389 : vector<8x128xf32>
    %cst_126 = arith.constant 1.000000e+00 : f32
    %391 = vector.broadcast %cst_126 : f32 to vector<8x128xf32>
    %392 = arith.addf %391, %390 : vector<8x128xf32>
    %393 = arith.divf %391, %392 : vector<8x128xf32>
    %394 = math.tanh %388 : vector<8x128xf32>
    %395 = vector.extract_strided_slice %393 {offsets = [0, 0], sizes = [8, 32], strides = [1, 1]} : vector<8x128xf32> to vector<8x32xf32>
    %396 = vector.extract_strided_slice %393 {offsets = [0, 32], sizes = [8, 32], strides = [1, 1]} : vector<8x128xf32> to vector<8x32xf32>
    %397 = vector.extract_strided_slice %394 {offsets = [0, 64], sizes = [8, 32], strides = [1, 1]} : vector<8x128xf32> to vector<8x32xf32>
    %398 = vector.extract_strided_slice %393 {offsets = [0, 96], sizes = [8, 32], strides = [1, 1]} : vector<8x128xf32> to vector<8x32xf32>
    %399 = arith.mulf %396, %376 : vector<8x32xf32>
    %400 = arith.mulf %395, %397 : vector<8x32xf32>
    %401 = arith.addf %399, %400 : vector<8x32xf32>
    %402 = math.tanh %401 : vector<8x32xf32>
    %403 = arith.mulf %398, %402 : vector<8x32xf32>
    %404 = arith.index_cast %c6_i32_122 : i32 to index
    %c0_127 = arith.constant 0 : index
    %c0_128 = arith.constant 0 : index
    %405 = vector.load %arg8[%404, %c0_127, %c0_128] : memref<8x8x32xf32, #tpu.memory_space<vmem>>, vector<1x8x32xf32>
    %406 = vector.shape_cast %405 : vector<1x8x32xf32> to vector<8x32xf32>
    %407 = vector.shape_cast %403 : vector<8x32xf32> to vector<1x8x32xf32>
    tpu.vector_store %arg8[%404, %c0_127, %c0_128], %407 {strides = array<i32>} : memref<8x8x32xf32, #tpu.memory_space<vmem>>, vector<1x8x32xf32>,
    %c7_i32_129 = arith.constant 7 : i32
    %408 = arith.index_cast %c7_i32_129 : i32 to index
    %c0_130 = arith.constant 0 : index
    %c0_131 = arith.constant 0 : index
    %409 = vector.load %arg9[%408, %c0_130, %c0_131] : memref<8x8x128xf32, #tpu.memory_space<vmem>>, vector<1x8x128xf32>
    %410 = vector.shape_cast %409 : vector<1x8x128xf32> to vector<8x128xf32>
    %411 = arith.truncf %403 : vector<8x32xf32> to vector<8x32xbf16>
    %cst_132 = arith.constant dense<0.000000e+00> : vector<8x128xf32>
    %412 = tpu.matmul %411, %230, %cst_132 {dimension_numbers = #tpu.dot_dimension_numbers<[1], [0], [0], [1], [0, 0, 1, 1], [], []>} : vector<8x32xbf16>, vector<32x128xbf16>, vector<8x128xf32> -> vector<8x128xf32>
    %413 = arith.addf %410, %412 : vector<8x128xf32>
    %414 = arith.negf %413 : vector<8x128xf32>
    %415 = math.exp %414 : vector<8x128xf32>
    %cst_133 = arith.constant 1.000000e+00 : f32
    %416 = vector.broadcast %cst_133 : f32 to vector<8x128xf32>
    %417 = arith.addf %416, %415 : vector<8x128xf32>
    %418 = arith.divf %416, %417 : vector<8x128xf32>
    %419 = math.tanh %413 : vector<8x128xf32>
    %420 = vector.extract_strided_slice %418 {offsets = [0, 0], sizes = [8, 32], strides = [1, 1]} : vector<8x128xf32> to vector<8x32xf32>
    %421 = vector.extract_strided_slice %418 {offsets = [0, 32], sizes = [8, 32], strides = [1, 1]} : vector<8x128xf32> to vector<8x32xf32>
    %422 = vector.extract_strided_slice %419 {offsets = [0, 64], sizes = [8, 32], strides = [1, 1]} : vector<8x128xf32> to vector<8x32xf32>
    %423 = vector.extract_strided_slice %418 {offsets = [0, 96], sizes = [8, 32], strides = [1, 1]} : vector<8x128xf32> to vector<8x32xf32>
    %424 = arith.mulf %421, %401 : vector<8x32xf32>
    %425 = arith.mulf %420, %422 : vector<8x32xf32>
    %426 = arith.addf %424, %425 : vector<8x32xf32>
    %427 = math.tanh %426 : vector<8x32xf32>
    %428 = arith.mulf %423, %427 : vector<8x32xf32>
    %429 = arith.index_cast %c7_i32_129 : i32 to index
    %c0_134 = arith.constant 0 : index
    %c0_135 = arith.constant 0 : index
    %430 = vector.load %arg8[%429, %c0_134, %c0_135] : memref<8x8x32xf32, #tpu.memory_space<vmem>>, vector<1x8x32xf32>
    %431 = vector.shape_cast %430 : vector<1x8x32xf32> to vector<8x32xf32>
    %432 = vector.shape_cast %428 : vector<8x32xf32> to vector<1x8x32xf32>
    tpu.vector_store %arg8[%429, %c0_134, %c0_135], %432 {strides = array<i32>} : memref<8x8x32xf32, #tpu.memory_space<vmem>>, vector<1x8x32xf32>,
    %c8_i32_136 = arith.constant 8 : i32
    %c0_137 = arith.constant 0 : index
    %c0_138 = arith.constant 0 : index
    %c0_139 = arith.constant 0 : index
    %433 = vector.load %arg8[%c0_137, %c0_138, %c0_139] : memref<8x8x32xf32, #tpu.memory_space<vmem>>, vector<8x8x32xf32>
    %434 = vector.shape_cast %433 : vector<8x8x32xf32> to vector<64x32xf32>
    %435 = arith.truncf %434 : vector<64x32xf32> to vector<64x32xbf16>
    %c1_140 = arith.constant 1 : index
    %c0_141 = arith.constant 0 : index
    %c0_142 = arith.constant 0 : index
    %436 = vector.load %arg2[%c1_140, %c0_141, %c0_142] : memref<3x32x128xbf16, #tpu.memory_space<vmem>>, vector<1x32x128xbf16>
    %437 = vector.shape_cast %436 : vector<1x32x128xbf16> to vector<32x128xbf16>
    %cst_143 = arith.constant dense<0.000000e+00> : vector<64x128xf32>
    %438 = tpu.matmul %435, %437, %cst_143 {dimension_numbers = #tpu.dot_dimension_numbers<[1], [0], [0], [1], [0, 0, 1, 1], [], []>} : vector<64x32xbf16>, vector<32x128xbf16>, vector<64x128xf32> -> vector<64x128xf32>
    %439 = vector.shape_cast %438 : vector<64x128xf32> to vector<8x8x128xf32>
    %c2 = arith.constant 2 : index
    %c0_144 = arith.constant 0 : index
    %c0_145 = arith.constant 0 : index
    %440 = vector.load %arg4[%c2, %c0_144, %c0_145] : memref<4x1x128xf32, #tpu.memory_space<vmem>>, vector<1x1x128xf32>
    %441 = vector.shape_cast %440 : vector<1x1x128xf32> to vector<1x128xf32>
    %442 = vector.shape_cast %441 : vector<1x128xf32> to vector<1x1x128xf32>
    %443 = vector.broadcast %442 : vector<1x1x128xf32> to vector<8x8x128xf32>
    %444 = arith.addf %439, %443 : vector<8x8x128xf32>
    %c0_146 = arith.constant 0 : index
    %c0_147 = arith.constant 0 : index
    %c0_148 = arith.constant 0 : index
    %445 = vector.load %arg9[%c0_146, %c0_147, %c0_148] : memref<8x8x128xf32, #tpu.memory_space<vmem>>, vector<8x8x128xf32>
    tpu.vector_store %arg9[%c0_146, %c0_147, %c0_148], %444 {strides = array<i32>} : memref<8x8x128xf32, #tpu.memory_space<vmem>>, vector<8x8x128xf32>,
    %c2_149 = arith.constant 2 : index
    %c0_150 = arith.constant 0 : index
    %c0_151 = arith.constant 0 : index
    %446 = vector.load %arg3[%c2_149, %c0_150, %c0_151] : memref<4x32x128xbf16, #tpu.memory_space<vmem>>, vector<1x32x128xbf16>
    %447 = vector.shape_cast %446 : vector<1x32x128xbf16> to vector<32x128xbf16>
    %cst_152 = arith.constant 0.000000e+00 : f32
    %448 = vector.broadcast %cst_152 : f32 to vector<8x32xf32>
    %cst_153 = arith.constant 0.000000e+00 : f32
    %449 = vector.broadcast %cst_153 : f32 to vector<8x32xf32>
    %c0_i32_154 = arith.constant 0 : i32
    %450 = arith.index_cast %c0_i32_154 : i32 to index
    %c0_155 = arith.constant 0 : index
    %c0_156 = arith.constant 0 : index
    %451 = vector.load %arg9[%450, %c0_155, %c0_156] : memref<8x8x128xf32, #tpu.memory_space<vmem>>, vector<1x8x128xf32>
    %452 = vector.shape_cast %451 : vector<1x8x128xf32> to vector<8x128xf32>
    %453 = arith.truncf %448 : vector<8x32xf32> to vector<8x32xbf16>
    %cst_157 = arith.constant dense<0.000000e+00> : vector<8x128xf32>
    %454 = tpu.matmul %453, %447, %cst_157 {dimension_numbers = #tpu.dot_dimension_numbers<[1], [0], [0], [1], [0, 0, 1, 1], [], []>} : vector<8x32xbf16>, vector<32x128xbf16>, vector<8x128xf32> -> vector<8x128xf32>
    %455 = arith.addf %452, %454 : vector<8x128xf32>
    %456 = arith.negf %455 : vector<8x128xf32>
    %457 = math.exp %456 : vector<8x128xf32>
    %cst_158 = arith.constant 1.000000e+00 : f32
    %458 = vector.broadcast %cst_158 : f32 to vector<8x128xf32>
    %459 = arith.addf %458, %457 : vector<8x128xf32>
    %460 = arith.divf %458, %459 : vector<8x128xf32>
    %461 = math.tanh %455 : vector<8x128xf32>
    %462 = vector.extract_strided_slice %460 {offsets = [0, 0], sizes = [8, 32], strides = [1, 1]} : vector<8x128xf32> to vector<8x32xf32>
    %463 = vector.extract_strided_slice %460 {offsets = [0, 32], sizes = [8, 32], strides = [1, 1]} : vector<8x128xf32> to vector<8x32xf32>
    %464 = vector.extract_strided_slice %461 {offsets = [0, 64], sizes = [8, 32], strides = [1, 1]} : vector<8x128xf32> to vector<8x32xf32>
    %465 = vector.extract_strided_slice %460 {offsets = [0, 96], sizes = [8, 32], strides = [1, 1]} : vector<8x128xf32> to vector<8x32xf32>
    %466 = arith.mulf %463, %449 : vector<8x32xf32>
    %467 = arith.mulf %462, %464 : vector<8x32xf32>
    %468 = arith.addf %466, %467 : vector<8x32xf32>
    %469 = math.tanh %468 : vector<8x32xf32>
    %470 = arith.mulf %465, %469 : vector<8x32xf32>
    %471 = arith.index_cast %c0_i32_154 : i32 to index
    %c0_159 = arith.constant 0 : index
    %c0_160 = arith.constant 0 : index
    %472 = vector.load %arg8[%471, %c0_159, %c0_160] : memref<8x8x32xf32, #tpu.memory_space<vmem>>, vector<1x8x32xf32>
    %473 = vector.shape_cast %472 : vector<1x8x32xf32> to vector<8x32xf32>
    %474 = vector.shape_cast %470 : vector<8x32xf32> to vector<1x8x32xf32>
    tpu.vector_store %arg8[%471, %c0_159, %c0_160], %474 {strides = array<i32>} : memref<8x8x32xf32, #tpu.memory_space<vmem>>, vector<1x8x32xf32>,
    %c1_i32_161 = arith.constant 1 : i32
    %475 = arith.index_cast %c1_i32_161 : i32 to index
    %c0_162 = arith.constant 0 : index
    %c0_163 = arith.constant 0 : index
    %476 = vector.load %arg9[%475, %c0_162, %c0_163] : memref<8x8x128xf32, #tpu.memory_space<vmem>>, vector<1x8x128xf32>
    %477 = vector.shape_cast %476 : vector<1x8x128xf32> to vector<8x128xf32>
    %478 = arith.truncf %470 : vector<8x32xf32> to vector<8x32xbf16>
    %cst_164 = arith.constant dense<0.000000e+00> : vector<8x128xf32>
    %479 = tpu.matmul %478, %447, %cst_164 {dimension_numbers = #tpu.dot_dimension_numbers<[1], [0], [0], [1], [0, 0, 1, 1], [], []>} : vector<8x32xbf16>, vector<32x128xbf16>, vector<8x128xf32> -> vector<8x128xf32>
    %480 = arith.addf %477, %479 : vector<8x128xf32>
    %481 = arith.negf %480 : vector<8x128xf32>
    %482 = math.exp %481 : vector<8x128xf32>
    %cst_165 = arith.constant 1.000000e+00 : f32
    %483 = vector.broadcast %cst_165 : f32 to vector<8x128xf32>
    %484 = arith.addf %483, %482 : vector<8x128xf32>
    %485 = arith.divf %483, %484 : vector<8x128xf32>
    %486 = math.tanh %480 : vector<8x128xf32>
    %487 = vector.extract_strided_slice %485 {offsets = [0, 0], sizes = [8, 32], strides = [1, 1]} : vector<8x128xf32> to vector<8x32xf32>
    %488 = vector.extract_strided_slice %485 {offsets = [0, 32], sizes = [8, 32], strides = [1, 1]} : vector<8x128xf32> to vector<8x32xf32>
    %489 = vector.extract_strided_slice %486 {offsets = [0, 64], sizes = [8, 32], strides = [1, 1]} : vector<8x128xf32> to vector<8x32xf32>
    %490 = vector.extract_strided_slice %485 {offsets = [0, 96], sizes = [8, 32], strides = [1, 1]} : vector<8x128xf32> to vector<8x32xf32>
    %491 = arith.mulf %488, %468 : vector<8x32xf32>
    %492 = arith.mulf %487, %489 : vector<8x32xf32>
    %493 = arith.addf %491, %492 : vector<8x32xf32>
    %494 = math.tanh %493 : vector<8x32xf32>
    %495 = arith.mulf %490, %494 : vector<8x32xf32>
    %496 = arith.index_cast %c1_i32_161 : i32 to index
    %c0_166 = arith.constant 0 : index
    %c0_167 = arith.constant 0 : index
    %497 = vector.load %arg8[%496, %c0_166, %c0_167] : memref<8x8x32xf32, #tpu.memory_space<vmem>>, vector<1x8x32xf32>
    %498 = vector.shape_cast %497 : vector<1x8x32xf32> to vector<8x32xf32>
    %499 = vector.shape_cast %495 : vector<8x32xf32> to vector<1x8x32xf32>
    tpu.vector_store %arg8[%496, %c0_166, %c0_167], %499 {strides = array<i32>} : memref<8x8x32xf32, #tpu.memory_space<vmem>>, vector<1x8x32xf32>,
    %c2_i32_168 = arith.constant 2 : i32
    %500 = arith.index_cast %c2_i32_168 : i32 to index
    %c0_169 = arith.constant 0 : index
    %c0_170 = arith.constant 0 : index
    %501 = vector.load %arg9[%500, %c0_169, %c0_170] : memref<8x8x128xf32, #tpu.memory_space<vmem>>, vector<1x8x128xf32>
    %502 = vector.shape_cast %501 : vector<1x8x128xf32> to vector<8x128xf32>
    %503 = arith.truncf %495 : vector<8x32xf32> to vector<8x32xbf16>
    %cst_171 = arith.constant dense<0.000000e+00> : vector<8x128xf32>
    %504 = tpu.matmul %503, %447, %cst_171 {dimension_numbers = #tpu.dot_dimension_numbers<[1], [0], [0], [1], [0, 0, 1, 1], [], []>} : vector<8x32xbf16>, vector<32x128xbf16>, vector<8x128xf32> -> vector<8x128xf32>
    %505 = arith.addf %502, %504 : vector<8x128xf32>
    %506 = arith.negf %505 : vector<8x128xf32>
    %507 = math.exp %506 : vector<8x128xf32>
    %cst_172 = arith.constant 1.000000e+00 : f32
    %508 = vector.broadcast %cst_172 : f32 to vector<8x128xf32>
    %509 = arith.addf %508, %507 : vector<8x128xf32>
    %510 = arith.divf %508, %509 : vector<8x128xf32>
    %511 = math.tanh %505 : vector<8x128xf32>
    %512 = vector.extract_strided_slice %510 {offsets = [0, 0], sizes = [8, 32], strides = [1, 1]} : vector<8x128xf32> to vector<8x32xf32>
    %513 = vector.extract_strided_slice %510 {offsets = [0, 32], sizes = [8, 32], strides = [1, 1]} : vector<8x128xf32> to vector<8x32xf32>
    %514 = vector.extract_strided_slice %511 {offsets = [0, 64], sizes = [8, 32], strides = [1, 1]} : vector<8x128xf32> to vector<8x32xf32>
    %515 = vector.extract_strided_slice %510 {offsets = [0, 96], sizes = [8, 32], strides = [1, 1]} : vector<8x128xf32> to vector<8x32xf32>
    %516 = arith.mulf %513, %493 : vector<8x32xf32>
    %517 = arith.mulf %512, %514 : vector<8x32xf32>
    %518 = arith.addf %516, %517 : vector<8x32xf32>
    %519 = math.tanh %518 : vector<8x32xf32>
    %520 = arith.mulf %515, %519 : vector<8x32xf32>
    %521 = arith.index_cast %c2_i32_168 : i32 to index
    %c0_173 = arith.constant 0 : index
    %c0_174 = arith.constant 0 : index
    %522 = vector.load %arg8[%521, %c0_173, %c0_174] : memref<8x8x32xf32, #tpu.memory_space<vmem>>, vector<1x8x32xf32>
    %523 = vector.shape_cast %522 : vector<1x8x32xf32> to vector<8x32xf32>
    %524 = vector.shape_cast %520 : vector<8x32xf32> to vector<1x8x32xf32>
    tpu.vector_store %arg8[%521, %c0_173, %c0_174], %524 {strides = array<i32>} : memref<8x8x32xf32, #tpu.memory_space<vmem>>, vector<1x8x32xf32>,
    %c3_i32_175 = arith.constant 3 : i32
    %525 = arith.index_cast %c3_i32_175 : i32 to index
    %c0_176 = arith.constant 0 : index
    %c0_177 = arith.constant 0 : index
    %526 = vector.load %arg9[%525, %c0_176, %c0_177] : memref<8x8x128xf32, #tpu.memory_space<vmem>>, vector<1x8x128xf32>
    %527 = vector.shape_cast %526 : vector<1x8x128xf32> to vector<8x128xf32>
    %528 = arith.truncf %520 : vector<8x32xf32> to vector<8x32xbf16>
    %cst_178 = arith.constant dense<0.000000e+00> : vector<8x128xf32>
    %529 = tpu.matmul %528, %447, %cst_178 {dimension_numbers = #tpu.dot_dimension_numbers<[1], [0], [0], [1], [0, 0, 1, 1], [], []>} : vector<8x32xbf16>, vector<32x128xbf16>, vector<8x128xf32> -> vector<8x128xf32>
    %530 = arith.addf %527, %529 : vector<8x128xf32>
    %531 = arith.negf %530 : vector<8x128xf32>
    %532 = math.exp %531 : vector<8x128xf32>
    %cst_179 = arith.constant 1.000000e+00 : f32
    %533 = vector.broadcast %cst_179 : f32 to vector<8x128xf32>
    %534 = arith.addf %533, %532 : vector<8x128xf32>
    %535 = arith.divf %533, %534 : vector<8x128xf32>
    %536 = math.tanh %530 : vector<8x128xf32>
    %537 = vector.extract_strided_slice %535 {offsets = [0, 0], sizes = [8, 32], strides = [1, 1]} : vector<8x128xf32> to vector<8x32xf32>
    %538 = vector.extract_strided_slice %535 {offsets = [0, 32], sizes = [8, 32], strides = [1, 1]} : vector<8x128xf32> to vector<8x32xf32>
    %539 = vector.extract_strided_slice %536 {offsets = [0, 64], sizes = [8, 32], strides = [1, 1]} : vector<8x128xf32> to vector<8x32xf32>
    %540 = vector.extract_strided_slice %535 {offsets = [0, 96], sizes = [8, 32], strides = [1, 1]} : vector<8x128xf32> to vector<8x32xf32>
    %541 = arith.mulf %538, %518 : vector<8x32xf32>
    %542 = arith.mulf %537, %539 : vector<8x32xf32>
    %543 = arith.addf %541, %542 : vector<8x32xf32>
    %544 = math.tanh %543 : vector<8x32xf32>
    %545 = arith.mulf %540, %544 : vector<8x32xf32>
    %546 = arith.index_cast %c3_i32_175 : i32 to index
    %c0_180 = arith.constant 0 : index
    %c0_181 = arith.constant 0 : index
    %547 = vector.load %arg8[%546, %c0_180, %c0_181] : memref<8x8x32xf32, #tpu.memory_space<vmem>>, vector<1x8x32xf32>
    %548 = vector.shape_cast %547 : vector<1x8x32xf32> to vector<8x32xf32>
    %549 = vector.shape_cast %545 : vector<8x32xf32> to vector<1x8x32xf32>
    tpu.vector_store %arg8[%546, %c0_180, %c0_181], %549 {strides = array<i32>} : memref<8x8x32xf32, #tpu.memory_space<vmem>>, vector<1x8x32xf32>,
    %c4_i32_182 = arith.constant 4 : i32
    %550 = arith.index_cast %c4_i32_182 : i32 to index
    %c0_183 = arith.constant 0 : index
    %c0_184 = arith.constant 0 : index
    %551 = vector.load %arg9[%550, %c0_183, %c0_184] : memref<8x8x128xf32, #tpu.memory_space<vmem>>, vector<1x8x128xf32>
    %552 = vector.shape_cast %551 : vector<1x8x128xf32> to vector<8x128xf32>
    %553 = arith.truncf %545 : vector<8x32xf32> to vector<8x32xbf16>
    %cst_185 = arith.constant dense<0.000000e+00> : vector<8x128xf32>
    %554 = tpu.matmul %553, %447, %cst_185 {dimension_numbers = #tpu.dot_dimension_numbers<[1], [0], [0], [1], [0, 0, 1, 1], [], []>} : vector<8x32xbf16>, vector<32x128xbf16>, vector<8x128xf32> -> vector<8x128xf32>
    %555 = arith.addf %552, %554 : vector<8x128xf32>
    %556 = arith.negf %555 : vector<8x128xf32>
    %557 = math.exp %556 : vector<8x128xf32>
    %cst_186 = arith.constant 1.000000e+00 : f32
    %558 = vector.broadcast %cst_186 : f32 to vector<8x128xf32>
    %559 = arith.addf %558, %557 : vector<8x128xf32>
    %560 = arith.divf %558, %559 : vector<8x128xf32>
    %561 = math.tanh %555 : vector<8x128xf32>
    %562 = vector.extract_strided_slice %560 {offsets = [0, 0], sizes = [8, 32], strides = [1, 1]} : vector<8x128xf32> to vector<8x32xf32>
    %563 = vector.extract_strided_slice %560 {offsets = [0, 32], sizes = [8, 32], strides = [1, 1]} : vector<8x128xf32> to vector<8x32xf32>
    %564 = vector.extract_strided_slice %561 {offsets = [0, 64], sizes = [8, 32], strides = [1, 1]} : vector<8x128xf32> to vector<8x32xf32>
    %565 = vector.extract_strided_slice %560 {offsets = [0, 96], sizes = [8, 32], strides = [1, 1]} : vector<8x128xf32> to vector<8x32xf32>
    %566 = arith.mulf %563, %543 : vector<8x32xf32>
    %567 = arith.mulf %562, %564 : vector<8x32xf32>
    %568 = arith.addf %566, %567 : vector<8x32xf32>
    %569 = math.tanh %568 : vector<8x32xf32>
    %570 = arith.mulf %565, %569 : vector<8x32xf32>
    %571 = arith.index_cast %c4_i32_182 : i32 to index
    %c0_187 = arith.constant 0 : index
    %c0_188 = arith.constant 0 : index
    %572 = vector.load %arg8[%571, %c0_187, %c0_188] : memref<8x8x32xf32, #tpu.memory_space<vmem>>, vector<1x8x32xf32>
    %573 = vector.shape_cast %572 : vector<1x8x32xf32> to vector<8x32xf32>
    %574 = vector.shape_cast %570 : vector<8x32xf32> to vector<1x8x32xf32>
    tpu.vector_store %arg8[%571, %c0_187, %c0_188], %574 {strides = array<i32>} : memref<8x8x32xf32, #tpu.memory_space<vmem>>, vector<1x8x32xf32>,
    %c5_i32_189 = arith.constant 5 : i32
    %575 = arith.index_cast %c5_i32_189 : i32 to index
    %c0_190 = arith.constant 0 : index
    %c0_191 = arith.constant 0 : index
    %576 = vector.load %arg9[%575, %c0_190, %c0_191] : memref<8x8x128xf32, #tpu.memory_space<vmem>>, vector<1x8x128xf32>
    %577 = vector.shape_cast %576 : vector<1x8x128xf32> to vector<8x128xf32>
    %578 = arith.truncf %570 : vector<8x32xf32> to vector<8x32xbf16>
    %cst_192 = arith.constant dense<0.000000e+00> : vector<8x128xf32>
    %579 = tpu.matmul %578, %447, %cst_192 {dimension_numbers = #tpu.dot_dimension_numbers<[1], [0], [0], [1], [0, 0, 1, 1], [], []>} : vector<8x32xbf16>, vector<32x128xbf16>, vector<8x128xf32> -> vector<8x128xf32>
    %580 = arith.addf %577, %579 : vector<8x128xf32>
    %581 = arith.negf %580 : vector<8x128xf32>
    %582 = math.exp %581 : vector<8x128xf32>
    %cst_193 = arith.constant 1.000000e+00 : f32
    %583 = vector.broadcast %cst_193 : f32 to vector<8x128xf32>
    %584 = arith.addf %583, %582 : vector<8x128xf32>
    %585 = arith.divf %583, %584 : vector<8x128xf32>
    %586 = math.tanh %580 : vector<8x128xf32>
    %587 = vector.extract_strided_slice %585 {offsets = [0, 0], sizes = [8, 32], strides = [1, 1]} : vector<8x128xf32> to vector<8x32xf32>
    %588 = vector.extract_strided_slice %585 {offsets = [0, 32], sizes = [8, 32], strides = [1, 1]} : vector<8x128xf32> to vector<8x32xf32>
    %589 = vector.extract_strided_slice %586 {offsets = [0, 64], sizes = [8, 32], strides = [1, 1]} : vector<8x128xf32> to vector<8x32xf32>
    %590 = vector.extract_strided_slice %585 {offsets = [0, 96], sizes = [8, 32], strides = [1, 1]} : vector<8x128xf32> to vector<8x32xf32>
    %591 = arith.mulf %588, %568 : vector<8x32xf32>
    %592 = arith.mulf %587, %589 : vector<8x32xf32>
    %593 = arith.addf %591, %592 : vector<8x32xf32>
    %594 = math.tanh %593 : vector<8x32xf32>
    %595 = arith.mulf %590, %594 : vector<8x32xf32>
    %596 = arith.index_cast %c5_i32_189 : i32 to index
    %c0_194 = arith.constant 0 : index
    %c0_195 = arith.constant 0 : index
    %597 = vector.load %arg8[%596, %c0_194, %c0_195] : memref<8x8x32xf32, #tpu.memory_space<vmem>>, vector<1x8x32xf32>
    %598 = vector.shape_cast %597 : vector<1x8x32xf32> to vector<8x32xf32>
    %599 = vector.shape_cast %595 : vector<8x32xf32> to vector<1x8x32xf32>
    tpu.vector_store %arg8[%596, %c0_194, %c0_195], %599 {strides = array<i32>} : memref<8x8x32xf32, #tpu.memory_space<vmem>>, vector<1x8x32xf32>,
    %c6_i32_196 = arith.constant 6 : i32
    %600 = arith.index_cast %c6_i32_196 : i32 to index
    %c0_197 = arith.constant 0 : index
    %c0_198 = arith.constant 0 : index
    %601 = vector.load %arg9[%600, %c0_197, %c0_198] : memref<8x8x128xf32, #tpu.memory_space<vmem>>, vector<1x8x128xf32>
    %602 = vector.shape_cast %601 : vector<1x8x128xf32> to vector<8x128xf32>
    %603 = arith.truncf %595 : vector<8x32xf32> to vector<8x32xbf16>
    %cst_199 = arith.constant dense<0.000000e+00> : vector<8x128xf32>
    %604 = tpu.matmul %603, %447, %cst_199 {dimension_numbers = #tpu.dot_dimension_numbers<[1], [0], [0], [1], [0, 0, 1, 1], [], []>} : vector<8x32xbf16>, vector<32x128xbf16>, vector<8x128xf32> -> vector<8x128xf32>
    %605 = arith.addf %602, %604 : vector<8x128xf32>
    %606 = arith.negf %605 : vector<8x128xf32>
    %607 = math.exp %606 : vector<8x128xf32>
    %cst_200 = arith.constant 1.000000e+00 : f32
    %608 = vector.broadcast %cst_200 : f32 to vector<8x128xf32>
    %609 = arith.addf %608, %607 : vector<8x128xf32>
    %610 = arith.divf %608, %609 : vector<8x128xf32>
    %611 = math.tanh %605 : vector<8x128xf32>
    %612 = vector.extract_strided_slice %610 {offsets = [0, 0], sizes = [8, 32], strides = [1, 1]} : vector<8x128xf32> to vector<8x32xf32>
    %613 = vector.extract_strided_slice %610 {offsets = [0, 32], sizes = [8, 32], strides = [1, 1]} : vector<8x128xf32> to vector<8x32xf32>
    %614 = vector.extract_strided_slice %611 {offsets = [0, 64], sizes = [8, 32], strides = [1, 1]} : vector<8x128xf32> to vector<8x32xf32>
    %615 = vector.extract_strided_slice %610 {offsets = [0, 96], sizes = [8, 32], strides = [1, 1]} : vector<8x128xf32> to vector<8x32xf32>
    %616 = arith.mulf %613, %593 : vector<8x32xf32>
    %617 = arith.mulf %612, %614 : vector<8x32xf32>
    %618 = arith.addf %616, %617 : vector<8x32xf32>
    %619 = math.tanh %618 : vector<8x32xf32>
    %620 = arith.mulf %615, %619 : vector<8x32xf32>
    %621 = arith.index_cast %c6_i32_196 : i32 to index
    %c0_201 = arith.constant 0 : index
    %c0_202 = arith.constant 0 : index
    %622 = vector.load %arg8[%621, %c0_201, %c0_202] : memref<8x8x32xf32, #tpu.memory_space<vmem>>, vector<1x8x32xf32>
    %623 = vector.shape_cast %622 : vector<1x8x32xf32> to vector<8x32xf32>
    %624 = vector.shape_cast %620 : vector<8x32xf32> to vector<1x8x32xf32>
    tpu.vector_store %arg8[%621, %c0_201, %c0_202], %624 {strides = array<i32>} : memref<8x8x32xf32, #tpu.memory_space<vmem>>, vector<1x8x32xf32>,
    %c7_i32_203 = arith.constant 7 : i32
    %625 = arith.index_cast %c7_i32_203 : i32 to index
    %c0_204 = arith.constant 0 : index
    %c0_205 = arith.constant 0 : index
    %626 = vector.load %arg9[%625, %c0_204, %c0_205] : memref<8x8x128xf32, #tpu.memory_space<vmem>>, vector<1x8x128xf32>
    %627 = vector.shape_cast %626 : vector<1x8x128xf32> to vector<8x128xf32>
    %628 = arith.truncf %620 : vector<8x32xf32> to vector<8x32xbf16>
    %cst_206 = arith.constant dense<0.000000e+00> : vector<8x128xf32>
    %629 = tpu.matmul %628, %447, %cst_206 {dimension_numbers = #tpu.dot_dimension_numbers<[1], [0], [0], [1], [0, 0, 1, 1], [], []>} : vector<8x32xbf16>, vector<32x128xbf16>, vector<8x128xf32> -> vector<8x128xf32>
    %630 = arith.addf %627, %629 : vector<8x128xf32>
    %631 = arith.negf %630 : vector<8x128xf32>
    %632 = math.exp %631 : vector<8x128xf32>
    %cst_207 = arith.constant 1.000000e+00 : f32
    %633 = vector.broadcast %cst_207 : f32 to vector<8x128xf32>
    %634 = arith.addf %633, %632 : vector<8x128xf32>
    %635 = arith.divf %633, %634 : vector<8x128xf32>
    %636 = math.tanh %630 : vector<8x128xf32>
    %637 = vector.extract_strided_slice %635 {offsets = [0, 0], sizes = [8, 32], strides = [1, 1]} : vector<8x128xf32> to vector<8x32xf32>
    %638 = vector.extract_strided_slice %635 {offsets = [0, 32], sizes = [8, 32], strides = [1, 1]} : vector<8x128xf32> to vector<8x32xf32>
    %639 = vector.extract_strided_slice %636 {offsets = [0, 64], sizes = [8, 32], strides = [1, 1]} : vector<8x128xf32> to vector<8x32xf32>
    %640 = vector.extract_strided_slice %635 {offsets = [0, 96], sizes = [8, 32], strides = [1, 1]} : vector<8x128xf32> to vector<8x32xf32>
    %641 = arith.mulf %638, %618 : vector<8x32xf32>
    %642 = arith.mulf %637, %639 : vector<8x32xf32>
    %643 = arith.addf %641, %642 : vector<8x32xf32>
    %644 = math.tanh %643 : vector<8x32xf32>
    %645 = arith.mulf %640, %644 : vector<8x32xf32>
    %646 = arith.index_cast %c7_i32_203 : i32 to index
    %c0_208 = arith.constant 0 : index
    %c0_209 = arith.constant 0 : index
    %647 = vector.load %arg8[%646, %c0_208, %c0_209] : memref<8x8x32xf32, #tpu.memory_space<vmem>>, vector<1x8x32xf32>
    %648 = vector.shape_cast %647 : vector<1x8x32xf32> to vector<8x32xf32>
    %649 = vector.shape_cast %645 : vector<8x32xf32> to vector<1x8x32xf32>
    tpu.vector_store %arg8[%646, %c0_208, %c0_209], %649 {strides = array<i32>} : memref<8x8x32xf32, #tpu.memory_space<vmem>>, vector<1x8x32xf32>,
    %c8_i32_210 = arith.constant 8 : i32
    %c0_211 = arith.constant 0 : index
    %c0_212 = arith.constant 0 : index
    %c0_213 = arith.constant 0 : index
    %650 = vector.load %arg8[%c0_211, %c0_212, %c0_213] : memref<8x8x32xf32, #tpu.memory_space<vmem>>, vector<8x8x32xf32>
    %651 = vector.shape_cast %650 : vector<8x8x32xf32> to vector<64x32xf32>
    %652 = arith.truncf %651 : vector<64x32xf32> to vector<64x32xbf16>
    %c2_214 = arith.constant 2 : index
    %c0_215 = arith.constant 0 : index
    %c0_216 = arith.constant 0 : index
    %653 = vector.load %arg2[%c2_214, %c0_215, %c0_216] : memref<3x32x128xbf16, #tpu.memory_space<vmem>>, vector<1x32x128xbf16>
    %654 = vector.shape_cast %653 : vector<1x32x128xbf16> to vector<32x128xbf16>
    %cst_217 = arith.constant dense<0.000000e+00> : vector<64x128xf32>
    %655 = tpu.matmul %652, %654, %cst_217 {dimension_numbers = #tpu.dot_dimension_numbers<[1], [0], [0], [1], [0, 0, 1, 1], [], []>} : vector<64x32xbf16>, vector<32x128xbf16>, vector<64x128xf32> -> vector<64x128xf32>
    %656 = vector.shape_cast %655 : vector<64x128xf32> to vector<8x8x128xf32>
    %c3 = arith.constant 3 : index
    %c0_218 = arith.constant 0 : index
    %c0_219 = arith.constant 0 : index
    %657 = vector.load %arg4[%c3, %c0_218, %c0_219] : memref<4x1x128xf32, #tpu.memory_space<vmem>>, vector<1x1x128xf32>
    %658 = vector.shape_cast %657 : vector<1x1x128xf32> to vector<1x128xf32>
    %659 = vector.shape_cast %658 : vector<1x128xf32> to vector<1x1x128xf32>
    %660 = vector.broadcast %659 : vector<1x1x128xf32> to vector<8x8x128xf32>
    %661 = arith.addf %656, %660 : vector<8x8x128xf32>
    %c0_220 = arith.constant 0 : index
    %c0_221 = arith.constant 0 : index
    %c0_222 = arith.constant 0 : index
    %662 = vector.load %arg9[%c0_220, %c0_221, %c0_222] : memref<8x8x128xf32, #tpu.memory_space<vmem>>, vector<8x8x128xf32>
    tpu.vector_store %arg9[%c0_220, %c0_221, %c0_222], %661 {strides = array<i32>} : memref<8x8x128xf32, #tpu.memory_space<vmem>>, vector<8x8x128xf32>,
    %c3_223 = arith.constant 3 : index
    %c0_224 = arith.constant 0 : index
    %c0_225 = arith.constant 0 : index
    %663 = vector.load %arg3[%c3_223, %c0_224, %c0_225] : memref<4x32x128xbf16, #tpu.memory_space<vmem>>, vector<1x32x128xbf16>
    %664 = vector.shape_cast %663 : vector<1x32x128xbf16> to vector<32x128xbf16>
    %cst_226 = arith.constant 0.000000e+00 : f32
    %665 = vector.broadcast %cst_226 : f32 to vector<8x32xf32>
    %cst_227 = arith.constant 0.000000e+00 : f32
    %666 = vector.broadcast %cst_227 : f32 to vector<8x32xf32>
    %c0_i32_228 = arith.constant 0 : i32
    %667 = arith.index_cast %c0_i32_228 : i32 to index
    %c0_229 = arith.constant 0 : index
    %c0_230 = arith.constant 0 : index
    %668 = vector.load %arg9[%667, %c0_229, %c0_230] : memref<8x8x128xf32, #tpu.memory_space<vmem>>, vector<1x8x128xf32>
    %669 = vector.shape_cast %668 : vector<1x8x128xf32> to vector<8x128xf32>
    %670 = arith.truncf %665 : vector<8x32xf32> to vector<8x32xbf16>
    %cst_231 = arith.constant dense<0.000000e+00> : vector<8x128xf32>
    %671 = tpu.matmul %670, %664, %cst_231 {dimension_numbers = #tpu.dot_dimension_numbers<[1], [0], [0], [1], [0, 0, 1, 1], [], []>} : vector<8x32xbf16>, vector<32x128xbf16>, vector<8x128xf32> -> vector<8x128xf32>
    %672 = arith.addf %669, %671 : vector<8x128xf32>
    %673 = arith.negf %672 : vector<8x128xf32>
    %674 = math.exp %673 : vector<8x128xf32>
    %cst_232 = arith.constant 1.000000e+00 : f32
    %675 = vector.broadcast %cst_232 : f32 to vector<8x128xf32>
    %676 = arith.addf %675, %674 : vector<8x128xf32>
    %677 = arith.divf %675, %676 : vector<8x128xf32>
    %678 = math.tanh %672 : vector<8x128xf32>
    %679 = vector.extract_strided_slice %677 {offsets = [0, 0], sizes = [8, 32], strides = [1, 1]} : vector<8x128xf32> to vector<8x32xf32>
    %680 = vector.extract_strided_slice %677 {offsets = [0, 32], sizes = [8, 32], strides = [1, 1]} : vector<8x128xf32> to vector<8x32xf32>
    %681 = vector.extract_strided_slice %678 {offsets = [0, 64], sizes = [8, 32], strides = [1, 1]} : vector<8x128xf32> to vector<8x32xf32>
    %682 = vector.extract_strided_slice %677 {offsets = [0, 96], sizes = [8, 32], strides = [1, 1]} : vector<8x128xf32> to vector<8x32xf32>
    %683 = arith.mulf %680, %666 : vector<8x32xf32>
    %684 = arith.mulf %679, %681 : vector<8x32xf32>
    %685 = arith.addf %683, %684 : vector<8x32xf32>
    %686 = math.tanh %685 : vector<8x32xf32>
    %687 = arith.mulf %682, %686 : vector<8x32xf32>
    %688 = arith.index_cast %c0_i32_228 : i32 to index
    %c0_233 = arith.constant 0 : index
    %c0_234 = arith.constant 0 : index
    %689 = vector.load %arg8[%688, %c0_233, %c0_234] : memref<8x8x32xf32, #tpu.memory_space<vmem>>, vector<1x8x32xf32>
    %690 = vector.shape_cast %689 : vector<1x8x32xf32> to vector<8x32xf32>
    %691 = vector.shape_cast %687 : vector<8x32xf32> to vector<1x8x32xf32>
    tpu.vector_store %arg8[%688, %c0_233, %c0_234], %691 {strides = array<i32>} : memref<8x8x32xf32, #tpu.memory_space<vmem>>, vector<1x8x32xf32>,
    %c1_i32_235 = arith.constant 1 : i32
    %692 = arith.index_cast %c1_i32_235 : i32 to index
    %c0_236 = arith.constant 0 : index
    %c0_237 = arith.constant 0 : index
    %693 = vector.load %arg9[%692, %c0_236, %c0_237] : memref<8x8x128xf32, #tpu.memory_space<vmem>>, vector<1x8x128xf32>
    %694 = vector.shape_cast %693 : vector<1x8x128xf32> to vector<8x128xf32>
    %695 = arith.truncf %687 : vector<8x32xf32> to vector<8x32xbf16>
    %cst_238 = arith.constant dense<0.000000e+00> : vector<8x128xf32>
    %696 = tpu.matmul %695, %664, %cst_238 {dimension_numbers = #tpu.dot_dimension_numbers<[1], [0], [0], [1], [0, 0, 1, 1], [], []>} : vector<8x32xbf16>, vector<32x128xbf16>, vector<8x128xf32> -> vector<8x128xf32>
    %697 = arith.addf %694, %696 : vector<8x128xf32>
    %698 = arith.negf %697 : vector<8x128xf32>
    %699 = math.exp %698 : vector<8x128xf32>
    %cst_239 = arith.constant 1.000000e+00 : f32
    %700 = vector.broadcast %cst_239 : f32 to vector<8x128xf32>
    %701 = arith.addf %700, %699 : vector<8x128xf32>
    %702 = arith.divf %700, %701 : vector<8x128xf32>
    %703 = math.tanh %697 : vector<8x128xf32>
    %704 = vector.extract_strided_slice %702 {offsets = [0, 0], sizes = [8, 32], strides = [1, 1]} : vector<8x128xf32> to vector<8x32xf32>
    %705 = vector.extract_strided_slice %702 {offsets = [0, 32], sizes = [8, 32], strides = [1, 1]} : vector<8x128xf32> to vector<8x32xf32>
    %706 = vector.extract_strided_slice %703 {offsets = [0, 64], sizes = [8, 32], strides = [1, 1]} : vector<8x128xf32> to vector<8x32xf32>
    %707 = vector.extract_strided_slice %702 {offsets = [0, 96], sizes = [8, 32], strides = [1, 1]} : vector<8x128xf32> to vector<8x32xf32>
    %708 = arith.mulf %705, %685 : vector<8x32xf32>
    %709 = arith.mulf %704, %706 : vector<8x32xf32>
    %710 = arith.addf %708, %709 : vector<8x32xf32>
    %711 = math.tanh %710 : vector<8x32xf32>
    %712 = arith.mulf %707, %711 : vector<8x32xf32>
    %713 = arith.index_cast %c1_i32_235 : i32 to index
    %c0_240 = arith.constant 0 : index
    %c0_241 = arith.constant 0 : index
    %714 = vector.load %arg8[%713, %c0_240, %c0_241] : memref<8x8x32xf32, #tpu.memory_space<vmem>>, vector<1x8x32xf32>
    %715 = vector.shape_cast %714 : vector<1x8x32xf32> to vector<8x32xf32>
    %716 = vector.shape_cast %712 : vector<8x32xf32> to vector<1x8x32xf32>
    tpu.vector_store %arg8[%713, %c0_240, %c0_241], %716 {strides = array<i32>} : memref<8x8x32xf32, #tpu.memory_space<vmem>>, vector<1x8x32xf32>,
    %c2_i32_242 = arith.constant 2 : i32
    %717 = arith.index_cast %c2_i32_242 : i32 to index
    %c0_243 = arith.constant 0 : index
    %c0_244 = arith.constant 0 : index
    %718 = vector.load %arg9[%717, %c0_243, %c0_244] : memref<8x8x128xf32, #tpu.memory_space<vmem>>, vector<1x8x128xf32>
    %719 = vector.shape_cast %718 : vector<1x8x128xf32> to vector<8x128xf32>
    %720 = arith.truncf %712 : vector<8x32xf32> to vector<8x32xbf16>
    %cst_245 = arith.constant dense<0.000000e+00> : vector<8x128xf32>
    %721 = tpu.matmul %720, %664, %cst_245 {dimension_numbers = #tpu.dot_dimension_numbers<[1], [0], [0], [1], [0, 0, 1, 1], [], []>} : vector<8x32xbf16>, vector<32x128xbf16>, vector<8x128xf32> -> vector<8x128xf32>
    %722 = arith.addf %719, %721 : vector<8x128xf32>
    %723 = arith.negf %722 : vector<8x128xf32>
    %724 = math.exp %723 : vector<8x128xf32>
    %cst_246 = arith.constant 1.000000e+00 : f32
    %725 = vector.broadcast %cst_246 : f32 to vector<8x128xf32>
    %726 = arith.addf %725, %724 : vector<8x128xf32>
    %727 = arith.divf %725, %726 : vector<8x128xf32>
    %728 = math.tanh %722 : vector<8x128xf32>
    %729 = vector.extract_strided_slice %727 {offsets = [0, 0], sizes = [8, 32], strides = [1, 1]} : vector<8x128xf32> to vector<8x32xf32>
    %730 = vector.extract_strided_slice %727 {offsets = [0, 32], sizes = [8, 32], strides = [1, 1]} : vector<8x128xf32> to vector<8x32xf32>
    %731 = vector.extract_strided_slice %728 {offsets = [0, 64], sizes = [8, 32], strides = [1, 1]} : vector<8x128xf32> to vector<8x32xf32>
    %732 = vector.extract_strided_slice %727 {offsets = [0, 96], sizes = [8, 32], strides = [1, 1]} : vector<8x128xf32> to vector<8x32xf32>
    %733 = arith.mulf %730, %710 : vector<8x32xf32>
    %734 = arith.mulf %729, %731 : vector<8x32xf32>
    %735 = arith.addf %733, %734 : vector<8x32xf32>
    %736 = math.tanh %735 : vector<8x32xf32>
    %737 = arith.mulf %732, %736 : vector<8x32xf32>
    %738 = arith.index_cast %c2_i32_242 : i32 to index
    %c0_247 = arith.constant 0 : index
    %c0_248 = arith.constant 0 : index
    %739 = vector.load %arg8[%738, %c0_247, %c0_248] : memref<8x8x32xf32, #tpu.memory_space<vmem>>, vector<1x8x32xf32>
    %740 = vector.shape_cast %739 : vector<1x8x32xf32> to vector<8x32xf32>
    %741 = vector.shape_cast %737 : vector<8x32xf32> to vector<1x8x32xf32>
    tpu.vector_store %arg8[%738, %c0_247, %c0_248], %741 {strides = array<i32>} : memref<8x8x32xf32, #tpu.memory_space<vmem>>, vector<1x8x32xf32>,
    %c3_i32_249 = arith.constant 3 : i32
    %742 = arith.index_cast %c3_i32_249 : i32 to index
    %c0_250 = arith.constant 0 : index
    %c0_251 = arith.constant 0 : index
    %743 = vector.load %arg9[%742, %c0_250, %c0_251] : memref<8x8x128xf32, #tpu.memory_space<vmem>>, vector<1x8x128xf32>
    %744 = vector.shape_cast %743 : vector<1x8x128xf32> to vector<8x128xf32>
    %745 = arith.truncf %737 : vector<8x32xf32> to vector<8x32xbf16>
    %cst_252 = arith.constant dense<0.000000e+00> : vector<8x128xf32>
    %746 = tpu.matmul %745, %664, %cst_252 {dimension_numbers = #tpu.dot_dimension_numbers<[1], [0], [0], [1], [0, 0, 1, 1], [], []>} : vector<8x32xbf16>, vector<32x128xbf16>, vector<8x128xf32> -> vector<8x128xf32>
    %747 = arith.addf %744, %746 : vector<8x128xf32>
    %748 = arith.negf %747 : vector<8x128xf32>
    %749 = math.exp %748 : vector<8x128xf32>
    %cst_253 = arith.constant 1.000000e+00 : f32
    %750 = vector.broadcast %cst_253 : f32 to vector<8x128xf32>
    %751 = arith.addf %750, %749 : vector<8x128xf32>
    %752 = arith.divf %750, %751 : vector<8x128xf32>
    %753 = math.tanh %747 : vector<8x128xf32>
    %754 = vector.extract_strided_slice %752 {offsets = [0, 0], sizes = [8, 32], strides = [1, 1]} : vector<8x128xf32> to vector<8x32xf32>
    %755 = vector.extract_strided_slice %752 {offsets = [0, 32], sizes = [8, 32], strides = [1, 1]} : vector<8x128xf32> to vector<8x32xf32>
    %756 = vector.extract_strided_slice %753 {offsets = [0, 64], sizes = [8, 32], strides = [1, 1]} : vector<8x128xf32> to vector<8x32xf32>
    %757 = vector.extract_strided_slice %752 {offsets = [0, 96], sizes = [8, 32], strides = [1, 1]} : vector<8x128xf32> to vector<8x32xf32>
    %758 = arith.mulf %755, %735 : vector<8x32xf32>
    %759 = arith.mulf %754, %756 : vector<8x32xf32>
    %760 = arith.addf %758, %759 : vector<8x32xf32>
    %761 = math.tanh %760 : vector<8x32xf32>
    %762 = arith.mulf %757, %761 : vector<8x32xf32>
    %763 = arith.index_cast %c3_i32_249 : i32 to index
    %c0_254 = arith.constant 0 : index
    %c0_255 = arith.constant 0 : index
    %764 = vector.load %arg8[%763, %c0_254, %c0_255] : memref<8x8x32xf32, #tpu.memory_space<vmem>>, vector<1x8x32xf32>
    %765 = vector.shape_cast %764 : vector<1x8x32xf32> to vector<8x32xf32>
    %766 = vector.shape_cast %762 : vector<8x32xf32> to vector<1x8x32xf32>
    tpu.vector_store %arg8[%763, %c0_254, %c0_255], %766 {strides = array<i32>} : memref<8x8x32xf32, #tpu.memory_space<vmem>>, vector<1x8x32xf32>,
    %c4_i32_256 = arith.constant 4 : i32
    %767 = arith.index_cast %c4_i32_256 : i32 to index
    %c0_257 = arith.constant 0 : index
    %c0_258 = arith.constant 0 : index
    %768 = vector.load %arg9[%767, %c0_257, %c0_258] : memref<8x8x128xf32, #tpu.memory_space<vmem>>, vector<1x8x128xf32>
    %769 = vector.shape_cast %768 : vector<1x8x128xf32> to vector<8x128xf32>
    %770 = arith.truncf %762 : vector<8x32xf32> to vector<8x32xbf16>
    %cst_259 = arith.constant dense<0.000000e+00> : vector<8x128xf32>
    %771 = tpu.matmul %770, %664, %cst_259 {dimension_numbers = #tpu.dot_dimension_numbers<[1], [0], [0], [1], [0, 0, 1, 1], [], []>} : vector<8x32xbf16>, vector<32x128xbf16>, vector<8x128xf32> -> vector<8x128xf32>
    %772 = arith.addf %769, %771 : vector<8x128xf32>
    %773 = arith.negf %772 : vector<8x128xf32>
    %774 = math.exp %773 : vector<8x128xf32>
    %cst_260 = arith.constant 1.000000e+00 : f32
    %775 = vector.broadcast %cst_260 : f32 to vector<8x128xf32>
    %776 = arith.addf %775, %774 : vector<8x128xf32>
    %777 = arith.divf %775, %776 : vector<8x128xf32>
    %778 = math.tanh %772 : vector<8x128xf32>
    %779 = vector.extract_strided_slice %777 {offsets = [0, 0], sizes = [8, 32], strides = [1, 1]} : vector<8x128xf32> to vector<8x32xf32>
    %780 = vector.extract_strided_slice %777 {offsets = [0, 32], sizes = [8, 32], strides = [1, 1]} : vector<8x128xf32> to vector<8x32xf32>
    %781 = vector.extract_strided_slice %778 {offsets = [0, 64], sizes = [8, 32], strides = [1, 1]} : vector<8x128xf32> to vector<8x32xf32>
    %782 = vector.extract_strided_slice %777 {offsets = [0, 96], sizes = [8, 32], strides = [1, 1]} : vector<8x128xf32> to vector<8x32xf32>
    %783 = arith.mulf %780, %760 : vector<8x32xf32>
    %784 = arith.mulf %779, %781 : vector<8x32xf32>
    %785 = arith.addf %783, %784 : vector<8x32xf32>
    %786 = math.tanh %785 : vector<8x32xf32>
    %787 = arith.mulf %782, %786 : vector<8x32xf32>
    %788 = arith.index_cast %c4_i32_256 : i32 to index
    %c0_261 = arith.constant 0 : index
    %c0_262 = arith.constant 0 : index
    %789 = vector.load %arg8[%788, %c0_261, %c0_262] : memref<8x8x32xf32, #tpu.memory_space<vmem>>, vector<1x8x32xf32>
    %790 = vector.shape_cast %789 : vector<1x8x32xf32> to vector<8x32xf32>
    %791 = vector.shape_cast %787 : vector<8x32xf32> to vector<1x8x32xf32>
    tpu.vector_store %arg8[%788, %c0_261, %c0_262], %791 {strides = array<i32>} : memref<8x8x32xf32, #tpu.memory_space<vmem>>, vector<1x8x32xf32>,
    %c5_i32_263 = arith.constant 5 : i32
    %792 = arith.index_cast %c5_i32_263 : i32 to index
    %c0_264 = arith.constant 0 : index
    %c0_265 = arith.constant 0 : index
    %793 = vector.load %arg9[%792, %c0_264, %c0_265] : memref<8x8x128xf32, #tpu.memory_space<vmem>>, vector<1x8x128xf32>
    %794 = vector.shape_cast %793 : vector<1x8x128xf32> to vector<8x128xf32>
    %795 = arith.truncf %787 : vector<8x32xf32> to vector<8x32xbf16>
    %cst_266 = arith.constant dense<0.000000e+00> : vector<8x128xf32>
    %796 = tpu.matmul %795, %664, %cst_266 {dimension_numbers = #tpu.dot_dimension_numbers<[1], [0], [0], [1], [0, 0, 1, 1], [], []>} : vector<8x32xbf16>, vector<32x128xbf16>, vector<8x128xf32> -> vector<8x128xf32>
    %797 = arith.addf %794, %796 : vector<8x128xf32>
    %798 = arith.negf %797 : vector<8x128xf32>
    %799 = math.exp %798 : vector<8x128xf32>
    %cst_267 = arith.constant 1.000000e+00 : f32
    %800 = vector.broadcast %cst_267 : f32 to vector<8x128xf32>
    %801 = arith.addf %800, %799 : vector<8x128xf32>
    %802 = arith.divf %800, %801 : vector<8x128xf32>
    %803 = math.tanh %797 : vector<8x128xf32>
    %804 = vector.extract_strided_slice %802 {offsets = [0, 0], sizes = [8, 32], strides = [1, 1]} : vector<8x128xf32> to vector<8x32xf32>
    %805 = vector.extract_strided_slice %802 {offsets = [0, 32], sizes = [8, 32], strides = [1, 1]} : vector<8x128xf32> to vector<8x32xf32>
    %806 = vector.extract_strided_slice %803 {offsets = [0, 64], sizes = [8, 32], strides = [1, 1]} : vector<8x128xf32> to vector<8x32xf32>
    %807 = vector.extract_strided_slice %802 {offsets = [0, 96], sizes = [8, 32], strides = [1, 1]} : vector<8x128xf32> to vector<8x32xf32>
    %808 = arith.mulf %805, %785 : vector<8x32xf32>
    %809 = arith.mulf %804, %806 : vector<8x32xf32>
    %810 = arith.addf %808, %809 : vector<8x32xf32>
    %811 = math.tanh %810 : vector<8x32xf32>
    %812 = arith.mulf %807, %811 : vector<8x32xf32>
    %813 = arith.index_cast %c5_i32_263 : i32 to index
    %c0_268 = arith.constant 0 : index
    %c0_269 = arith.constant 0 : index
    %814 = vector.load %arg8[%813, %c0_268, %c0_269] : memref<8x8x32xf32, #tpu.memory_space<vmem>>, vector<1x8x32xf32>
    %815 = vector.shape_cast %814 : vector<1x8x32xf32> to vector<8x32xf32>
    %816 = vector.shape_cast %812 : vector<8x32xf32> to vector<1x8x32xf32>
    tpu.vector_store %arg8[%813, %c0_268, %c0_269], %816 {strides = array<i32>} : memref<8x8x32xf32, #tpu.memory_space<vmem>>, vector<1x8x32xf32>,
    %c6_i32_270 = arith.constant 6 : i32
    %817 = arith.index_cast %c6_i32_270 : i32 to index
    %c0_271 = arith.constant 0 : index
    %c0_272 = arith.constant 0 : index
    %818 = vector.load %arg9[%817, %c0_271, %c0_272] : memref<8x8x128xf32, #tpu.memory_space<vmem>>, vector<1x8x128xf32>
    %819 = vector.shape_cast %818 : vector<1x8x128xf32> to vector<8x128xf32>
    %820 = arith.truncf %812 : vector<8x32xf32> to vector<8x32xbf16>
    %cst_273 = arith.constant dense<0.000000e+00> : vector<8x128xf32>
    %821 = tpu.matmul %820, %664, %cst_273 {dimension_numbers = #tpu.dot_dimension_numbers<[1], [0], [0], [1], [0, 0, 1, 1], [], []>} : vector<8x32xbf16>, vector<32x128xbf16>, vector<8x128xf32> -> vector<8x128xf32>
    %822 = arith.addf %819, %821 : vector<8x128xf32>
    %823 = arith.negf %822 : vector<8x128xf32>
    %824 = math.exp %823 : vector<8x128xf32>
    %cst_274 = arith.constant 1.000000e+00 : f32
    %825 = vector.broadcast %cst_274 : f32 to vector<8x128xf32>
    %826 = arith.addf %825, %824 : vector<8x128xf32>
    %827 = arith.divf %825, %826 : vector<8x128xf32>
    %828 = math.tanh %822 : vector<8x128xf32>
    %829 = vector.extract_strided_slice %827 {offsets = [0, 0], sizes = [8, 32], strides = [1, 1]} : vector<8x128xf32> to vector<8x32xf32>
    %830 = vector.extract_strided_slice %827 {offsets = [0, 32], sizes = [8, 32], strides = [1, 1]} : vector<8x128xf32> to vector<8x32xf32>
    %831 = vector.extract_strided_slice %828 {offsets = [0, 64], sizes = [8, 32], strides = [1, 1]} : vector<8x128xf32> to vector<8x32xf32>
    %832 = vector.extract_strided_slice %827 {offsets = [0, 96], sizes = [8, 32], strides = [1, 1]} : vector<8x128xf32> to vector<8x32xf32>
    %833 = arith.mulf %830, %810 : vector<8x32xf32>
    %834 = arith.mulf %829, %831 : vector<8x32xf32>
    %835 = arith.addf %833, %834 : vector<8x32xf32>
    %836 = math.tanh %835 : vector<8x32xf32>
    %837 = arith.mulf %832, %836 : vector<8x32xf32>
    %838 = arith.index_cast %c6_i32_270 : i32 to index
    %c0_275 = arith.constant 0 : index
    %c0_276 = arith.constant 0 : index
    %839 = vector.load %arg8[%838, %c0_275, %c0_276] : memref<8x8x32xf32, #tpu.memory_space<vmem>>, vector<1x8x32xf32>
    %840 = vector.shape_cast %839 : vector<1x8x32xf32> to vector<8x32xf32>
    %841 = vector.shape_cast %837 : vector<8x32xf32> to vector<1x8x32xf32>
    tpu.vector_store %arg8[%838, %c0_275, %c0_276], %841 {strides = array<i32>} : memref<8x8x32xf32, #tpu.memory_space<vmem>>, vector<1x8x32xf32>,
    %c7_i32_277 = arith.constant 7 : i32
    %842 = arith.index_cast %c7_i32_277 : i32 to index
    %c0_278 = arith.constant 0 : index
    %c0_279 = arith.constant 0 : index
    %843 = vector.load %arg9[%842, %c0_278, %c0_279] : memref<8x8x128xf32, #tpu.memory_space<vmem>>, vector<1x8x128xf32>
    %844 = vector.shape_cast %843 : vector<1x8x128xf32> to vector<8x128xf32>
    %845 = arith.truncf %837 : vector<8x32xf32> to vector<8x32xbf16>
    %cst_280 = arith.constant dense<0.000000e+00> : vector<8x128xf32>
    %846 = tpu.matmul %845, %664, %cst_280 {dimension_numbers = #tpu.dot_dimension_numbers<[1], [0], [0], [1], [0, 0, 1, 1], [], []>} : vector<8x32xbf16>, vector<32x128xbf16>, vector<8x128xf32> -> vector<8x128xf32>
    %847 = arith.addf %844, %846 : vector<8x128xf32>
    %848 = arith.negf %847 : vector<8x128xf32>
    %849 = math.exp %848 : vector<8x128xf32>
    %cst_281 = arith.constant 1.000000e+00 : f32
    %850 = vector.broadcast %cst_281 : f32 to vector<8x128xf32>
    %851 = arith.addf %850, %849 : vector<8x128xf32>
    %852 = arith.divf %850, %851 : vector<8x128xf32>
    %853 = math.tanh %847 : vector<8x128xf32>
    %854 = vector.extract_strided_slice %852 {offsets = [0, 0], sizes = [8, 32], strides = [1, 1]} : vector<8x128xf32> to vector<8x32xf32>
    %855 = vector.extract_strided_slice %852 {offsets = [0, 32], sizes = [8, 32], strides = [1, 1]} : vector<8x128xf32> to vector<8x32xf32>
    %856 = vector.extract_strided_slice %853 {offsets = [0, 64], sizes = [8, 32], strides = [1, 1]} : vector<8x128xf32> to vector<8x32xf32>
    %857 = vector.extract_strided_slice %852 {offsets = [0, 96], sizes = [8, 32], strides = [1, 1]} : vector<8x128xf32> to vector<8x32xf32>
    %858 = arith.mulf %855, %835 : vector<8x32xf32>
    %859 = arith.mulf %854, %856 : vector<8x32xf32>
    %860 = arith.addf %858, %859 : vector<8x32xf32>
    %861 = math.tanh %860 : vector<8x32xf32>
    %862 = arith.mulf %857, %861 : vector<8x32xf32>
    %863 = arith.index_cast %c7_i32_277 : i32 to index
    %c0_282 = arith.constant 0 : index
    %c0_283 = arith.constant 0 : index
    %864 = vector.load %arg8[%863, %c0_282, %c0_283] : memref<8x8x32xf32, #tpu.memory_space<vmem>>, vector<1x8x32xf32>
    %865 = vector.shape_cast %864 : vector<1x8x32xf32> to vector<8x32xf32>
    %866 = vector.shape_cast %862 : vector<8x32xf32> to vector<1x8x32xf32>
    tpu.vector_store %arg8[%863, %c0_282, %c0_283], %866 {strides = array<i32>} : memref<8x8x32xf32, #tpu.memory_space<vmem>>, vector<1x8x32xf32>,
    %c8_i32_284 = arith.constant 8 : i32
    %c0_285 = arith.constant 0 : index
    %c0_286 = arith.constant 0 : index
    %c0_287 = arith.constant 0 : index
    %867 = vector.load %arg8[%c0_285, %c0_286, %c0_287] : memref<8x8x32xf32, #tpu.memory_space<vmem>>, vector<8x8x32xf32>
    %868 = vector.shape_cast %867 : vector<8x8x32xf32> to vector<64x32xf32>
    %869 = arith.truncf %868 : vector<64x32xf32> to vector<64x32xbf16>
    %c0_288 = arith.constant 0 : index
    %c0_289 = arith.constant 0 : index
    %870 = vector.load %arg5[%c0_288, %c0_289] : memref<32x8xbf16, #tpu.memory_space<vmem>>, vector<32x8xbf16>
    %cst_290 = arith.constant dense<0.000000e+00> : vector<64x8xf32>
    %871 = tpu.matmul %869, %870, %cst_290 {dimension_numbers = #tpu.dot_dimension_numbers<[1], [0], [0], [1], [0, 0, 1, 1], [], []>} : vector<64x32xbf16>, vector<32x8xbf16>, vector<64x8xf32> -> vector<64x8xf32>
    %872 = vector.shape_cast %871 : vector<64x8xf32> to vector<8x8x8xf32>
    %c0_291 = arith.constant 0 : index
    %c0_292 = arith.constant 0 : index
    %873 = vector.load %arg6[%c0_291, %c0_292] : memref<1x8xf32, #tpu.memory_space<vmem>>, vector<1x8xf32>
    %874 = vector.shape_cast %873 : vector<1x8xf32> to vector<1x1x8xf32>
    %875 = vector.broadcast %874 : vector<1x1x8xf32> to vector<8x8x8xf32>
    %876 = arith.addf %872, %875 : vector<8x8x8xf32>
    %c0_293 = arith.constant 0 : index
    %c0_294 = arith.constant 0 : index
    %c0_295 = arith.constant 0 : index
    %877 = vector.load %arg7[%c0_293, %c0_294, %c0_295] : memref<8x8x8xf32, #tpu.memory_space<vmem>>, vector<8x8x8xf32>
    tpu.vector_store %arg7[%c0_293, %c0_294, %c0_295], %876 {strides = array<i32>} : memref<8x8x8xf32, #tpu.memory_space<vmem>>, vector<8x8x8xf32>,
    return
  }
}

</mosaic_0001>

<bundles_post_ra>
// kernel: tpu_custom_call.1
= control target key start
LH: loop header
LB: loop body
LE: loop exit
PB: predicated region body
PF: predicated region fallthrough
CT: control target
= control target key end

     0   :  { %12 = vsyncpa [#allocation5], 0  ;;  %s4995_s0 = inlined_call_operand.hbm [shape: f32[8,8,8], index: 0, kind: input, shape index: {}]   ;;  %s4996_s1 = inlined_call_operand.vmem [shape: bf16[8,128], index: 1, kind: input, shape index: {}]   ;;  %s4997_s2 = inlined_call_operand.hbm [shape: bf16[3,32,128], index: 2, kind: input, shape index: {}]   ;;  %s4998_s3 = inlined_call_operand.hbm [shape: bf16[4,32,128], index: 3, kind: input, shape index: {}]   ;;  %s4999_s4 = inlined_call_operand.vmem [shape: f32[4,1,128], index: 4, kind: input, shape index: {}]   ;;  %s5000_s5 = inlined_call_operand.vmem [shape: bf16[32,8], index: 5, kind: input, shape index: {}]   ;;  %s5001_s6 = inlined_call_operand.vmem [shape: f32[1,8], index: 6, kind: input, shape index: {}]   ;;  %s5002_s7 = inlined_call_operand.hbm [shape: f32[8,8,8], index: 7, kind: output, shape index: {}]  }
   0x1   :  { %13 = vsyncpa [#allocation8], 0 }
   0x2   :  { %14 = vsyncpa [#allocation6], 0  ;;  %s4192_s24 = smov [#allocation7]  }
   0x3   :  { %s34_s25 = sshll.u32 %s4192_s24, 4  ;;  %s35_s25 = int_to_ptr.vmem [resolvable:$true] %s34_s25 }
   0x4   :  { %s4114_s26 = scalar_lea.vmem %s35_s25, 768  ;;  %p4119_p1 = scmp.lt.s32.totalorder %s35_s25, %s35_s25 }
   0x5   :  { %p4115_p0 = scmp.ne.s32.totalorder %s35_s25, %s4114_s26  ;;  %p4120_p2 = scmp.lt.s32.totalorder %s4114_s26, %s4114_s26 }
   0x7   :  { %p4121_p3 = por %p4120_p2, %p4119_p1 }
   0x9   :  { %p4122_p4 = pnand %p4121_p3, %p4115_p0 }
   0xb   :  { %4125 = shalt.err (!%p4122_p4)
}
   0xc   :  { %s4193_s27 = smov 64   ;;  %s4194_s28 = smov 4  }
   0xd   :  { %40 = dma.hbm_to_vmem [thread:$0]  %s4997_s2, 768, %s35_s25, [#allocation8], %s4193_s27, %s4193_s27, %s4194_s28  }
   0xe   :  { %s4195_s8 = smov [#allocation4]  }
   0xf   :  { %s20_s9 = sshll.u32 %s4195_s8, 4  ;;  %s21_s9 = int_to_ptr.vmem [resolvable:$true] %s20_s9 }
  0x10   :  { %s4134_s10 = scalar_lea.vmem %s21_s9, 1024  ;;  %p4139_p6 = scmp.lt.s32.totalorder %s21_s9, %s21_s9 }
  0x11   :  { %p4135_p5 = scmp.ne.s32.totalorder %s21_s9, %s4134_s10  ;;  %p4140_p7 = scmp.lt.s32.totalorder %s4134_s10, %s4134_s10 }
  0x13   :  { %p4141_p8 = por %p4140_p7, %p4139_p6 }
  0x15   :  { %p4142_p9 = pnand %p4141_p8, %p4135_p5 }
  0x17   :  { %4145 = shalt.err (!%p4142_p9)
}
  0x18   :  { %s4196_s11 = smov 128   ;;  %s4197_s12 = smov 8  }
  0x19   :  { %26 = dma.hbm_to_vmem [thread:$0]  %s4995_s0, 1024, %s21_s9, [#allocation5], %s4196_s11, %s4196_s11, %s4197_s12  }
  0x1a   :  { %s4198_s2 = smov [#allocation9]  }
  0x1b   :  { %s46_s15 = sshll.u32 %s4198_s2, 4  ;;  %s47_s15 = int_to_ptr.vmem [resolvable:$true] %s46_s15 }
  0x1c   :  { %s4154_s16 = scalar_lea.vmem %s47_s15, 1024  ;;  %p4159_p11 = scmp.lt.s32.totalorder %s47_s15, %s47_s15 }
  0x1d   :  { %p4155_p10 = scmp.ne.s32.totalorder %s47_s15, %s4154_s16  ;;  %p4160_p12 = scmp.lt.s32.totalorder %s4154_s16, %s4154_s16 }
  0x1f   :  { %p4161_p13 = por %p4160_p12, %p4159_p11 }
  0x21   :  { %p4162_p0 = pnand %p4161_p13, %p4155_p10 }
  0x23   :  { %4165 = shalt.err (!%p4162_p0)
}
  0x24   :  { %52 = dma.hbm_to_vmem [thread:$0]  %s4998_s3, 1024, %s47_s15, [#allocation8], %s4193_s27, %s4193_s27, %s4194_s28  }
  0x25   :  { %4186 = dma.done.wait [#allocation5], 1024  }
  0x26   :  { %4187 = vsyncadd [#allocation5], 4294966272 }
  0x27   :  { %4188 = dma.done.wait [#allocation8], 1792  }
  0x28   :  { %4189 = vsyncadd [#allocation8], 4294965504  ;;  %vm95_vm0 = vcmask 1043456   ;;  %v81_v0 = vld [vmem:[%s4996_s1] sm:$0xf]  ;;  %v70_v2 = vld [vmem:[#allocation4 + $0x8] sm:$0xff] }
  0x29   :  { %v69_v1 = vld [vmem:[#allocation4] sm:$0xff]  ;;  %vm82_vm1 = vcmask 64512   ;;  %3820 = vmatprep.subr.msk.bf16.mxu0 %vm95_vm0, %v81_v0  ;;  %3821 = vmatprep.subr.msk.bf16.mxu1 %vm95_vm0, %v81_v0  ;;  %v97_v3 = vsel %vm95_vm0, %v81_v0, 0  ;;  %v74_v6 = vld [vmem:[#allocation4 + $0x28] sm:$0xff]  ;;  %v71_v7 = vld [vmem:[#allocation4 + $0x10] sm:$0xff]  ;;  %v4199_v14 = vmov 0.0  }
  0x2a   :  { %v77_v4 = vpack.c.bf16 %v70_v2, %v69_v1  ;;  %v73_v5 = vld [vmem:[#allocation4 + $0x20] sm:$0xff]  ;;  %3505 = vmatpush3.bf16.msra.mxu0 %v97_v3  ;;  %3819 = vmatpush3.bf16.msra.mxu1 %v97_v3  ;;  %v72_v9 = vld [vmem:[#allocation4 + $0x18] sm:$0xff]  ;;  %v75_v10 = vld [vmem:[#allocation4 + $0x30] sm:$0xff]  ;;  %vm4200_vm2 = vmmov 0   ;;  %v4201_v17 = vmov 0   ;;  %s4202_s20 = smov 32  }
  0x2b   :  { %v79_v8 = vpack.c.bf16 %v74_v6, %v73_v5  ;;  %v76_v11 = vld [vmem:[#allocation4 + $0x38] sm:$0xff]  ;;  %v78_v12 = vpack.c.bf16 %v72_v9, %v71_v7  ;;  %3514 = vmatprep.subr.bf16.mxu1 %v4199_v14  ;;  %v4268_v16 = vld [vmem:[#allocation9] sm:$0xff]   ;;  %3530 = vmatprep.subr.bf16.mxu0 %v4199_v14  ;;  %v3279_v18 = vld [vmem:[%s4999_s4] ss:$0 sm:$0xff]  ;;  %vm204_vm3 = vcmask 261120  }
  0x2c   :  { %3506 = vmatprep.mubr.msk.bf16.mxu0 %vm82_vm1, %v77_v4  ;;  %v80_v13 = vpack.c.bf16 %v76_v11, %v75_v10  ;;  %v4265_v15 = vld [vmem:[#allocation9 + $0x8] sm:$0xff]  }
  0x2d   :  { %3510 = vmatprep.mubr.msk.bf16.mxu1 %vm82_vm1, %v79_v8  ;;  %3507 = vmatmul.mubr.msk.bf16.vlgmr.msra.gmra.mxu0 %vm82_vm1, %v78_v12 }
  0x2e   :  { %3511 = vmatmul.mubr.msk.bf16.vlgmr.msra.gmra.mxu1 %vm82_vm1, %v80_v13  ;;  %3531 = vmatpush3.bf16.msra.mxu0 %v4265_v15 }
  0x2f   :  { %3515 = vmatpush3.bf16.msra.mxu1 %v4265_v15  ;;  %3518 = vmatprep.mubr.msk.bf16.mxu1 %vm4200_vm2, %v4199_v14 }
  0x30   :  { %3516 = vmatprep.subr.bf16.mxu1 %v4199_v14  ;;  %3532 = vmatprep.subr.bf16.mxu0 %v4199_v14 }
  0x31   :  { %3534 = vmatprep.mubr.msk.bf16.mxu0 %vm4200_vm2, %v4199_v14 }
  0x32   :  { %3533 = vmatpush3.bf16.msra.mxu0 %v4268_v16 }
  0x33   :  { %3517 = vmatpush3.bf16.msra.mxu1 %v4268_v16  ;;  %3546 = vmatprep.subr.bf16.mxu0 %v4199_v14 }
  0x34   :  { %3522 = vmatprep.subr.bf16.mxu1 %v4199_v14 }
  0x36   :  { %3519 = vmatmul.mubr.bf16.vlgmr.msra.gmra.mxu1 %v4201_v17 }
  0x37   :  { %3523 = vmatpush3.bf16.msra.mxu1 %v4265_v15  ;;  %3526 = vmatprep.mubr.msk.bf16.mxu1 %vm4200_vm2, %v4199_v14 }
  0x38   :  { %3524 = vmatprep.subr.bf16.mxu1 %v4199_v14 }
  0x3b   :  { %3525 = vmatpush3.bf16.msra.mxu1 %v4268_v16 }
  0x3c   :  { %3538 = vmatprep.subr.bf16.mxu1 %v4199_v14 }
  0xed   :  { %v3508_v19 = vpop.f32.mrf.mxu0 }
  0xee   :  { %v3512_v20 = vpop.f32.mrf.mxu1  ;;  %v4295_v21 = vadd.f32 %v3508_v19, %v3279_v18 }
  0xef   :  { %v4297_v22 = vadd.f32 %v3512_v20, %v3279_v18  ;;  %v133_v23 = vpop.f32.mrf.mxu0 }
  0xf0   :  { %v149_v24 = vpop.f32.mrf.mxu1  ;;  %v171_v31 = vadd.f32 %v3279_v18, %v133_v23 }
  0xf1   :  { %v4299_v25 = vadd.f32 %v3279_v18, %v149_v24  ;;  %v3509_v26 = vpop.f32.mrf.mxu0 }
  0xf2   :  { %v3513_v27 = vpop.f32.mrf.mxu1  ;;  %v4301_v28 = vadd.f32 %v3509_v26, %v3279_v18 }
  0xf3   :  { %v4303_v29 = vadd.f32 %v3513_v27, %v3279_v18  ;;  %v136_v53 = vpop.f32.mrf.mxu0 }
  0xf4   :  { %v152_v30 = vpop.f32.mrf.mxu1  ;;  %v172_v54 = vadd.f32 %v3279_v18, %v136_v53 }
  0xf5   :  { %v4305_v32 = vadd.f32 %v3279_v18, %v152_v30 }
  0xf6   :  { %v242_v33 = vpop.f32.mrf.mxu1 }
  0xf7   :  { %v248_v34 = vadd.f32 %v242_v33, %v171_v31 }
  0xf8   :  { %v3520_v35 = vpop.f32.mrf.mxu1 }
  0xf9   :  { %3850 = vtanh.f32 %v248_v34  ;;  %v3282_v39 = vmul.f32 -1.442695, %v248_v34 }
  0xfa   :  { %v245_v36 = vpop.f32.mrf.mxu1 }
  0xfb   :  { %3852 = vpow2.f32 %v3282_v39 }
  0xfc   :  { %v3521_v37 = vpop.f32.mrf.mxu1 }
 0x106   :  { %v3851_v38 = vpop.eup %3850 }
 0x107   :  { %258 = vrot.lane.b32.xlu0 %v3851_v38, %s4193_s27 }
 0x108   :  { %v3853_v40 = vpop.eup %3852 }
 0x109   :  { %v252_v41 = vadd.f32 1.0, %v3853_v40 }
 0x10b   :  { %3854 = vrcp.f32 %v252_v41 }
 0x118   :  { %v3855_v42 = vpop.eup %3854 }
 0x119   :  { %v256_v45 = vmul.f32 0.0, %v3855_v42 }
 0x179   :  { %v259_v43 = vpop.permute.xlu0 %258 }
 0x17a   :  { %v261_v44 = vmul.f32 %v3855_v42, %v259_v43 }
 0x17c   :  { %263 = vrot.lane.b32.xlu0 %v261_v44, %s4202_s20 }
 0x1ee   :  { %v264_v46 = vpop.permute.xlu0 %263 }
 0x1ef   :  { %v266_v47 = vadd.f32 %v264_v46, %v256_v45 }
 0x1f1   :  { %3856 = vtanh.f32 %v266_v47 }
 0x1fe   :  { %v3857_v48 = vpop.eup %3856 }
 0x1ff   :  { %269 = vrot.lane.b32.xlu1 %v3857_v48, %s4193_s27 }
 0x271   :  { %v270_v49 = vpop.permute.xlu1 %269 }
 0x272   :  { %v4310_v50 = vmul.f32 %v3855_v42, %v270_v49 }
 0x274   :  { %v280_v51 = vpack.c.bf16 %v4310_v50, %v4310_v50 }
 0x276   :  { %282 = vrot.lane.b32.xlu1 %v280_v51, %s4202_s20 }
 0x2e8   :  { %v283_v52 = vpop.permute.xlu1 %282 }
 0x2e9   :  { %3527 = vmatmul.mubr.msk.bf16.vlgmr.msra.gmra.mxu1 %vm204_vm3, %v283_v52 }
 0x2ea   :  { %3539 = vmatpush3.bf16.msra.mxu1 %v4265_v15  ;;  %3542 = vmatprep.mubr.msk.bf16.mxu1 %vm4200_vm2, %v4199_v14 }
 0x2eb   :  { %3540 = vmatprep.subr.bf16.mxu1 %v4199_v14 }
 0x2ee   :  { %3541 = vmatpush3.bf16.msra.mxu1 %v4268_v16 }
 0x2ef   :  { %3554 = vmatprep.subr.bf16.mxu1 %v4199_v14 }
 0x3a9   :  { %v321_v55 = vpop.f32.mrf.mxu1 }
 0x3aa   :  { %v327_v56 = vadd.f32 %v321_v55, %v172_v54 }
 0x3ab   :  { %v3528_v57 = vpop.f32.mrf.mxu1 }
 0x3ac   :  { %3858 = vtanh.f32 %v327_v56  ;;  %v3284_v61 = vmul.f32 -1.442695, %v327_v56 }
 0x3ad   :  { %v324_v58 = vpop.f32.mrf.mxu1 }
 0x3ae   :  { %3860 = vpow2.f32 %v3284_v61 }
 0x3af   :  { %v3529_v59 = vpop.f32.mrf.mxu1 }
 0x3b9   :  { %v3859_v60 = vpop.eup %3858 }
 0x3ba   :  { %337 = vrot.lane.b32.xlu0 %v3859_v60, %s4193_s27 }
 0x3bb   :  { %v3861_v62 = vpop.eup %3860 }
 0x3bc   :  { %v331_v63 = vadd.f32 1.0, %v3861_v62 }
 0x3be   :  { %3862 = vrcp.f32 %v331_v63 }
 0x3cb   :  { %v3863_v0 = vpop.eup %3862 }
 0x3cc   :  { %v335_v3 = vmul.f32 %v3863_v0, %v266_v47 }
 0x42c   :  { %v338_v1 = vpop.permute.xlu0 %337 }
 0x42d   :  { %v340_v2 = vmul.f32 %v3863_v0, %v338_v1 }
 0x42f   :  { %342 = vrot.lane.b32.xlu1 %v340_v2, %s4202_s20 }
 0x4a1   :  { %v343_v4 = vpop.permute.xlu1 %342 }
 0x4a2   :  { %v345_v5 = vadd.f32 %v343_v4, %v335_v3 }
 0x4a4   :  { %3864 = vtanh.f32 %v345_v5 }
 0x4b1   :  { %v3865_v6 = vpop.eup %3864 }
 0x4b2   :  { %348 = vrot.lane.b32.xlu0 %v3865_v6, %s4193_s27 }
 0x524   :  { %v349_v7 = vpop.permute.xlu0 %348 }
 0x525   :  { %v4325_v8 = vmul.f32 %v3863_v0, %v349_v7 }
 0x527   :  { %v360_v9 = vpack.c.bf16 %v4325_v8, %v4325_v8 }
 0x529   :  { %362 = vrot.lane.b32.xlu1 %v360_v9, %s4202_s20 }
 0x59b   :  { %v363_v10 = vpop.permute.xlu1 %362 }
 0x59c   :  { %3535 = vmatmul.mubr.msk.bf16.vlgmr.msra.gmra.mxu0 %vm204_vm3, %v363_v10 }
 0x59d   :  { %3547 = vmatpush3.bf16.msra.mxu0 %v4265_v15  ;;  %3550 = vmatprep.mubr.msk.bf16.mxu0 %vm4200_vm2, %v4199_v14 }
 0x59e   :  { %3548 = vmatprep.subr.bf16.mxu0 %v4199_v14 }
 0x5a1   :  { %3549 = vmatpush3.bf16.msra.mxu0 %v4268_v16 }
 0x5a2   :  { %3562 = vmatprep.subr.bf16.mxu0 %v4199_v14 }
 0x65c   :  { %v401_v11 = vpop.f32.mrf.mxu0 }
 0x65d   :  { %v407_v12 = vadd.f32 %v401_v11, %v4295_v21 }
 0x65e   :  { %v3536_v13 = vpop.f32.mrf.mxu0 }
 0x65f   :  { %3866 = vtanh.f32 %v407_v12  ;;  %v3286_v23 = vmul.f32 -1.442695, %v407_v12 }
 0x660   :  { %v404_v18 = vpop.f32.mrf.mxu0 }
 0x661   :  { %3868 = vpow2.f32 %v3286_v23 }
 0x662   :  { %v3537_v19 = vpop.f32.mrf.mxu0 }
 0x66c   :  { %v3867_v20 = vpop.eup %3866 }
 0x66d   :  { %417 = vrot.lane.b32.xlu0 %v3867_v20, %s4193_s27 }
 0x66e   :  { %v3869_v24 = vpop.eup %3868 }
 0x66f   :  { %v411_v26 = vadd.f32 1.0, %v3869_v24 }
 0x671   :  { %3870 = vrcp.f32 %v411_v26 }
 0x67e   :  { %v3871_v27 = vpop.eup %3870 }
 0x67f   :  { %v415_v33 = vmul.f32 %v3871_v27, %v345_v5 }
 0x6df   :  { %v418_v30 = vpop.permute.xlu0 %417 }
 0x6e0   :  { %v420_v31 = vmul.f32 %v3871_v27, %v418_v30 }
 0x6e2   :  { %422 = vrot.lane.b32.xlu1 %v420_v31, %s4202_s20 }
 0x754   :  { %v423_v34 = vpop.permute.xlu1 %422 }
 0x755   :  { %v425_v21 = vadd.f32 %v423_v34, %v415_v33 }
 0x757   :  { %3872 = vtanh.f32 %v425_v21 }
 0x764   :  { %v3873_v35 = vpop.eup %3872 }
 0x765   :  { %428 = vrot.lane.b32.xlu0 %v3873_v35, %s4193_s27 }
 0x7d7   :  { %v429_v36 = vpop.permute.xlu0 %428 }
 0x7d8   :  { %v4341_v37 = vmul.f32 %v3871_v27, %v429_v36 }
 0x7da   :  { %v440_v38 = vpack.c.bf16 %v4341_v37, %v4341_v37 }
 0x7dc   :  { %442 = vrot.lane.b32.xlu1 %v440_v38, %s4202_s20 }
 0x84e   :  { %v443_v39 = vpop.permute.xlu1 %442 }
 0x84f   :  { %3543 = vmatmul.mubr.msk.bf16.vlgmr.msra.gmra.mxu1 %vm204_vm3, %v443_v39 }
 0x850   :  { %3555 = vmatpush3.bf16.msra.mxu1 %v4265_v15  ;;  %3558 = vmatprep.mubr.msk.bf16.mxu1 %vm4200_vm2, %v4199_v14 }
 0x851   :  { %3556 = vmatprep.subr.bf16.mxu1 %v4199_v14 }
 0x854   :  { %3557 = vmatpush3.bf16.msra.mxu1 %v4268_v16 }
 0x855   :  { %3570 = vmatprep.subr.bf16.mxu1 %v4199_v14 }
 0x90f   :  { %v481_v40 = vpop.f32.mrf.mxu1 }
 0x910   :  { %v487_v41 = vadd.f32 %v481_v40, %v4301_v28 }
 0x911   :  { %v3544_v42 = vpop.f32.mrf.mxu1 }
 0x912   :  { %3874 = vtanh.f32 %v487_v41  ;;  %v3288_v46 = vmul.f32 -1.442695, %v487_v41 }
 0x913   :  { %v484_v43 = vpop.f32.mrf.mxu1 }
 0x914   :  { %3876 = vpow2.f32 %v3288_v46 }
 0x915   :  { %v3545_v44 = vpop.f32.mrf.mxu1 }
 0x91f   :  { %v3875_v45 = vpop.eup %3874 }
 0x920   :  { %497 = vrot.lane.b32.xlu0 %v3875_v45, %s4193_s27 }
 0x921   :  { %v3877_v47 = vpop.eup %3876 }
 0x922   :  { %v491_v48 = vadd.f32 1.0, %v3877_v47 }
 0x924   :  { %3878 = vrcp.f32 %v491_v48 }
 0x931   :  { %v3879_v49 = vpop.eup %3878 }
 0x932   :  { %v495_v53 = vmul.f32 %v3879_v49, %v425_v21 }
 0x992   :  { %v498_v51 = vpop.permute.xlu0 %497 }
 0x993   :  { %v500_v52 = vmul.f32 %v3879_v49, %v498_v51 }
 0x995   :  { %502 = vrot.lane.b32.xlu1 %v500_v52, %s4202_s20 }
 0xa07   :  { %v503_v54 = vpop.permute.xlu1 %502 }
 0xa08   :  { %v505_v28 = vadd.f32 %v503_v54, %v495_v53 }
 0xa0a   :  { %3880 = vtanh.f32 %v505_v28 }
 0xa17   :  { %v3881_v55 = vpop.eup %3880 }
 0xa18   :  { %508 = vrot.lane.b32.xlu0 %v3881_v55, %s4193_s27 }
 0xa8a   :  { %v509_v56 = vpop.permute.xlu0 %508 }
 0xa8b   :  { %v4357_v57 = vmul.f32 %v3879_v49, %v509_v56 }
 0xa8d   :  { %v520_v58 = vpack.c.bf16 %v4357_v57, %v4357_v57 }
 0xa8f   :  { %522 = vrot.lane.b32.xlu1 %v520_v58, %s4202_s20 }
 0xb01   :  { %v523_v59 = vpop.permute.xlu1 %522 }
 0xb02   :  { %3551 = vmatmul.mubr.msk.bf16.vlgmr.msra.gmra.mxu0 %vm204_vm3, %v523_v59 }
 0xb03   :  { %3563 = vmatpush3.bf16.msra.mxu0 %v4265_v15  ;;  %3566 = vmatprep.mubr.msk.bf16.mxu0 %vm4200_vm2, %v4199_v14 }
 0xb04   :  { %3564 = vmatprep.subr.bf16.mxu0 %v4199_v14 }
 0xb07   :  { %3565 = vmatpush3.bf16.msra.mxu0 %v4268_v16 }
 0xbc2   :  { %v561_v60 = vpop.f32.mrf.mxu0 }
 0xbc3   :  { %v567_v61 = vadd.f32 %v561_v60, %v4299_v25  ;;  %v3836_v60 = vld [vmem:[#allocation7 + $0x8] sm:$0xff]  }
 0xbc4   :  { %v3552_v62 = vpop.f32.mrf.mxu0  ;;  %3578 = vmatprep.subr.bf16.mxu0 %v3836_v60 }
 0xbc5   :  { %3882 = vtanh.f32 %v567_v61  ;;  %v3290_v2 = vmul.f32 -1.442695, %v567_v61  ;;  %v3837_v61 = vld [vmem:[#allocation7] sm:$0xff]  }
 0xbc6   :  { %v564_v63 = vpop.f32.mrf.mxu0 }
 0xbc7   :  { %3884 = vpow2.f32 %v3290_v2 }
 0xbc8   :  { %v3553_v0 = vpop.f32.mrf.mxu0 }
 0xbd2   :  { %v3883_v1 = vpop.eup %3882 }
 0xbd3   :  { %577 = vrot.lane.b32.xlu0 %v3883_v1, %s4193_s27 }
 0xbd4   :  { %v3885_v3 = vpop.eup %3884 }
 0xbd5   :  { %v571_v4 = vadd.f32 1.0, %v3885_v3 }
 0xbd7   :  { %3886 = vrcp.f32 %v571_v4 }
 0xbe4   :  { %v3887_v5 = vpop.eup %3886 }
 0xbe5   :  { %v575_v9 = vmul.f32 %v3887_v5, %v505_v28 }
 0xc45   :  { %v578_v6 = vpop.permute.xlu0 %577 }
 0xc46   :  { %v580_v7 = vmul.f32 %v3887_v5, %v578_v6  ;;  %v4420_v6 = vld [vmem:[#allocation9 + $0x18] sm:$0xff]  }
 0xc48   :  { %582 = vrot.lane.b32.xlu1 %v580_v7, %s4202_s20  ;;  %v4425_v7 = vld [vmem:[#allocation9 + $0x10] sm:$0xff]  }
 0xcba   :  { %v583_v10 = vpop.permute.xlu1 %582 }
 0xcbb   :  { %v585_v25 = vadd.f32 %v583_v10, %v575_v9 }
 0xcbd   :  { %3888 = vtanh.f32 %v585_v25 }
 0xcca   :  { %v3889_v11 = vpop.eup %3888 }
 0xccb   :  { %588 = vrot.lane.b32.xlu0 %v3889_v11, %s4193_s27 }
 0xd3d   :  { %v589_v12 = vpop.permute.xlu0 %588 }
 0xd3e   :  { %v4372_v13 = vmul.f32 %v3887_v5, %v589_v12 }
 0xd40   :  { %v600_v18 = vpack.c.bf16 %v4372_v13, %v4372_v13 }
 0xd42   :  { %602 = vrot.lane.b32.xlu1 %v600_v18, %s4202_s20 }
 0xdb4   :  { %v603_v19 = vpop.permute.xlu1 %602 }
 0xdb5   :  { %3559 = vmatmul.mubr.msk.bf16.vlgmr.msra.gmra.mxu1 %vm204_vm3, %v603_v19 }
 0xdb6   :  { %3571 = vmatpush3.bf16.msra.mxu1 %v4265_v15  ;;  %3574 = vmatprep.mubr.msk.bf16.mxu1 %vm4200_vm2, %v4199_v14 }
 0xdb7   :  { %3572 = vmatprep.subr.bf16.mxu1 %v4199_v14 }
 0xdba   :  { %3573 = vmatpush3.bf16.msra.mxu1 %v4268_v16 }
 0xdbb   :  { %3590 = vmatprep.subr.bf16.mxu1 %v4199_v14 }
 0xe75   :  { %v641_v20 = vpop.f32.mrf.mxu1 }
 0xe76   :  { %v647_v23 = vadd.f32 %v641_v20, %v4305_v32  ;;  %v4449_v20 = vld [vmem:[%s4999_s4 + $0x1] ss:$0 sm:$0xff] }
 0xe77   :  { %v3560_v24 = vpop.f32.mrf.mxu1 }
 0xe78   :  { %3890 = vtanh.f32 %v647_v23  ;;  %v3292_v15 = vmul.f32 -1.442695, %v647_v23 }
 0xe79   :  { %v644_v26 = vpop.f32.mrf.mxu1 }
 0xe7a   :  { %3892 = vpow2.f32 %v3292_v15 }
 0xe7b   :  { %v3561_v27 = vpop.f32.mrf.mxu1 }
 0xe85   :  { %v3891_v30 = vpop.eup %3890 }
 0xe86   :  { %657 = vrot.lane.b32.xlu0 %v3891_v30, %s4193_s27 }
 0xe87   :  { %v3893_v31 = vpop.eup %3892 }
 0xe88   :  { %v651_v33 = vadd.f32 1.0, %v3893_v31 }
 0xe8a   :  { %3894 = vrcp.f32 %v651_v33 }
 0xe97   :  { %v3895_v34 = vpop.eup %3894 }
 0xe98   :  { %v655_v35 = vmul.f32 %v3895_v34, %v585_v25 }
 0xef8   :  { %v658_v21 = vpop.permute.xlu0 %657 }
 0xef9   :  { %v660_v16 = vmul.f32 %v3895_v34, %v658_v21 }
 0xefb   :  { %662 = vrot.lane.b32.xlu1 %v660_v16, %s4202_s20 }
 0xf6d   :  { %v663_v36 = vpop.permute.xlu1 %662 }
 0xf6e   :  { %v665_v32 = vadd.f32 %v663_v36, %v655_v35 }
 0xf70   :  { %3896 = vtanh.f32 %v665_v32 }
 0xf7d   :  { %v3897_v38 = vpop.eup %3896 }
 0xf7e   :  { %668 = vrot.lane.b32.xlu0 %v3897_v38, %s4193_s27 }
 0xff0   :  { %v669_v39 = vpop.permute.xlu0 %668 }
 0xff1   :  { %v4388_v40 = vmul.f32 %v3895_v34, %v669_v39 }
 0xff3   :  { %v680_v41 = vpack.c.bf16 %v4388_v40, %v4388_v40 }
 0xff5   :  { %682 = vrot.lane.b32.xlu1 %v680_v41, %s4202_s20 }
0x1067   :  { %v683_v42 = vpop.permute.xlu1 %682 }
0x1068   :  { %3567 = vmatmul.mubr.msk.bf16.vlgmr.msra.gmra.mxu0 %vm204_vm3, %v683_v42 }
0x1069   :  { %3579 = vmatpush3.bf16.msra.mxu0 %v3836_v60 }
0x106a   :  { %3580 = vmatprep.subr.bf16.mxu0 %v3837_v61 }
0x106d   :  { %3581 = vmatpush3.bf16.msra.mxu0 %v3837_v61 }
0x106e   :  { %3606 = vmatprep.subr.bf16.mxu0 %v4199_v14 }
0x1128   :  { %v721_v43 = vpop.f32.mrf.mxu0 }
0x1129   :  { %v727_v44 = vadd.f32 %v721_v43, %v4297_v22 }
0x112a   :  { %v3568_v45 = vpop.f32.mrf.mxu0 }
0x112b   :  { %3898 = vtanh.f32 %v727_v44  ;;  %v3294_v49 = vmul.f32 -1.442695, %v727_v44 }
0x112c   :  { %v724_v46 = vpop.f32.mrf.mxu0 }
0x112d   :  { %3900 = vpow2.f32 %v3294_v49 }
0x112e   :  { %v3569_v47 = vpop.f32.mrf.mxu0 }
0x1138   :  { %v3899_v48 = vpop.eup %3898 }
0x1139   :  { %737 = vrot.lane.b32.xlu0 %v3899_v48, %s4193_s27 }
0x113a   :  { %v3901_v51 = vpop.eup %3900 }
0x113b   :  { %v731_v52 = vadd.f32 1.0, %v3901_v51 }
0x113d   :  { %3902 = vrcp.f32 %v731_v52 }
0x114a   :  { %v3903_v53 = vpop.eup %3902 }
0x114b   :  { %v735_v22 = vmul.f32 %v3903_v53, %v665_v32 }
0x11ab   :  { %v738_v54 = vpop.permute.xlu0 %737 }
0x11ac   :  { %v740_v28 = vmul.f32 %v3903_v53, %v738_v54 }
0x11ae   :  { %742 = vrot.lane.b32.xlu1 %v740_v28, %s4202_s20 }
0x11b2   :  { %274 = vrot.lane.b32.xlu1 %v4310_v50, %s4202_s20 }
0x11b6   :  { %433 = vrot.lane.b32.xlu1 %v4341_v37, %s4202_s20 }
0x1220   :  { %v743_v55 = vpop.permute.xlu1 %742 }
0x1221   :  { %v4401_v56 = vadd.f32 %v743_v55, %v735_v22 }
0x1223   :  { %3904 = vtanh.f32 %v4401_v56 }
0x1224   :  { %v275_v58 = vpop.permute.xlu1 %274 }
0x1225   :  { %277 = vst.msk [vmem:[#allocation2] sm:$0xff] %vm204_vm3, %v275_v58 }
0x1228   :  { %v434_v59 = vpop.permute.xlu1 %433 }
0x1229   :  { %437 = vst.msk [vmem:[#allocation2 + $0x10] sm:$0xff] %vm204_vm3, %v434_v59 }
0x122c   :  { %v838_v2 = vld [vmem:[#allocation2] sm:$0xff] }
0x1230   :  { %v3905_v50 = vpop.eup %3904 }
0x1231   :  { %748 = vrot.lane.b32.xlu0 %v3905_v50, %s4193_s27 }
0x1235   :  { %353 = vrot.lane.b32.xlu0 %v4325_v8, %s4202_s20 }
0x1239   :  { %513 = vrot.lane.b32.xlu0 %v4357_v57, %s4202_s20  ;;  %v840_v57 = vld [vmem:[#allocation2 + $0x10] sm:$0xff] }
0x12a3   :  { %v749_v37 = vpop.permute.xlu0 %748 }
0x12a4   :  { %v4412_v62 = vmul.f32 %v3903_v53, %v749_v37 }
0x12a6   :  { %v760_v63 = vpack.c.bf16 %v4412_v62, %v4412_v62 }
0x12a7   :  { %v354_v0 = vpop.permute.xlu0 %353 }
0x12a8   :  { %357 = vst.msk [vmem:[#allocation2 + $0x8] sm:$0xff] %vm204_vm3, %v354_v0  ;;  %762 = vrot.lane.b32.xlu1 %v760_v63, %s4202_s20 }
0x12ab   :  { %v514_v1 = vpop.permute.xlu0 %513 }
0x12ac   :  { %517 = vst.msk [vmem:[#allocation2 + $0x18] sm:$0xff] %vm204_vm3, %v514_v1 }
0x12af   :  { %v839_v3 = vld [vmem:[#allocation2 + $0x8] sm:$0xff] }
0x12b0   :  { %v846_v8 = vpack.c.bf16 %v839_v3, %v838_v2 }
0x12b2   :  { %3582 = vmatprep.mubr.msk.bf16.mxu0 %vm204_vm3, %v846_v8 }
0x12b3   :  { %v841_v4 = vld [vmem:[#allocation2 + $0x18] sm:$0xff] }
0x12b4   :  { %v847_v5 = vpack.c.bf16 %v841_v4, %v840_v57 }
0x12b6   :  { %3583 = vmatmul.mubr.msk.bf16.vlgmr.msra.gmra.mxu0 %vm204_vm3, %v847_v5 }
0x12b7   :  { %3607 = vmatpush3.bf16.msra.mxu0 %v4420_v6 }
0x12b8   :  { %3608 = vmatprep.subr.bf16.mxu0 %v4199_v14 }
0x12bb   :  { %3609 = vmatpush3.bf16.msra.mxu0 %v4425_v7 }
0x12bc   :  { %3622 = vmatprep.subr.bf16.mxu0 %v4199_v14 }
0x131a   :  { %v763_v9 = vpop.permute.xlu1 %762 }
0x131b   :  { %3575 = vmatmul.mubr.msk.bf16.vlgmr.msra.gmra.mxu1 %vm204_vm3, %v763_v9 }
0x131c   :  { %3591 = vmatpush3.bf16.msra.mxu1 %v4420_v6  ;;  %3594 = vmatprep.mubr.msk.bf16.mxu1 %vm4200_vm2, %v4199_v14 }
0x131d   :  { %3592 = vmatprep.subr.bf16.mxu1 %v4199_v14 }
0x1320   :  { %3593 = vmatpush3.bf16.msra.mxu1 %v4425_v7 }
0x1321   :  { %3598 = vmatprep.subr.bf16.mxu1 %v4199_v14 }
0x1323   :  { %3595 = vmatmul.mubr.bf16.vlgmr.msra.gmra.mxu1 %v4201_v17 }
0x1324   :  { %3599 = vmatpush3.bf16.msra.mxu1 %v4420_v6  ;;  %3602 = vmatprep.mubr.msk.bf16.mxu1 %vm4200_vm2, %v4199_v14 }
0x1325   :  { %3600 = vmatprep.subr.bf16.mxu1 %v4199_v14 }
0x1328   :  { %3601 = vmatpush3.bf16.msra.mxu1 %v4425_v7 }
0x1329   :  { %3614 = vmatprep.subr.bf16.mxu1 %v4199_v14 }
0x1376   :  { %v4443_v10 = vpop.f32.mrf.mxu0 }
0x1378   :  { %v912_v18 = vpop.f32.mrf.mxu0 }
0x1379   :  { %v951_v24 = vadd.f32 %v4449_v20, %v912_v18 }
0x137a   :  { %v4477_v60 = vpop.f32.mrf.mxu0 }
0x137c   :  { %v915_v61 = vpop.f32.mrf.mxu0 }
0x137d   :  { %v952_v50 = vadd.f32 %v4449_v20, %v915_v61 }
0x13db   :  { %v801_v25 = vpop.f32.mrf.mxu1 }
0x13dc   :  { %v807_v11 = vadd.f32 %v801_v25, %v4303_v29 }
0x13dd   :  { %v3576_v12 = vpop.f32.mrf.mxu1 }
0x13de   :  { %v3296_v43 = vmul.f32 -1.442695, %v807_v11 }
0x13df   :  { %v804_v19 = vpop.f32.mrf.mxu1 }
0x13e1   :  { %v3577_v23 = vpop.f32.mrf.mxu1 }
0x13e3   :  { %v1019_v26 = vpop.f32.mrf.mxu1 }
0x13e4   :  { %v1025_v27 = vadd.f32 %v1019_v26, %v951_v24 }
0x13e5   :  { %v3596_v30 = vpop.f32.mrf.mxu1 }
0x13e6   :  { %3906 = vtanh.f32 %v1025_v27  ;;  %v3307_v29 = vmul.f32 -1.442695, %v1025_v27 }
0x13e7   :  { %v1022_v15 = vpop.f32.mrf.mxu1 }
0x13e8   :  { %3908 = vpow2.f32 %v3307_v29 }
0x13e9   :  { %v3597_v31 = vpop.f32.mrf.mxu1 }
0x13f3   :  { %v3907_v33 = vpop.eup %3906 }
0x13f4   :  { %1035 = vrot.lane.b32.xlu0 %v3907_v33, %s4193_s27 }
0x13f5   :  { %v3909_v34 = vpop.eup %3908 }
0x13f6   :  { %v1029_v21 = vadd.f32 1.0, %v3909_v34 }
0x13f8   :  { %3910 = vrcp.f32 %v1029_v21 }
0x1405   :  { %v3911_v16 = vpop.eup %3910 }
0x1406   :  { %v1033_v32 = vmul.f32 0.0, %v3911_v16 }
0x1466   :  { %v1036_v35 = vpop.permute.xlu0 %1035 }
0x1467   :  { %v1038_v36 = vmul.f32 %v3911_v16, %v1036_v35 }
0x1469   :  { %1040 = vrot.lane.b32.xlu1 %v1038_v36, %s4202_s20 }
0x14db   :  { %v1041_v38 = vpop.permute.xlu1 %1040 }
0x14dc   :  { %v1043_v39 = vadd.f32 %v1041_v38, %v1033_v32  ;;  %v953_v32 = vadd.f32 %v4443_v10, %v4449_v20 }
0x14de   :  { %3912 = vtanh.f32 %v1043_v39 }
0x14df   :  { %3914 = vtanh.f32 %v807_v11 }
0x14e0   :  { %3916 = vpow2.f32 %v3296_v43 }
0x14eb   :  { %v3913_v41 = vpop.eup %3912 }
0x14ec   :  { %1046 = vrot.lane.b32.xlu0 %v3913_v41, %s4193_s27  ;;  %v3915_v42 = vpop.eup %3914 }
0x14ed   :  { %v3917_v44 = vpop.eup %3916 }
0x14ee   :  { %v811_v45 = vadd.f32 1.0, %v3917_v44 }
0x14f0   :  { %817 = vrot.lane.b32.xlu0 %v3915_v42, %s4193_s27  ;;  %3918 = vrcp.f32 %v811_v45 }
0x14fd   :  { %v3919_v49 = vpop.eup %3918 }
0x14fe   :  { %v815_v54 = vmul.f32 %v3919_v49, %v4401_v56 }
0x155e   :  { %v1047_v46 = vpop.permute.xlu0 %1046 }
0x155f   :  { %v4456_v47 = vmul.f32 %v3911_v16, %v1047_v46 }
0x1561   :  { %v1056_v48 = vpack.c.bf16 %v4456_v47, %v4456_v47 }
0x1562   :  { %v818_v51 = vpop.permute.xlu0 %817 }
0x1563   :  { %v820_v52 = vmul.f32 %v3919_v49, %v818_v51  ;;  %1058 = vrot.lane.b32.xlu1 %v1056_v48, %s4202_s20 }
0x1565   :  { %822 = vrot.lane.b32.xlu0 %v820_v52, %s4202_s20 }
0x15d5   :  { %v1059_v53 = vpop.permute.xlu1 %1058 }
0x15d6   :  { %3603 = vmatmul.mubr.msk.bf16.vlgmr.msra.gmra.mxu1 %vm204_vm3, %v1059_v53 }
0x15d7   :  { %v823_v28 = vpop.permute.xlu0 %822  ;;  %3615 = vmatpush3.bf16.msra.mxu1 %v4420_v6  ;;  %3618 = vmatprep.mubr.msk.bf16.mxu1 %vm4200_vm2, %v4199_v14 }
0x15d8   :  { %v825_v22 = vadd.f32 %v823_v28, %v815_v54  ;;  %3616 = vmatprep.subr.bf16.mxu1 %v4199_v14 }
0x15da   :  { %3920 = vtanh.f32 %v825_v22 }
0x15db   :  { %3617 = vmatpush3.bf16.msra.mxu1 %v4425_v7 }
0x15dc   :  { %3630 = vmatprep.subr.bf16.mxu1 %v4199_v14 }
0x15e7   :  { %v3921_v55 = vpop.eup %3920 }
0x15e8   :  { %828 = vrot.lane.b32.xlu0 %v3921_v55, %s4193_s27 }
0x15ec   :  { %593 = vrot.lane.b32.xlu0 %v4372_v13, %s4202_s20 }
0x15f0   :  { %753 = vrot.lane.b32.xlu0 %v4412_v62, %s4202_s20 }
0x165a   :  { %v829_v56 = vpop.permute.xlu0 %828 }
0x165b   :  { %v831_v18 = vmul.f32 %v3919_v49, %v829_v56 }
0x165e   :  { %v594_v58 = vpop.permute.xlu0 %593 }
0x165f   :  { %597 = vst.msk [vmem:[#allocation2 + $0x20] sm:$0xff] %vm204_vm3, %v594_v58 }
0x1662   :  { %v754_v59 = vpop.permute.xlu0 %753 }
0x1663   :  { %757 = vst.msk [vmem:[#allocation2 + $0x30] sm:$0xff] %vm204_vm3, %v754_v59  ;;  %v954_v59 = vadd.f32 %v4477_v60, %v4449_v20 }
0x1666   :  { %v842_v30 = vld [vmem:[#allocation2 + $0x20] sm:$0xff] }
0x166a   :  { %v844_v31 = vld [vmem:[#allocation2 + $0x30] sm:$0xff] }
0x1696   :  { %v1097_v37 = vpop.f32.mrf.mxu1 }
0x1697   :  { %v1103_v63 = vadd.f32 %v1097_v37, %v952_v50 }
0x1698   :  { %v3604_v0 = vpop.f32.mrf.mxu1 }
0x1699   :  { %3922 = vtanh.f32 %v1103_v63  ;;  %v3309_v62 = vmul.f32 -1.442695, %v1103_v63 }
0x169a   :  { %v1100_v13 = vpop.f32.mrf.mxu1 }
0x169b   :  { %3924 = vpow2.f32 %v3309_v62 }
0x169c   :  { %v3605_v1 = vpop.f32.mrf.mxu1 }
0x16a6   :  { %v3923_v2 = vpop.eup %3922 }
0x16a7   :  { %1113 = vrot.lane.b32.xlu1 %v3923_v2, %s4193_s27 }
0x16a8   :  { %v3925_v3 = vpop.eup %3924 }
0x16a9   :  { %v1107_v8 = vadd.f32 1.0, %v3925_v3 }
0x16ab   :  { %3926 = vrcp.f32 %v1107_v8 }
0x16b8   :  { %v3927_v57 = vpop.eup %3926 }
0x16b9   :  { %v1111_v9 = vmul.f32 %v3927_v57, %v1043_v39 }
0x1719   :  { %v1114_v4 = vpop.permute.xlu1 %1113 }
0x171a   :  { %v1116_v5 = vmul.f32 %v3927_v57, %v1114_v4 }
0x171c   :  { %1118 = vrot.lane.b32.xlu1 %v1116_v5, %s4202_s20 }
0x178e   :  { %v1119_v25 = vpop.permute.xlu1 %1118 }
0x178f   :  { %v1121_v11 = vadd.f32 %v1119_v25, %v1111_v9 }
0x1791   :  { %3928 = vtanh.f32 %v1121_v11 }
0x179e   :  { %v3929_v12 = vpop.eup %3928 }
0x179f   :  { %1124 = vrot.lane.b32.xlu1 %v3929_v12, %s4193_s27 }
0x17a3   :  { %673 = vrot.lane.b32.xlu1 %v4388_v40, %s4202_s20 }
0x17a7   :  { %833 = vrot.lane.b32.xlu1 %v831_v18, %s4202_s20 }
0x1811   :  { %v1125_v19 = vpop.permute.xlu1 %1124 }
0x1812   :  { %v4486_v23 = vmul.f32 %v3927_v57, %v1125_v19 }
0x1814   :  { %v1134_v24 = vpack.c.bf16 %v4486_v23, %v4486_v23 }
0x1815   :  { %v674_v26 = vpop.permute.xlu1 %673 }
0x1816   :  { %677 = vst.msk [vmem:[#allocation2 + $0x28] sm:$0xff] %vm204_vm3, %v674_v26  ;;  %1136 = vrot.lane.b32.xlu0 %v1134_v24, %s4202_s20 }
0x1819   :  { %v834_v27 = vpop.permute.xlu1 %833 }
0x181a   :  { %837 = vst.msk [vmem:[#allocation2 + $0x38] sm:$0xff] %vm204_vm3, %v834_v27 }
0x181d   :  { %v843_v15 = vld [vmem:[#allocation2 + $0x28] sm:$0xff] }
0x181e   :  { %v848_v40 = vpack.c.bf16 %v843_v15, %v842_v30 }
0x1820   :  { %3586 = vmatprep.mubr.msk.bf16.mxu0 %vm204_vm3, %v848_v40 }
0x1821   :  { %v845_v33 = vld [vmem:[#allocation2 + $0x38] sm:$0xff] }
0x1822   :  { %v849_v29 = vpack.c.bf16 %v845_v33, %v844_v31 }
0x1824   :  { %3587 = vmatmul.mubr.msk.bf16.gmra.mxu0 %vm204_vm3, %v849_v29 }
0x1825   :  { %3610 = vmatprep.mubr.msk.bf16.mxu0 %vm4200_vm2, %v4199_v14 }
0x1888   :  { %v1137_v34 = vpop.permute.xlu0 %1136 }
0x1889   :  { %3611 = vmatmul.mubr.msk.bf16.vlgmr.msra.gmra.mxu0 %vm204_vm3, %v1137_v34 }
0x188a   :  { %3623 = vmatpush3.bf16.msra.mxu0 %v4420_v6  ;;  %3626 = vmatprep.mubr.msk.bf16.mxu0 %vm4200_vm2, %v4199_v14 }
0x188b   :  { %3624 = vmatprep.subr.bf16.mxu0 %v4199_v14 }
0x188e   :  { %3625 = vmatpush3.bf16.msra.mxu0 %v4425_v7 }
0x188f   :  { %3638 = vmatprep.subr.bf16.mxu0 %v4199_v14 }
0x18e4   :  { %v4504_v21 = vpop.f32.mrf.mxu0 }
0x18e6   :  { %v4506_v16 = vpop.f32.mrf.mxu0 }
0x18e7   :  { %v955_v19 = vadd.f32 %v4449_v20, %v4506_v16 }
0x18e8   :  { %v4508_v35 = vpop.f32.mrf.mxu0 }
0x18ea   :  { %v4510_v36 = vpop.f32.mrf.mxu0 }
0x1949   :  { %v1175_v38 = vpop.f32.mrf.mxu0 }
0x194a   :  { %v1181_v39 = vadd.f32 %v1175_v38, %v953_v32 }
0x194b   :  { %v3612_v41 = vpop.f32.mrf.mxu0 }
0x194c   :  { %3930 = vtanh.f32 %v1181_v39  ;;  %v3311_v45 = vmul.f32 -1.442695, %v1181_v39 }
0x194d   :  { %v1178_v42 = vpop.f32.mrf.mxu0 }
0x194e   :  { %3932 = vpow2.f32 %v3311_v45 }
0x194f   :  { %v3613_v43 = vpop.f32.mrf.mxu0 }
0x1959   :  { %v3931_v44 = vpop.eup %3930 }
0x195a   :  { %1191 = vrot.lane.b32.xlu1 %v3931_v44, %s4193_s27 }
0x195b   :  { %v3933_v46 = vpop.eup %3932 }
0x195c   :  { %v1185_v48 = vadd.f32 1.0, %v3933_v46 }
0x195e   :  { %3934 = vrcp.f32 %v1185_v48  ;;  %v956_v48 = vadd.f32 %v4449_v20, %v4510_v36 }
0x196b   :  { %v3935_v49 = vpop.eup %3934 }
0x196c   :  { %v1189_v10 = vmul.f32 %v3935_v49, %v1121_v11 }
0x19cc   :  { %v1192_v51 = vpop.permute.xlu1 %1191 }
0x19cd   :  { %v1194_v52 = vmul.f32 %v3935_v49, %v1192_v51 }
0x19cf   :  { %1196 = vrot.lane.b32.xlu0 %v1194_v52, %s4202_s20 }
0x1a41   :  { %v1197_v53 = vpop.permute.xlu0 %1196 }
0x1a42   :  { %v1199_v54 = vadd.f32 %v1197_v53, %v1189_v10 }
0x1a44   :  { %3936 = vtanh.f32 %v1199_v54 }
0x1a51   :  { %v3937_v28 = vpop.eup %3936 }
0x1a52   :  { %1202 = vrot.lane.b32.xlu1 %v3937_v28, %s4193_s27 }
0x1ac4   :  { %v1203_v22 = vpop.permute.xlu1 %1202 }
0x1ac5   :  { %v4517_v55 = vmul.f32 %v3935_v49, %v1203_v22 }
0x1ac7   :  { %v1212_v56 = vpack.c.bf16 %v4517_v55, %v4517_v55 }
0x1ac9   :  { %1214 = vrot.lane.b32.xlu0 %v1212_v56, %s4202_s20 }
0x1b3b   :  { %v1215_v58 = vpop.permute.xlu0 %1214 }
0x1b3c   :  { %3619 = vmatmul.mubr.msk.bf16.vlgmr.msra.gmra.mxu1 %vm204_vm3, %v1215_v58 }
0x1b3d   :  { %3631 = vmatpush3.bf16.msra.mxu1 %v4420_v6  ;;  %3634 = vmatprep.mubr.msk.bf16.mxu1 %vm4200_vm2, %v4199_v14 }
0x1b3e   :  { %3632 = vmatprep.subr.bf16.mxu1 %v4199_v14 }
0x1b41   :  { %3633 = vmatpush3.bf16.msra.mxu1 %v4425_v7 }
0x1b42   :  { %3646 = vmatprep.subr.bf16.mxu1 %v4199_v14 }
0x1bfc   :  { %v1253_v61 = vpop.f32.mrf.mxu1 }
0x1bfd   :  { %v1259_v50 = vadd.f32 %v1253_v61, %v954_v59 }
0x1bfe   :  { %v3620_v37 = vpop.f32.mrf.mxu1 }
0x1bff   :  { %3938 = vtanh.f32 %v1259_v50  ;;  %v3313_v1 = vmul.f32 -1.442695, %v1259_v50 }
0x1c00   :  { %v1256_v63 = vpop.f32.mrf.mxu1 }
0x1c01   :  { %3940 = vpow2.f32 %v3313_v1  ;;  %v957_v1 = vadd.f32 %v4504_v21, %v4449_v20 }
0x1c02   :  { %v3621_v0 = vpop.f32.mrf.mxu1 }
0x1c0c   :  { %v3939_v13 = vpop.eup %3938 }
0x1c0d   :  { %1269 = vrot.lane.b32.xlu1 %v3939_v13, %s4193_s27 }
0x1c0e   :  { %v3941_v2 = vpop.eup %3940 }
0x1c0f   :  { %v1263_v62 = vadd.f32 1.0, %v3941_v2 }
0x1c11   :  { %3942 = vrcp.f32 %v1263_v62 }
0x1c1e   :  { %v3943_v3 = vpop.eup %3942 }
0x1c1f   :  { %v1267_v60 = vmul.f32 %v3943_v3, %v1199_v54 }
0x1c7f   :  { %v1270_v8 = vpop.permute.xlu1 %1269 }
0x1c80   :  { %v1272_v57 = vmul.f32 %v3943_v3, %v1270_v8 }
0x1c82   :  { %1274 = vrot.lane.b32.xlu0 %v1272_v57, %s4202_s20 }
0x1cf4   :  { %v1275_v4 = vpop.permute.xlu0 %1274 }
0x1cf5   :  { %v1277_v5 = vadd.f32 %v1275_v4, %v1267_v60 }
0x1cf7   :  { %3944 = vtanh.f32 %v1277_v5 }
0x1d04   :  { %v3945_v9 = vpop.eup %3944 }
0x1d05   :  { %1280 = vrot.lane.b32.xlu1 %v3945_v9, %s4193_s27 }
0x1d77   :  { %v1281_v25 = vpop.permute.xlu1 %1280 }
0x1d78   :  { %v4534_v11 = vmul.f32 %v3943_v3, %v1281_v25 }
0x1d7a   :  { %v1290_v12 = vpack.c.bf16 %v4534_v11, %v4534_v11 }
0x1d7c   :  { %1292 = vrot.lane.b32.xlu0 %v1290_v12, %s4202_s20 }
0x1dee   :  { %v1293_v18 = vpop.permute.xlu0 %1292 }
0x1def   :  { %3627 = vmatmul.mubr.msk.bf16.vlgmr.msra.gmra.mxu0 %vm204_vm3, %v1293_v18 }
0x1df0   :  { %3639 = vmatpush3.bf16.msra.mxu0 %v4420_v6  ;;  %3642 = vmatprep.mubr.msk.bf16.mxu0 %vm4200_vm2, %v4199_v14 }
0x1df1   :  { %3640 = vmatprep.subr.bf16.mxu0 %v4199_v14 }
0x1df4   :  { %3641 = vmatpush3.bf16.msra.mxu0 %v4425_v7 }
0x1eaf   :  { %v1331_v24 = vpop.f32.mrf.mxu0 }
0x1eb0   :  { %v1337_v26 = vadd.f32 %v1331_v24, %v955_v19 }
0x1eb1   :  { %v3628_v27 = vpop.f32.mrf.mxu0 }
0x1eb2   :  { %3946 = vtanh.f32 %v1337_v26  ;;  %v3315_v31 = vmul.f32 -1.442695, %v1337_v26 }
0x1eb3   :  { %v1334_v30 = vpop.f32.mrf.mxu0 }
0x1eb4   :  { %3948 = vpow2.f32 %v3315_v31  ;;  %v3840_v30 = vld [vmem:[#allocation7 + $0x18] sm:$0xff]  }
0x1eb5   :  { %v3629_v15 = vpop.f32.mrf.mxu0  ;;  %3654 = vmatprep.subr.bf16.mxu0 %v3840_v30 }
0x1eb6   :  { %v3841_v15 = vld [vmem:[#allocation7 + $0x10] sm:$0xff]  }
0x1ebf   :  { %v3947_v40 = vpop.eup %3946 }
0x1ec0   :  { %1347 = vrot.lane.b32.xlu1 %v3947_v40, %s4193_s27 }
0x1ec1   :  { %v3949_v33 = vpop.eup %3948 }
0x1ec2   :  { %v1341_v29 = vadd.f32 1.0, %v3949_v33 }
0x1ec4   :  { %3950 = vrcp.f32 %v1341_v29 }
0x1ed1   :  { %v3951_v34 = vpop.eup %3950 }
0x1ed2   :  { %v1345_v16 = vmul.f32 %v3951_v34, %v1277_v5 }
0x1f32   :  { %v1348_v32 = vpop.permute.xlu1 %1347 }
0x1f33   :  { %v1350_v38 = vmul.f32 %v3951_v34, %v1348_v32 }
0x1f35   :  { %1352 = vrot.lane.b32.xlu0 %v1350_v38, %s4202_s20 }
0x1fa7   :  { %v1353_v39 = vpop.permute.xlu0 %1352 }
0x1fa8   :  { %v1355_v41 = vadd.f32 %v1353_v39, %v1345_v16  ;;  %v4600_v39 = vld [vmem:[#allocation9 + $0x28] sm:$0xff]  }
0x1faa   :  { %3952 = vtanh.f32 %v1355_v41 }
0x1fb7   :  { %v3953_v42 = vpop.eup %3952 }
0x1fb8   :  { %1358 = vrot.lane.b32.xlu1 %v3953_v42, %s4193_s27 }
0x202a   :  { %v1359_v43 = vpop.permute.xlu1 %1358 }
0x202b   :  { %v4550_v44 = vmul.f32 %v3951_v34, %v1359_v43  ;;  %v958_v43 = vadd.f32 %v4508_v35, %v4449_v20 }
0x202d   :  { %v1368_v45 = vpack.c.bf16 %v4550_v44, %v4550_v44 }
0x202f   :  { %1370 = vrot.lane.b32.xlu0 %v1368_v45, %s4202_s20 }
0x20a1   :  { %v1371_v46 = vpop.permute.xlu0 %1370 }
0x20a2   :  { %3635 = vmatmul.mubr.msk.bf16.vlgmr.msra.gmra.mxu1 %vm204_vm3, %v1371_v46 }
0x20a3   :  { %3647 = vmatpush3.bf16.msra.mxu1 %v4420_v6  ;;  %3650 = vmatprep.mubr.msk.bf16.mxu1 %vm4200_vm2, %v4199_v14 }
0x20a4   :  { %3648 = vmatprep.subr.bf16.mxu1 %v4199_v14 }
0x20a7   :  { %3649 = vmatpush3.bf16.msra.mxu1 %v4425_v7 }
0x20a8   :  { %3666 = vmatprep.subr.bf16.mxu1 %v4199_v14 }
0x2162   :  { %v1409_v49 = vpop.f32.mrf.mxu1 }
0x2163   :  { %v1415_v51 = vadd.f32 %v1409_v49, %v956_v48 }
0x2164   :  { %v3636_v52 = vpop.f32.mrf.mxu1 }
0x2165   :  { %3954 = vtanh.f32 %v1415_v51  ;;  %v3317_v6 = vmul.f32 -1.442695, %v1415_v51 }
0x2166   :  { %v1412_v10 = vpop.f32.mrf.mxu1 }
0x2167   :  { %3956 = vpow2.f32 %v3317_v6  ;;  %v4630_v10 = vld [vmem:[%s4999_s4 + $0x2] ss:$0 sm:$0xff] }
0x2168   :  { %v3637_v53 = vpop.f32.mrf.mxu1 }
0x2172   :  { %v3955_v54 = vpop.eup %3954 }
0x2173   :  { %1425 = vrot.lane.b32.xlu1 %v3955_v54, %s4193_s27 }
0x2174   :  { %v3957_v28 = vpop.eup %3956 }
0x2175   :  { %v1419_v22 = vadd.f32 1.0, %v3957_v28 }
0x2177   :  { %3958 = vrcp.f32 %v1419_v22 }
0x2184   :  { %v3959_v7 = vpop.eup %3958 }
0x2185   :  { %v1423_v36 = vmul.f32 %v3959_v7, %v1355_v41  ;;  %v4605_v41 = vld [vmem:[#allocation9 + $0x20] sm:$0xff]  }
0x21e5   :  { %v1426_v56 = vpop.permute.xlu1 %1425 }
0x21e6   :  { %v1428_v58 = vmul.f32 %v3959_v7, %v1426_v56 }
0x21e8   :  { %1430 = vrot.lane.b32.xlu0 %v1428_v58, %s4202_s20 }
0x225a   :  { %v1431_v59 = vpop.permute.xlu0 %1430 }
0x225b   :  { %v1433_v61 = vadd.f32 %v1431_v59, %v1423_v36 }
0x225d   :  { %3960 = vtanh.f32 %v1433_v61 }
0x226a   :  { %v3961_v50 = vpop.eup %3960 }
0x226b   :  { %1436 = vrot.lane.b32.xlu1 %v3961_v50, %s4193_s27 }
0x22dd   :  { %v1437_v37 = vpop.permute.xlu1 %1436 }
0x22de   :  { %v4567_v63 = vmul.f32 %v3959_v7, %v1437_v37 }
0x22e0   :  { %v1446_v0 = vpack.c.bf16 %v4567_v63, %v4567_v63 }
0x22e2   :  { %1448 = vrot.lane.b32.xlu0 %v1446_v0, %s4202_s20 }
0x2354   :  { %v1449_v13 = vpop.permute.xlu0 %1448 }
0x2355   :  { %3643 = vmatmul.mubr.msk.bf16.vlgmr.msra.gmra.mxu0 %vm204_vm3, %v1449_v13 }
0x2356   :  { %3655 = vmatpush3.bf16.msra.mxu0 %v3840_v30 }
0x2357   :  { %3656 = vmatprep.subr.bf16.mxu0 %v3841_v15 }
0x235a   :  { %3657 = vmatpush3.bf16.msra.mxu0 %v3841_v15 }
0x235b   :  { %3682 = vmatprep.subr.bf16.mxu0 %v4199_v14 }
0x2415   :  { %v1487_v2 = vpop.f32.mrf.mxu0 }
0x2416   :  { %v1493_v62 = vadd.f32 %v1487_v2, %v957_v1 }
0x2417   :  { %v3644_v3 = vpop.f32.mrf.mxu0 }
0x2418   :  { %3962 = vtanh.f32 %v1493_v62  ;;  %v3319_v4 = vmul.f32 -1.442695, %v1493_v62 }
0x2419   :  { %v1490_v8 = vpop.f32.mrf.mxu0 }
0x241a   :  { %3964 = vpow2.f32 %v3319_v4 }
0x241b   :  { %v3645_v57 = vpop.f32.mrf.mxu0 }
0x2425   :  { %v3963_v60 = vpop.eup %3962 }
0x2426   :  { %1503 = vrot.lane.b32.xlu1 %v3963_v60, %s4193_s27 }
0x2427   :  { %v3965_v5 = vpop.eup %3964 }
0x2428   :  { %v1497_v9 = vadd.f32 1.0, %v3965_v5 }
0x242a   :  { %3966 = vrcp.f32 %v1497_v9 }
0x2437   :  { %v3967_v25 = vpop.eup %3966 }
0x2438   :  { %v1501_v21 = vmul.f32 %v3967_v25, %v1433_v61 }
0x2498   :  { %v1504_v12 = vpop.permute.xlu1 %1503 }
0x2499   :  { %v1506_v18 = vmul.f32 %v3967_v25, %v1504_v12 }
0x249b   :  { %1508 = vrot.lane.b32.xlu0 %v1506_v18, %s4202_s20 }
0x249f   :  { %1051 = vrot.lane.b32.xlu0 %v4456_v47, %s4202_s20 }
0x24a3   :  { %1207 = vrot.lane.b32.xlu0 %v4517_v55, %s4202_s20 }
0x250d   :  { %v1509_v19 = vpop.permute.xlu0 %1508 }
0x250e   :  { %v4581_v24 = vadd.f32 %v1509_v19, %v1501_v21 }
0x2510   :  { %3968 = vtanh.f32 %v4581_v24 }
0x2511   :  { %v1052_v26 = vpop.permute.xlu0 %1051 }
0x2512   :  { %1054 = vst.msk [vmem:[#allocation2] sm:$0xff] %vm204_vm3, %v1052_v26 }
0x2515   :  { %v1208_v27 = vpop.permute.xlu0 %1207 }
0x2516   :  { %1210 = vst.msk [vmem:[#allocation2 + $0x10] sm:$0xff] %vm204_vm3, %v1208_v27 }
0x2519   :  { %v1601_v34 = vld [vmem:[#allocation2] sm:$0xff] }
0x251d   :  { %v3969_v47 = vpop.eup %3968 }
0x251e   :  { %1514 = vrot.lane.b32.xlu1 %v3969_v47, %s4193_s27 }
0x2522   :  { %1129 = vrot.lane.b32.xlu1 %v4486_v23, %s4202_s20 }
0x2526   :  { %1285 = vrot.lane.b32.xlu1 %v4534_v11, %s4202_s20  ;;  %v1603_v11 = vld [vmem:[#allocation2 + $0x10] sm:$0xff] }
0x2590   :  { %v1515_v55 = vpop.permute.xlu1 %1514 }
0x2591   :  { %v4592_v40 = vmul.f32 %v3967_v25, %v1515_v55 }
0x2593   :  { %v1524_v31 = vpack.c.bf16 %v4592_v40, %v4592_v40 }
0x2594   :  { %v1130_v33 = vpop.permute.xlu1 %1129 }
0x2595   :  { %1132 = vst.msk [vmem:[#allocation2 + $0x8] sm:$0xff] %vm204_vm3, %v1130_v33  ;;  %1526 = vrot.lane.b32.xlu0 %v1524_v31, %s4202_s20 }
0x2598   :  { %v1286_v29 = vpop.permute.xlu1 %1285 }
0x2599   :  { %1288 = vst.msk [vmem:[#allocation2 + $0x18] sm:$0xff] %vm204_vm3, %v1286_v29 }
0x259c   :  { %v1602_v32 = vld [vmem:[#allocation2 + $0x8] sm:$0xff] }
0x259d   :  { %v1609_v23 = vpack.c.bf16 %v1602_v32, %v1601_v34 }
0x259f   :  { %3658 = vmatprep.mubr.msk.bf16.mxu0 %vm204_vm3, %v1609_v23 }
0x25a0   :  { %v1604_v38 = vld [vmem:[#allocation2 + $0x18] sm:$0xff] }
0x25a1   :  { %v1610_v16 = vpack.c.bf16 %v1604_v38, %v1603_v11 }
0x25a3   :  { %3659 = vmatmul.mubr.msk.bf16.vlgmr.msra.gmra.mxu0 %vm204_vm3, %v1610_v16 }
0x25a4   :  { %3683 = vmatpush3.bf16.msra.mxu0 %v4600_v39 }
0x25a5   :  { %3684 = vmatprep.subr.bf16.mxu0 %v4199_v14 }
0x25a8   :  { %3685 = vmatpush3.bf16.msra.mxu0 %v4605_v41 }
0x25a9   :  { %3698 = vmatprep.subr.bf16.mxu0 %v4199_v14 }
0x2607   :  { %v1527_v42 = vpop.permute.xlu0 %1526 }
0x2608   :  { %3651 = vmatmul.mubr.msk.bf16.vlgmr.msra.gmra.mxu1 %vm204_vm3, %v1527_v42 }
0x2609   :  { %3667 = vmatpush3.bf16.msra.mxu1 %v4600_v39  ;;  %3670 = vmatprep.mubr.msk.bf16.mxu1 %vm4200_vm2, %v4199_v14 }
0x260a   :  { %3668 = vmatprep.subr.bf16.mxu1 %v4199_v14 }
0x260d   :  { %3669 = vmatpush3.bf16.msra.mxu1 %v4605_v41 }
0x260e   :  { %3674 = vmatprep.subr.bf16.mxu1 %v4199_v14 }
0x2610   :  { %3671 = vmatmul.mubr.bf16.vlgmr.msra.gmra.mxu1 %v4201_v17 }
0x2611   :  { %3675 = vmatpush3.bf16.msra.mxu1 %v4600_v39  ;;  %3678 = vmatprep.mubr.msk.bf16.mxu1 %vm4200_vm2, %v4199_v14 }
0x2612   :  { %3676 = vmatprep.subr.bf16.mxu1 %v4199_v14 }
0x2615   :  { %3677 = vmatpush3.bf16.msra.mxu1 %v4605_v41 }
0x2616   :  { %3690 = vmatprep.subr.bf16.mxu1 %v4199_v14 }
0x2663   :  { %v4625_v45 = vpop.f32.mrf.mxu0 }
0x2665   :  { %v1676_v51 = vpop.f32.mrf.mxu0 }
0x2666   :  { %v1715_v54 = vadd.f32 %v4630_v10, %v1676_v51 }
0x2667   :  { %v4658_v15 = vpop.f32.mrf.mxu0 }
0x2669   :  { %v1679_v47 = vpop.f32.mrf.mxu0 }
0x266a   :  { %v1716_v55 = vadd.f32 %v4630_v10, %v1679_v47 }
0x26c8   :  { %v1565_v46 = vpop.f32.mrf.mxu1 }
0x26c9   :  { %v1571_v48 = vadd.f32 %v1565_v46, %v958_v43 }
0x26ca   :  { %v3652_v49 = vpop.f32.mrf.mxu1 }
0x26cb   :  { %v3321_v62 = vmul.f32 -1.442695, %v1571_v48 }
0x26cc   :  { %v1568_v52 = vpop.f32.mrf.mxu1 }
0x26ce   :  { %v3653_v53 = vpop.f32.mrf.mxu1 }
0x26d0   :  { %v1783_v6 = vpop.f32.mrf.mxu1 }
0x26d1   :  { %v1789_v28 = vadd.f32 %v1783_v6, %v1715_v54 }
0x26d2   :  { %v3672_v22 = vpop.f32.mrf.mxu1 }
0x26d3   :  { %3970 = vtanh.f32 %v1789_v28  ;;  %v3332_v56 = vmul.f32 -1.442695, %v1789_v28 }
0x26d4   :  { %v1786_v20 = vpop.f32.mrf.mxu1 }
0x26d5   :  { %3972 = vpow2.f32 %v3332_v56 }
0x26d6   :  { %v3673_v35 = vpop.f32.mrf.mxu1 }
0x26e0   :  { %v3971_v7 = vpop.eup %3970 }
0x26e1   :  { %1799 = vrot.lane.b32.xlu1 %v3971_v7, %s4193_s27 }
0x26e2   :  { %v3973_v58 = vpop.eup %3972 }
0x26e3   :  { %v1793_v36 = vadd.f32 1.0, %v3973_v58 }
0x26e5   :  { %3974 = vrcp.f32 %v1793_v36 }
0x26f2   :  { %v3975_v59 = vpop.eup %3974 }
0x26f3   :  { %v1797_v37 = vmul.f32 0.0, %v3975_v59 }
0x2753   :  { %v1800_v61 = vpop.permute.xlu1 %1799 }
0x2754   :  { %v1802_v50 = vmul.f32 %v3975_v59, %v1800_v61 }
0x2756   :  { %1804 = vrot.lane.b32.xlu0 %v1802_v50, %s4202_s20 }
0x27c8   :  { %v1805_v0 = vpop.permute.xlu0 %1804 }
0x27c9   :  { %v1807_v13 = vadd.f32 %v1805_v0, %v1797_v37  ;;  %v1717_v37 = vadd.f32 %v4625_v45, %v4630_v10 }
0x27cb   :  { %3976 = vtanh.f32 %v1807_v13 }
0x27cc   :  { %3978 = vtanh.f32 %v1571_v48 }
0x27cd   :  { %3980 = vpow2.f32 %v3321_v62 }
0x27d8   :  { %v3977_v1 = vpop.eup %3976 }
0x27d9   :  { %1810 = vrot.lane.b32.xlu1 %v3977_v1, %s4193_s27  ;;  %v3979_v2 = vpop.eup %3978 }
0x27da   :  { %v3981_v3 = vpop.eup %3980 }
0x27db   :  { %v1575_v8 = vadd.f32 1.0, %v3981_v3 }
0x27dd   :  { %1581 = vrot.lane.b32.xlu1 %v3979_v2, %s4193_s27  ;;  %3982 = vrcp.f32 %v1575_v8 }
0x27ea   :  { %v3983_v5 = vpop.eup %3982 }
0x27eb   :  { %v1579_v18 = vmul.f32 %v3983_v5, %v4581_v24 }
0x284b   :  { %v1811_v57 = vpop.permute.xlu1 %1810 }
0x284c   :  { %v4637_v60 = vmul.f32 %v3975_v59, %v1811_v57 }
0x284e   :  { %v1820_v4 = vpack.c.bf16 %v4637_v60, %v4637_v60 }
0x284f   :  { %v1582_v9 = vpop.permute.xlu1 %1581 }
0x2850   :  { %v1584_v25 = vmul.f32 %v3983_v5, %v1582_v9  ;;  %1822 = vrot.lane.b32.xlu0 %v1820_v4, %s4202_s20 }
0x2852   :  { %1586 = vrot.lane.b32.xlu1 %v1584_v25, %s4202_s20 }
0x28c2   :  { %v1823_v12 = vpop.permute.xlu0 %1822 }
0x28c3   :  { %3679 = vmatmul.mubr.msk.bf16.vlgmr.msra.gmra.mxu1 %vm204_vm3, %v1823_v12 }
0x28c4   :  { %v1587_v21 = vpop.permute.xlu1 %1586  ;;  %3691 = vmatpush3.bf16.msra.mxu1 %v4600_v39  ;;  %3694 = vmatprep.mubr.msk.bf16.mxu1 %vm4200_vm2, %v4199_v14 }
0x28c5   :  { %v1589_v19 = vadd.f32 %v1587_v21, %v1579_v18  ;;  %3692 = vmatprep.subr.bf16.mxu1 %v4199_v14 }
0x28c7   :  { %3984 = vtanh.f32 %v1589_v19 }
0x28c8   :  { %3693 = vmatpush3.bf16.msra.mxu1 %v4605_v41 }
0x28c9   :  { %3706 = vmatprep.subr.bf16.mxu1 %v4199_v14 }
0x28d4   :  { %v3985_v26 = vpop.eup %3984 }
0x28d5   :  { %1592 = vrot.lane.b32.xlu1 %v3985_v26, %s4193_s27 }
0x28d9   :  { %1363 = vrot.lane.b32.xlu1 %v4550_v44, %s4202_s20 }
0x28dd   :  { %1519 = vrot.lane.b32.xlu1 %v4592_v40, %s4202_s20 }
0x2947   :  { %v1593_v24 = vpop.permute.xlu1 %1592 }
0x2948   :  { %v1595_v51 = vmul.f32 %v3983_v5, %v1593_v24 }
0x294b   :  { %v1364_v27 = vpop.permute.xlu1 %1363 }
0x294c   :  { %1366 = vst.msk [vmem:[#allocation2 + $0x20] sm:$0xff] %vm204_vm3, %v1364_v27 }
0x294f   :  { %v1520_v30 = vpop.permute.xlu1 %1519 }
0x2950   :  { %1522 = vst.msk [vmem:[#allocation2 + $0x30] sm:$0xff] %vm204_vm3, %v1520_v30  ;;  %v1718_v30 = vadd.f32 %v4658_v15, %v4630_v10 }
0x2953   :  { %v1605_v22 = vld [vmem:[#allocation2 + $0x20] sm:$0xff] }
0x2957   :  { %v1607_v35 = vld [vmem:[#allocation2 + $0x30] sm:$0xff] }
0x2983   :  { %v1861_v31 = vpop.f32.mrf.mxu1 }
0x2984   :  { %v1867_v33 = vadd.f32 %v1861_v31, %v1716_v55 }
0x2985   :  { %v3680_v29 = vpop.f32.mrf.mxu1 }
0x2986   :  { %3986 = vtanh.f32 %v1867_v33  ;;  %v3334_v40 = vmul.f32 -1.442695, %v1867_v33 }
0x2987   :  { %v1864_v44 = vpop.f32.mrf.mxu1 }
0x2988   :  { %3988 = vpow2.f32 %v3334_v40 }
0x2989   :  { %v3681_v34 = vpop.f32.mrf.mxu1 }
0x2993   :  { %v3987_v32 = vpop.eup %3986 }
0x2994   :  { %1877 = vrot.lane.b32.xlu0 %v3987_v32, %s4193_s27 }
0x2995   :  { %v3989_v23 = vpop.eup %3988 }
0x2996   :  { %v1871_v11 = vadd.f32 1.0, %v3989_v23 }
0x2998   :  { %3990 = vrcp.f32 %v1871_v11 }
0x29a5   :  { %v3991_v38 = vpop.eup %3990 }
0x29a6   :  { %v1875_v43 = vmul.f32 %v3991_v38, %v1807_v13 }
0x2a06   :  { %v1878_v16 = vpop.permute.xlu0 %1877 }
0x2a07   :  { %v1880_v42 = vmul.f32 %v3991_v38, %v1878_v16 }
0x2a09   :  { %1882 = vrot.lane.b32.xlu0 %v1880_v42, %s4202_s20 }
0x2a7b   :  { %v1883_v46 = vpop.permute.xlu0 %1882 }
0x2a7c   :  { %v1885_v48 = vadd.f32 %v1883_v46, %v1875_v43 }
0x2a7e   :  { %3992 = vtanh.f32 %v1885_v48 }
0x2a8b   :  { %v3993_v49 = vpop.eup %3992 }
0x2a8c   :  { %1888 = vrot.lane.b32.xlu0 %v3993_v49, %s4193_s27 }
0x2a90   :  { %1441 = vrot.lane.b32.xlu0 %v4567_v63, %s4202_s20 }
0x2a94   :  { %1597 = vrot.lane.b32.xlu0 %v1595_v51, %s4202_s20 }
0x2afe   :  { %v1889_v52 = vpop.permute.xlu0 %1888 }
0x2aff   :  { %v4667_v53 = vmul.f32 %v3991_v38, %v1889_v52 }
0x2b01   :  { %v1898_v54 = vpack.c.bf16 %v4667_v53, %v4667_v53 }
0x2b02   :  { %v1442_v6 = vpop.permute.xlu0 %1441 }
0x2b03   :  { %1444 = vst.msk [vmem:[#allocation2 + $0x28] sm:$0xff] %vm204_vm3, %v1442_v6  ;;  %1900 = vrot.lane.b32.xlu1 %v1898_v54, %s4202_s20 }
0x2b06   :  { %v1598_v28 = vpop.permute.xlu0 %1597 }
0x2b07   :  { %1600 = vst.msk [vmem:[#allocation2 + $0x38] sm:$0xff] %vm204_vm3, %v1598_v28 }
0x2b0a   :  { %v1606_v20 = vld [vmem:[#allocation2 + $0x28] sm:$0xff] }
0x2b0b   :  { %v1611_v63 = vpack.c.bf16 %v1606_v20, %v1605_v22 }
0x2b0d   :  { %3662 = vmatprep.mubr.msk.bf16.mxu0 %vm204_vm3, %v1611_v63 }
0x2b0e   :  { %v1608_v7 = vld [vmem:[#allocation2 + $0x38] sm:$0xff] }
0x2b0f   :  { %v1612_v56 = vpack.c.bf16 %v1608_v7, %v1607_v35 }
0x2b11   :  { %3663 = vmatmul.mubr.msk.bf16.gmra.mxu0 %vm204_vm3, %v1612_v56 }
0x2b12   :  { %3686 = vmatprep.mubr.msk.bf16.mxu0 %vm4200_vm2, %v4199_v14 }
0x2b75   :  { %v1901_v58 = vpop.permute.xlu1 %1900 }
0x2b76   :  { %3687 = vmatmul.mubr.msk.bf16.vlgmr.msra.gmra.mxu0 %vm204_vm3, %v1901_v58 }
0x2b77   :  { %3699 = vmatpush3.bf16.msra.mxu0 %v4600_v39  ;;  %3702 = vmatprep.mubr.msk.bf16.mxu0 %vm4200_vm2, %v4199_v14 }
0x2b78   :  { %3700 = vmatprep.subr.bf16.mxu0 %v4199_v14 }
0x2b7b   :  { %3701 = vmatpush3.bf16.msra.mxu0 %v4605_v41 }
0x2b7c   :  { %3714 = vmatprep.subr.bf16.mxu0 %v4199_v14 }
0x2bd1   :  { %v4685_v36 = vpop.f32.mrf.mxu0 }
0x2bd3   :  { %v4687_v59 = vpop.f32.mrf.mxu0 }
0x2bd4   :  { %v1719_v52 = vadd.f32 %v4630_v10, %v4687_v59 }
0x2bd5   :  { %v4689_v61 = vpop.f32.mrf.mxu0 }
0x2bd7   :  { %v4691_v50 = vpop.f32.mrf.mxu0 }
0x2c36   :  { %v1939_v0 = vpop.f32.mrf.mxu0 }
0x2c37   :  { %v1945_v13 = vadd.f32 %v1939_v0, %v1717_v37 }
0x2c38   :  { %v3688_v1 = vpop.f32.mrf.mxu0 }
0x2c39   :  { %3994 = vtanh.f32 %v1945_v13  ;;  %v3336_v8 = vmul.f32 -1.442695, %v1945_v13 }
0x2c3a   :  { %v1942_v2 = vpop.f32.mrf.mxu0 }
0x2c3b   :  { %3996 = vpow2.f32 %v3336_v8 }
0x2c3c   :  { %v3689_v62 = vpop.f32.mrf.mxu0 }
0x2c46   :  { %v3995_v3 = vpop.eup %3994 }
0x2c47   :  { %1955 = vrot.lane.b32.xlu0 %v3995_v3, %s4193_s27 }
0x2c48   :  { %v3997_v57 = vpop.eup %3996 }
0x2c49   :  { %v1949_v4 = vadd.f32 1.0, %v3997_v57 }
0x2c4b   :  { %3998 = vrcp.f32 %v1949_v4  ;;  %v1720_v4 = vadd.f32 %v4630_v10, %v4691_v50 }
0x2c58   :  { %v3999_v5 = vpop.eup %3998 }
0x2c59   :  { %v1953_v45 = vmul.f32 %v3999_v5, %v1885_v48 }
0x2cb9   :  { %v1956_v9 = vpop.permute.xlu0 %1955 }
0x2cba   :  { %v1958_v25 = vmul.f32 %v3999_v5, %v1956_v9 }
0x2cbc   :  { %1960 = vrot.lane.b32.xlu1 %v1958_v25, %s4202_s20 }
0x2d2e   :  { %v1961_v12 = vpop.permute.xlu1 %1960 }
0x2d2f   :  { %v1963_v18 = vadd.f32 %v1961_v12, %v1953_v45 }
0x2d31   :  { %4000 = vtanh.f32 %v1963_v18 }
0x2d3e   :  { %v4001_v21 = vpop.eup %4000 }
0x2d3f   :  { %1966 = vrot.lane.b32.xlu0 %v4001_v21, %s4193_s27 }
0x2db1   :  { %v1967_v19 = vpop.permute.xlu0 %1966 }
0x2db2   :  { %v4698_v26 = vmul.f32 %v3999_v5, %v1967_v19 }
0x2db4   :  { %v1976_v24 = vpack.c.bf16 %v4698_v26, %v4698_v26 }
0x2db6   :  { %1978 = vrot.lane.b32.xlu1 %v1976_v24, %s4202_s20 }
0x2e28   :  { %v1979_v27 = vpop.permute.xlu1 %1978 }
0x2e29   :  { %3695 = vmatmul.mubr.msk.bf16.vlgmr.msra.gmra.mxu1 %vm204_vm3, %v1979_v27 }
0x2e2a   :  { %3707 = vmatpush3.bf16.msra.mxu1 %v4600_v39  ;;  %3710 = vmatprep.mubr.msk.bf16.mxu1 %vm4200_vm2, %v4199_v14 }
0x2e2b   :  { %3708 = vmatprep.subr.bf16.mxu1 %v4199_v14 }
0x2e2e   :  { %3709 = vmatpush3.bf16.msra.mxu1 %v4605_v41 }
0x2e2f   :  { %3722 = vmatprep.subr.bf16.mxu1 %v4199_v14 }
0x2ee9   :  { %v2017_v47 = vpop.f32.mrf.mxu1 }
0x2eea   :  { %v2023_v55 = vadd.f32 %v2017_v47, %v1718_v30 }
0x2eeb   :  { %v3696_v31 = vpop.f32.mrf.mxu1 }
0x2eec   :  { %4002 = vtanh.f32 %v2023_v55  ;;  %v3338_v34 = vmul.f32 -1.442695, %v2023_v55 }
0x2eed   :  { %v2020_v33 = vpop.f32.mrf.mxu1 }
0x2eee   :  { %4004 = vpow2.f32 %v3338_v34  ;;  %v1721_v34 = vadd.f32 %v4685_v36, %v4630_v10 }
0x2eef   :  { %v3697_v29 = vpop.f32.mrf.mxu1 }
0x2ef9   :  { %v4003_v44 = vpop.eup %4002 }
0x2efa   :  { %2033 = vrot.lane.b32.xlu0 %v4003_v44, %s4193_s27 }
0x2efb   :  { %v4005_v32 = vpop.eup %4004 }
0x2efc   :  { %v2027_v40 = vadd.f32 1.0, %v4005_v32 }
0x2efe   :  { %4006 = vrcp.f32 %v2027_v40 }
0x2f0b   :  { %v4007_v23 = vpop.eup %4006 }
0x2f0c   :  { %v2031_v15 = vmul.f32 %v4007_v23, %v1963_v18 }
0x2f6c   :  { %v2034_v11 = vpop.permute.xlu0 %2033 }
0x2f6d   :  { %v2036_v38 = vmul.f32 %v4007_v23, %v2034_v11 }
0x2f6f   :  { %2038 = vrot.lane.b32.xlu1 %v2036_v38, %s4202_s20 }
0x2fe1   :  { %v2039_v16 = vpop.permute.xlu1 %2038 }
0x2fe2   :  { %v2041_v42 = vadd.f32 %v2039_v16, %v2031_v15 }
0x2fe4   :  { %4008 = vtanh.f32 %v2041_v42 }
0x2ff1   :  { %v4009_v43 = vpop.eup %4008 }
0x2ff2   :  { %2044 = vrot.lane.b32.xlu0 %v4009_v43, %s4193_s27 }
0x3064   :  { %v2045_v46 = vpop.permute.xlu0 %2044 }
0x3065   :  { %v4715_v48 = vmul.f32 %v4007_v23, %v2045_v46 }
0x3067   :  { %v2054_v49 = vpack.c.bf16 %v4715_v48, %v4715_v48 }
0x3069   :  { %2056 = vrot.lane.b32.xlu1 %v2054_v49, %s4202_s20 }
0x30db   :  { %v2057_v51 = vpop.permute.xlu1 %2056 }
0x30dc   :  { %3703 = vmatmul.mubr.msk.bf16.vlgmr.msra.gmra.mxu0 %vm204_vm3, %v2057_v51 }
0x30dd   :  { %3715 = vmatpush3.bf16.msra.mxu0 %v4600_v39  ;;  %3718 = vmatprep.mubr.msk.bf16.mxu0 %vm4200_vm2, %v4199_v14 }
0x30de   :  { %3716 = vmatprep.subr.bf16.mxu0 %v4199_v14 }
0x30e1   :  { %3717 = vmatpush3.bf16.msra.mxu0 %v4605_v41 }
0x319c   :  { %v2095_v54 = vpop.f32.mrf.mxu0 }
0x319d   :  { %v2101_v6 = vadd.f32 %v2095_v54, %v1719_v52 }
0x319e   :  { %v3704_v28 = vpop.f32.mrf.mxu0 }
0x319f   :  { %4010 = vtanh.f32 %v2101_v6  ;;  %v3340_v35 = vmul.f32 -1.442695, %v2101_v6 }
0x31a0   :  { %v2098_v22 = vpop.f32.mrf.mxu0 }
0x31a1   :  { %4012 = vpow2.f32 %v3340_v35  ;;  %v3844_v22 = vld [vmem:[#allocation7 + $0x28] sm:$0xff]  }
0x31a2   :  { %v3705_v20 = vpop.f32.mrf.mxu0  ;;  %3730 = vmatprep.subr.bf16.mxu0 %v3844_v22 }
0x31a3   :  { %v3845_v20 = vld [vmem:[#allocation7 + $0x20] sm:$0xff]  }
0x31ac   :  { %v4011_v63 = vpop.eup %4010 }
0x31ad   :  { %2111 = vrot.lane.b32.xlu0 %v4011_v63, %s4193_s27 }
0x31ae   :  { %v4013_v7 = vpop.eup %4012 }
0x31af   :  { %v2105_v56 = vadd.f32 1.0, %v4013_v7 }
0x31b1   :  { %4014 = vrcp.f32 %v2105_v56 }
0x31be   :  { %v4015_v58 = vpop.eup %4014 }
0x31bf   :  { %v2109_v59 = vmul.f32 %v4015_v58, %v2041_v42 }
0x321f   :  { %v2112_v37 = vpop.permute.xlu0 %2111 }
0x3220   :  { %v2114_v0 = vmul.f32 %v4015_v58, %v2112_v37 }
0x3222   :  { %2116 = vrot.lane.b32.xlu1 %v2114_v0, %s4202_s20 }
0x3294   :  { %v2117_v13 = vpop.permute.xlu1 %2116 }
0x3295   :  { %v2119_v1 = vadd.f32 %v2117_v13, %v2109_v59  ;;  %v4781_v13 = vld [vmem:[#allocation9 + $0x38] sm:$0xff]  }
0x3297   :  { %4016 = vtanh.f32 %v2119_v1 }
0x32a4   :  { %v4017_v2 = vpop.eup %4016 }
0x32a5   :  { %2122 = vrot.lane.b32.xlu0 %v4017_v2, %s4193_s27 }
0x3317   :  { %v2123_v62 = vpop.permute.xlu0 %2122 }
0x3318   :  { %v4731_v3 = vmul.f32 %v4015_v58, %v2123_v62  ;;  %v1722_v62 = vadd.f32 %v4689_v61, %v4630_v10 }
0x331a   :  { %v2132_v8 = vpack.c.bf16 %v4731_v3, %v4731_v3 }
0x331c   :  { %2134 = vrot.lane.b32.xlu1 %v2132_v8, %s4202_s20 }
0x338e   :  { %v2135_v57 = vpop.permute.xlu1 %2134 }
0x338f   :  { %3711 = vmatmul.mubr.msk.bf16.vlgmr.msra.gmra.mxu1 %vm204_vm3, %v2135_v57 }
0x3390   :  { %3723 = vmatpush3.bf16.msra.mxu1 %v4600_v39  ;;  %3726 = vmatprep.mubr.msk.bf16.mxu1 %vm4200_vm2, %v4199_v14 }
0x3391   :  { %3724 = vmatprep.subr.bf16.mxu1 %v4199_v14 }
0x3394   :  { %3725 = vmatpush3.bf16.msra.mxu1 %v4605_v41 }
0x3395   :  { %3742 = vmatprep.subr.bf16.mxu1 %v4199_v14 }
0x344f   :  { %v2173_v5 = vpop.f32.mrf.mxu1 }
0x3450   :  { %v2179_v9 = vadd.f32 %v2173_v5, %v1720_v4 }
0x3451   :  { %v3712_v25 = vpop.f32.mrf.mxu1 }
0x3452   :  { %4018 = vtanh.f32 %v2179_v9  ;;  %v3342_v39 = vmul.f32 -1.442695, %v2179_v9  ;;  %v4811_v25 = vld [vmem:[%s4999_s4 + $0x3] ss:$0 sm:$0xff] }
0x3453   :  { %v2176_v45 = vpop.f32.mrf.mxu1 }
0x3454   :  { %4020 = vpow2.f32 %v3342_v39 }
0x3455   :  { %v3713_v12 = vpop.f32.mrf.mxu1 }
0x345f   :  { %v4019_v18 = vpop.eup %4018 }
0x3460   :  { %2189 = vrot.lane.b32.xlu0 %v4019_v18, %s4193_s27 }
0x3461   :  { %v4021_v21 = vpop.eup %4020 }
0x3462   :  { %v2183_v19 = vadd.f32 1.0, %v4021_v21 }
0x3464   :  { %4022 = vrcp.f32 %v2183_v19 }
0x3471   :  { %v4023_v41 = vpop.eup %4022 }
0x3472   :  { %v2187_v50 = vmul.f32 %v4023_v41, %v2119_v1  ;;  %v4786_v1 = vld [vmem:[#allocation9 + $0x30] sm:$0xff]  }
0x34d2   :  { %v2190_v24 = vpop.permute.xlu0 %2189 }
0x34d3   :  { %v2192_v27 = vmul.f32 %v4023_v41, %v2190_v24 }
0x34d5   :  { %2194 = vrot.lane.b32.xlu1 %v2192_v27, %s4202_s20 }
0x3547   :  { %v2195_v30 = vpop.permute.xlu1 %2194 }
0x3548   :  { %v2197_v47 = vadd.f32 %v2195_v30, %v2187_v50 }
0x354a   :  { %4024 = vtanh.f32 %v2197_v47 }
0x3557   :  { %v4025_v55 = vpop.eup %4024 }
0x3558   :  { %2200 = vrot.lane.b32.xlu0 %v4025_v55, %s4193_s27 }
0x35ca   :  { %v2201_v31 = vpop.permute.xlu0 %2200 }
0x35cb   :  { %v4748_v33 = vmul.f32 %v4023_v41, %v2201_v31 }
0x35cd   :  { %v2210_v29 = vpack.c.bf16 %v4748_v33, %v4748_v33 }
0x35cf   :  { %2212 = vrot.lane.b32.xlu1 %v2210_v29, %s4202_s20 }
0x3641   :  { %v2213_v44 = vpop.permute.xlu1 %2212 }
0x3642   :  { %3719 = vmatmul.mubr.msk.bf16.vlgmr.msra.gmra.mxu0 %vm204_vm3, %v2213_v44 }
0x3643   :  { %3731 = vmatpush3.bf16.msra.mxu0 %v3844_v22 }
0x3644   :  { %3732 = vmatprep.subr.bf16.mxu0 %v3845_v20 }
0x3647   :  { %3733 = vmatpush3.bf16.msra.mxu0 %v3845_v20 }
0x3648   :  { %3758 = vmatprep.subr.bf16.mxu0 %v4199_v14 }
0x3702   :  { %v2251_v32 = vpop.f32.mrf.mxu0 }
0x3703   :  { %v2257_v40 = vadd.f32 %v2251_v32, %v1721_v34 }
0x3704   :  { %v3720_v23 = vpop.f32.mrf.mxu0 }
0x3705   :  { %4026 = vtanh.f32 %v2257_v40  ;;  %v3344_v16 = vmul.f32 -1.442695, %v2257_v40 }
0x3706   :  { %v2254_v11 = vpop.f32.mrf.mxu0 }
0x3707   :  { %4028 = vpow2.f32 %v3344_v16 }
0x3708   :  { %v3721_v38 = vpop.f32.mrf.mxu0 }
0x3712   :  { %v4027_v15 = vpop.eup %4026 }
0x3713   :  { %2267 = vrot.lane.b32.xlu0 %v4027_v15, %s4193_s27 }
0x3714   :  { %v4029_v42 = vpop.eup %4028 }
0x3715   :  { %v2261_v43 = vadd.f32 1.0, %v4029_v42 }
0x3717   :  { %4030 = vrcp.f32 %v2261_v43 }
0x3724   :  { %v4031_v46 = vpop.eup %4030 }
0x3725   :  { %v2265_v36 = vmul.f32 %v4031_v46, %v2197_v47 }
0x3785   :  { %v2268_v49 = vpop.permute.xlu0 %2267 }
0x3786   :  { %v2270_v51 = vmul.f32 %v4031_v46, %v2268_v49 }
0x3788   :  { %2272 = vrot.lane.b32.xlu1 %v2270_v51, %s4202_s20 }
0x378c   :  { %1815 = vrot.lane.b32.xlu1 %v4637_v60, %s4202_s20 }
0x3790   :  { %1971 = vrot.lane.b32.xlu1 %v4698_v26, %s4202_s20 }
0x37fa   :  { %v2273_v52 = vpop.permute.xlu1 %2272 }
0x37fb   :  { %v4762_v54 = vadd.f32 %v2273_v52, %v2265_v36 }
0x37fd   :  { %4032 = vtanh.f32 %v4762_v54 }
0x37fe   :  { %v1816_v6 = vpop.permute.xlu1 %1815 }
0x37ff   :  { %1818 = vst.msk [vmem:[#allocation2] sm:$0xff] %vm204_vm3, %v1816_v6 }
0x3802   :  { %v1972_v28 = vpop.permute.xlu1 %1971 }
0x3803   :  { %1974 = vst.msk [vmem:[#allocation2 + $0x10] sm:$0xff] %vm204_vm3, %v1972_v28 }
0x3806   :  { %v2365_v58 = vld [vmem:[#allocation2] sm:$0xff] }
0x380a   :  { %v4033_v60 = vpop.eup %4032 }
0x380b   :  { %2278 = vrot.lane.b32.xlu0 %v4033_v60, %s4193_s27 }
0x380f   :  { %1893 = vrot.lane.b32.xlu0 %v4667_v53, %s4202_s20 }
0x3813   :  { %2049 = vrot.lane.b32.xlu0 %v4715_v48, %s4202_s20  ;;  %v2367_v48 = vld [vmem:[#allocation2 + $0x10] sm:$0xff] }
0x387d   :  { %v2279_v26 = vpop.permute.xlu0 %2278 }
0x387e   :  { %v4773_v63 = vmul.f32 %v4031_v46, %v2279_v26 }
0x3880   :  { %v2288_v35 = vpack.c.bf16 %v4773_v63, %v4773_v63 }
0x3881   :  { %v1894_v7 = vpop.permute.xlu0 %1893 }
0x3882   :  { %1896 = vst.msk [vmem:[#allocation2 + $0x8] sm:$0xff] %vm204_vm3, %v1894_v7  ;;  %2290 = vrot.lane.b32.xlu1 %v2288_v35, %s4202_s20 }
0x3885   :  { %v2050_v56 = vpop.permute.xlu0 %2049 }
0x3886   :  { %2052 = vst.msk [vmem:[#allocation2 + $0x18] sm:$0xff] %vm204_vm3, %v2050_v56 }
0x3889   :  { %v2366_v37 = vld [vmem:[#allocation2 + $0x8] sm:$0xff] }
0x388a   :  { %v2373_v53 = vpack.c.bf16 %v2366_v37, %v2365_v58 }
0x388c   :  { %3734 = vmatprep.mubr.msk.bf16.mxu0 %vm204_vm3, %v2373_v53 }
0x388d   :  { %v2368_v0 = vld [vmem:[#allocation2 + $0x18] sm:$0xff] }
0x388e   :  { %v2374_v59 = vpack.c.bf16 %v2368_v0, %v2367_v48 }
0x3890   :  { %3735 = vmatmul.mubr.msk.bf16.vlgmr.msra.gmra.mxu0 %vm204_vm3, %v2374_v59 }
0x3891   :  { %3759 = vmatpush3.bf16.msra.mxu0 %v4781_v13 }
0x3892   :  { %3760 = vmatprep.subr.bf16.mxu0 %v4199_v14 }
0x3895   :  { %3761 = vmatpush3.bf16.msra.mxu0 %v4786_v1 }
0x3896   :  { %3774 = vmatprep.subr.bf16.mxu0 %v4199_v14 }
0x38f4   :  { %v2291_v2 = vpop.permute.xlu1 %2290 }
0x38f5   :  { %3727 = vmatmul.mubr.msk.bf16.vlgmr.msra.gmra.mxu1 %vm204_vm3, %v2291_v2 }
0x38f6   :  { %3743 = vmatpush3.bf16.msra.mxu1 %v4781_v13  ;;  %3746 = vmatprep.mubr.msk.bf16.mxu1 %vm4200_vm2, %v4199_v14 }
0x38f7   :  { %3744 = vmatprep.subr.bf16.mxu1 %v4199_v14 }
0x38fa   :  { %3745 = vmatpush3.bf16.msra.mxu1 %v4786_v1 }
0x38fb   :  { %3750 = vmatprep.subr.bf16.mxu1 %v4199_v14 }
0x38fd   :  { %3747 = vmatmul.mubr.bf16.vlgmr.msra.gmra.mxu1 %v4201_v17 }
0x38fe   :  { %3751 = vmatpush3.bf16.msra.mxu1 %v4781_v13  ;;  %3754 = vmatprep.mubr.msk.bf16.mxu1 %vm4200_vm2, %v4199_v14 }
0x38ff   :  { %3752 = vmatprep.subr.bf16.mxu1 %v4199_v14 }
0x3902   :  { %3753 = vmatpush3.bf16.msra.mxu1 %v4786_v1 }
0x3903   :  { %3766 = vmatprep.subr.bf16.mxu1 %v4199_v14 }
0x3950   :  { %v4806_v8 = vpop.f32.mrf.mxu0 }
0x3952   :  { %v2440_v17 = vpop.f32.mrf.mxu0 }
0x3953   :  { %v2479_v12 = vadd.f32 %v4811_v25, %v2440_v17 }
0x3954   :  { %v4839_v22 = vpop.f32.mrf.mxu0 }
0x3956   :  { %v2443_v20 = vpop.f32.mrf.mxu0 }
0x3957   :  { %v2480_v60 = vadd.f32 %v4811_v25, %v2443_v20 }
0x39b5   :  { %v2329_v57 = vpop.f32.mrf.mxu1 }
0x39b6   :  { %v2335_v4 = vadd.f32 %v2329_v57, %v1722_v62 }
0x39b7   :  { %v3728_v5 = vpop.f32.mrf.mxu1 }
0x39b8   :  { %v3346_v32 = vmul.f32 -1.442695, %v2335_v4 }
0x39b9   :  { %v2332_v9 = vpop.f32.mrf.mxu1 }
0x39bb   :  { %v3729_v45 = vpop.f32.mrf.mxu1 }
0x39bd   :  { %v2547_v18 = vpop.f32.mrf.mxu1 }
0x39be   :  { %v2553_v39 = vadd.f32 %v2547_v18, %v2479_v12 }
0x39bf   :  { %v3748_v21 = vpop.f32.mrf.mxu1 }
0x39c0   :  { %4034 = vtanh.f32 %v2553_v39  ;;  %v3357_v41 = vmul.f32 -1.442695, %v2553_v39 }
0x39c1   :  { %v2550_v10 = vpop.f32.mrf.mxu1 }
0x39c2   :  { %4036 = vpow2.f32 %v3357_v41 }
0x39c3   :  { %v3749_v61 = vpop.f32.mrf.mxu1 }
0x39cd   :  { %v4035_v19 = vpop.eup %4034 }
0x39ce   :  { %2563 = vrot.lane.b32.xlu0 %v4035_v19, %s4193_s27 }
0x39cf   :  { %v4037_v24 = vpop.eup %4036 }
0x39d0   :  { %v2557_v27 = vadd.f32 1.0, %v4037_v24 }
0x39d2   :  { %4038 = vrcp.f32 %v2557_v27 }
0x39df   :  { %v4039_v50 = vpop.eup %4038 }
0x39e0   :  { %v2561_v55 = vmul.f32 0.0, %v4039_v50 }
0x3a40   :  { %v2564_v30 = vpop.permute.xlu0 %2563 }
0x3a41   :  { %v2566_v47 = vmul.f32 %v4039_v50, %v2564_v30 }
0x3a43   :  { %2568 = vrot.lane.b32.xlu1 %v2566_v47, %s4202_s20  ;;  %v2481_v47 = vadd.f32 %v4806_v8, %v4811_v25 }
0x3ab5   :  { %v2569_v31 = vpop.permute.xlu1 %2568 }
0x3ab6   :  { %v2571_v29 = vadd.f32 %v2569_v31, %v2561_v55 }
0x3ab8   :  { %4040 = vtanh.f32 %v2571_v29 }
0x3ab9   :  { %4042 = vtanh.f32 %v2335_v4 }
0x3aba   :  { %4044 = vpow2.f32 %v3346_v32 }
0x3ac5   :  { %v4041_v44 = vpop.eup %4040 }
0x3ac6   :  { %2574 = vrot.lane.b32.xlu0 %v4041_v44, %s4193_s27  ;;  %v4043_v34 = vpop.eup %4042 }
0x3ac7   :  { %v4045_v40 = vpop.eup %4044 }
0x3ac8   :  { %v2339_v23 = vadd.f32 1.0, %v4045_v40 }
0x3aca   :  { %2345 = vrot.lane.b32.xlu0 %v4043_v34, %s4193_s27  ;;  %4046 = vrcp.f32 %v2339_v23 }
0x3ad7   :  { %v4047_v16 = vpop.eup %4046 }
0x3ad8   :  { %v2343_v49 = vmul.f32 %v4047_v16, %v4762_v54 }
0x3b38   :  { %v2575_v11 = vpop.permute.xlu0 %2574 }
0x3b39   :  { %v4818_v38 = vmul.f32 %v4039_v50, %v2575_v11 }
0x3b3b   :  { %v2584_v15 = vpack.c.bf16 %v4818_v38, %v4818_v38 }
0x3b3c   :  { %v2346_v42 = vpop.permute.xlu0 %2345 }
0x3b3d   :  { %v2348_v43 = vmul.f32 %v4047_v16, %v2346_v42  ;;  %2586 = vrot.lane.b32.xlu1 %v2584_v15, %s4202_s20 }
0x3b3f   :  { %2350 = vrot.lane.b32.xlu0 %v2348_v43, %s4202_s20 }
0x3baf   :  { %v2587_v46 = vpop.permute.xlu1 %2586 }
0x3bb0   :  { %3755 = vmatmul.mubr.msk.bf16.vlgmr.msra.gmra.mxu1 %vm204_vm3, %v2587_v46 }
0x3bb1   :  { %v2351_v51 = vpop.permute.xlu0 %2350  ;;  %3767 = vmatpush3.bf16.msra.mxu1 %v4781_v13  ;;  %3770 = vmatprep.mubr.msk.bf16.mxu1 %vm4200_vm2, %v4199_v14 }
0x3bb2   :  { %v2353_v36 = vadd.f32 %v2351_v51, %v2343_v49  ;;  %3768 = vmatprep.subr.bf16.mxu1 %v4199_v14 }
0x3bb4   :  { %4048 = vtanh.f32 %v2353_v36 }
0x3bb5   :  { %3769 = vmatpush3.bf16.msra.mxu1 %v4786_v1 }
0x3bb6   :  { %3782 = vmatprep.subr.bf16.mxu1 %v4199_v14 }
0x3bc1   :  { %v4049_v52 = vpop.eup %4048 }
0x3bc2   :  { %2356 = vrot.lane.b32.xlu0 %v4049_v52, %s4193_s27 }
0x3bc6   :  { %2127 = vrot.lane.b32.xlu0 %v4731_v3, %s4202_s20 }
0x3bca   :  { %2283 = vrot.lane.b32.xlu0 %v4773_v63, %s4202_s20 }
0x3c34   :  { %v2357_v54 = vpop.permute.xlu0 %2356 }
0x3c35   :  { %v2359_v5 = vmul.f32 %v4047_v16, %v2357_v54 }
0x3c38   :  { %v2128_v6 = vpop.permute.xlu0 %2127 }
0x3c39   :  { %2130 = vst.msk [vmem:[#allocation2 + $0x20] sm:$0xff] %vm204_vm3, %v2128_v6  ;;  %v2482_v6 = vadd.f32 %v4839_v22, %v4811_v25 }
0x3c3c   :  { %v2284_v28 = vpop.permute.xlu0 %2283 }
0x3c3d   :  { %2286 = vst.msk [vmem:[#allocation2 + $0x30] sm:$0xff] %vm204_vm3, %v2284_v28 }
0x3c40   :  { %v2369_v39 = vld [vmem:[#allocation2 + $0x20] sm:$0xff] }
0x3c44   :  { %v2371_v10 = vld [vmem:[#allocation2 + $0x30] sm:$0xff] }
0x3c70   :  { %v2625_v26 = vpop.f32.mrf.mxu1 }
0x3c71   :  { %v2631_v35 = vadd.f32 %v2625_v26, %v2480_v60 }
0x3c72   :  { %v3756_v7 = vpop.f32.mrf.mxu1 }
0x3c73   :  { %4050 = vtanh.f32 %v2631_v35  ;;  %v3359_v63 = vmul.f32 -1.442695, %v2631_v35 }
0x3c74   :  { %v2628_v3 = vpop.f32.mrf.mxu1 }
0x3c75   :  { %4052 = vpow2.f32 %v3359_v63 }
0x3c76   :  { %v3757_v56 = vpop.f32.mrf.mxu1 }
0x3c80   :  { %v4051_v58 = vpop.eup %4050 }
0x3c81   :  { %2641 = vrot.lane.b32.xlu1 %v4051_v58, %s4193_s27 }
0x3c82   :  { %v4053_v37 = vpop.eup %4052 }
0x3c83   :  { %v2635_v53 = vadd.f32 1.0, %v4053_v37 }
0x3c85   :  { %4054 = vrcp.f32 %v2635_v53 }
0x3c92   :  { %v4055_v48 = vpop.eup %4054 }
0x3c93   :  { %v2639_v2 = vmul.f32 %v4055_v48, %v2571_v29 }
0x3cf3   :  { %v2642_v0 = vpop.permute.xlu1 %2641 }
0x3cf4   :  { %v2644_v59 = vmul.f32 %v4055_v48, %v2642_v0 }
0x3cf6   :  { %2646 = vrot.lane.b32.xlu1 %v2644_v59, %s4202_s20 }
0x3d68   :  { %v2647_v62 = vpop.permute.xlu1 %2646 }
0x3d69   :  { %v2649_v57 = vadd.f32 %v2647_v62, %v2639_v2 }
0x3d6b   :  { %4056 = vtanh.f32 %v2649_v57 }
0x3d78   :  { %v4057_v4 = vpop.eup %4056 }
0x3d79   :  { %2652 = vrot.lane.b32.xlu1 %v4057_v4, %s4193_s27 }
0x3d7d   :  { %2205 = vrot.lane.b32.xlu1 %v4748_v33, %s4202_s20 }
0x3d81   :  { %2361 = vrot.lane.b32.xlu1 %v2359_v5, %s4202_s20 }
0x3deb   :  { %v2653_v17 = vpop.permute.xlu1 %2652 }
0x3dec   :  { %v4848_v9 = vmul.f32 %v4055_v48, %v2653_v17 }
0x3dee   :  { %v2662_v45 = vpack.c.bf16 %v4848_v9, %v4848_v9 }
0x3def   :  { %v2206_v12 = vpop.permute.xlu1 %2205 }
0x3df0   :  { %2208 = vst.msk [vmem:[#allocation2 + $0x28] sm:$0xff] %vm204_vm3, %v2206_v12  ;;  %2664 = vrot.lane.b32.xlu0 %v2662_v45, %s4202_s20 }
0x3df3   :  { %v2362_v18 = vpop.permute.xlu1 %2361 }
0x3df4   :  { %2364 = vst.msk [vmem:[#allocation2 + $0x38] sm:$0xff] %vm204_vm3, %v2362_v18 }
0x3df7   :  { %v2370_v21 = vld [vmem:[#allocation2 + $0x28] sm:$0xff] }
0x3df8   :  { %v2375_v33 = vpack.c.bf16 %v2370_v21, %v2369_v39 }
0x3dfa   :  { %3738 = vmatprep.mubr.msk.bf16.mxu0 %vm204_vm3, %v2375_v33 }
0x3dfb   :  { %v2372_v61 = vld [vmem:[#allocation2 + $0x38] sm:$0xff] }
0x3dfc   :  { %v2376_v19 = vpack.c.bf16 %v2372_v61, %v2371_v10 }
0x3dfe   :  { %3739 = vmatmul.mubr.msk.bf16.gmra.mxu0 %vm204_vm3, %v2376_v19 }
0x3dff   :  { %3762 = vmatprep.mubr.msk.bf16.mxu0 %vm4200_vm2, %v4199_v14 }
0x3e62   :  { %v2665_v41 = vpop.permute.xlu0 %2664 }
0x3e63   :  { %3763 = vmatmul.mubr.msk.bf16.vlgmr.msra.gmra.mxu0 %vm204_vm3, %v2665_v41 }
0x3e64   :  { %3775 = vmatpush3.bf16.msra.mxu0 %v4781_v13  ;;  %3778 = vmatprep.mubr.msk.bf16.mxu0 %vm4200_vm2, %v4199_v14 }
0x3e65   :  { %3776 = vmatprep.subr.bf16.mxu0 %v4199_v14 }
0x3e68   :  { %3777 = vmatpush3.bf16.msra.mxu0 %v4786_v1 }
0x3e69   :  { %3790 = vmatprep.subr.bf16.mxu0 %v4199_v14 }
0x3ebe   :  { %v4866_v24 = vpop.f32.mrf.mxu0 }
0x3ec0   :  { %v4868_v27 = vpop.f32.mrf.mxu0 }
0x3ec1   :  { %v2483_v5 = vadd.f32 %v4811_v25, %v4868_v27 }
0x3ec2   :  { %v4870_v50 = vpop.f32.mrf.mxu0 }
0x3ec4   :  { %v4872_v30 = vpop.f32.mrf.mxu0 }
0x3f23   :  { %v2703_v55 = vpop.f32.mrf.mxu0 }
0x3f24   :  { %v2709_v31 = vadd.f32 %v2703_v55, %v2481_v47 }
0x3f25   :  { %v3764_v29 = vpop.f32.mrf.mxu0 }
0x3f26   :  { %4058 = vtanh.f32 %v2709_v31  ;;  %v3361_v40 = vmul.f32 -1.442695, %v2709_v31 }
0x3f27   :  { %v2706_v44 = vpop.f32.mrf.mxu0 }
0x3f28   :  { %4060 = vpow2.f32 %v3361_v40 }
0x3f29   :  { %v3765_v34 = vpop.f32.mrf.mxu0 }
0x3f33   :  { %v4059_v32 = vpop.eup %4058 }
0x3f34   :  { %2719 = vrot.lane.b32.xlu1 %v4059_v32, %s4193_s27 }
0x3f35   :  { %v4061_v23 = vpop.eup %4060 }
0x3f36   :  { %v2713_v11 = vadd.f32 1.0, %v4061_v23  ;;  %v2484_v23 = vadd.f32 %v4811_v25, %v4872_v30 }
0x3f38   :  { %4062 = vrcp.f32 %v2713_v11 }
0x3f45   :  { %v4063_v15 = vpop.eup %4062 }
0x3f46   :  { %v2717_v8 = vmul.f32 %v4063_v15, %v2649_v57 }
0x3fa6   :  { %v2720_v16 = vpop.permute.xlu1 %2719 }
0x3fa7   :  { %v2722_v42 = vmul.f32 %v4063_v15, %v2720_v16 }
0x3fa9   :  { %2724 = vrot.lane.b32.xlu0 %v2722_v42, %s4202_s20 }
0x401b   :  { %v2725_v43 = vpop.permute.xlu0 %2724 }
0x401c   :  { %v2727_v46 = vadd.f32 %v2725_v43, %v2717_v8 }
0x401e   :  { %4064 = vtanh.f32 %v2727_v46 }
0x402b   :  { %v4065_v49 = vpop.eup %4064 }
0x402c   :  { %2730 = vrot.lane.b32.xlu1 %v4065_v49, %s4193_s27 }
0x409e   :  { %v2731_v51 = vpop.permute.xlu1 %2730 }
0x409f   :  { %v4879_v36 = vmul.f32 %v4063_v15, %v2731_v51 }
0x40a1   :  { %v2740_v52 = vpack.c.bf16 %v4879_v36, %v4879_v36 }
0x40a3   :  { %2742 = vrot.lane.b32.xlu0 %v2740_v52, %s4202_s20 }
0x4115   :  { %v2743_v54 = vpop.permute.xlu0 %2742 }
0x4116   :  { %3771 = vmatmul.mubr.msk.bf16.vlgmr.msra.gmra.mxu1 %vm204_vm3, %v2743_v54 }
0x4117   :  { %3783 = vmatpush3.bf16.msra.mxu1 %v4781_v13  ;;  %3786 = vmatprep.mubr.msk.bf16.mxu1 %vm4200_vm2, %v4199_v14 }
0x4118   :  { %3784 = vmatprep.subr.bf16.mxu1 %v4199_v14 }
0x411b   :  { %3785 = vmatpush3.bf16.msra.mxu1 %v4786_v1 }
0x411c   :  { %3798 = vmatprep.subr.bf16.mxu1 %v4199_v14 }
0x41d6   :  { %v2781_v28 = vpop.f32.mrf.mxu1 }
0x41d7   :  { %v2787_v20 = vadd.f32 %v2781_v28, %v2482_v6 }
0x41d8   :  { %v3772_v60 = vpop.f32.mrf.mxu1 }
0x41d9   :  { %4066 = vtanh.f32 %v2787_v20  ;;  %v3363_v3 = vmul.f32 -1.442695, %v2787_v20 }
0x41da   :  { %v2784_v26 = vpop.f32.mrf.mxu1 }
0x41db   :  { %4068 = vpow2.f32 %v3363_v3 }
0x41dc   :  { %v3773_v35 = vpop.f32.mrf.mxu1 }
0x41dd   :  { %v2485_v35 = vadd.f32 %v4866_v24, %v4811_v25 }
0x41e6   :  { %v4067_v7 = vpop.eup %4066 }
0x41e7   :  { %2797 = vrot.lane.b32.xlu1 %v4067_v7, %s4193_s27 }
0x41e8   :  { %v4069_v56 = vpop.eup %4068 }
0x41e9   :  { %v2791_v58 = vadd.f32 1.0, %v4069_v56 }
0x41eb   :  { %4070 = vrcp.f32 %v2791_v58 }
0x41f8   :  { %v4071_v63 = vpop.eup %4070 }
0x41f9   :  { %v2795_v22 = vmul.f32 %v4071_v63, %v2727_v46 }
0x4259   :  { %v2798_v37 = vpop.permute.xlu1 %2797 }
0x425a   :  { %v2800_v53 = vmul.f32 %v4071_v63, %v2798_v37 }
0x425c   :  { %2802 = vrot.lane.b32.xlu0 %v2800_v53, %s4202_s20 }
0x42ce   :  { %v2803_v48 = vpop.permute.xlu0 %2802 }
0x42cf   :  { %v2805_v0 = vadd.f32 %v2803_v48, %v2795_v22 }
0x42d1   :  { %4072 = vtanh.f32 %v2805_v0 }
0x42de   :  { %v4073_v59 = vpop.eup %4072 }
0x42df   :  { %2808 = vrot.lane.b32.xlu1 %v4073_v59, %s4193_s27 }
0x4351   :  { %v2809_v2 = vpop.permute.xlu1 %2808 }
0x4352   :  { %v4896_v62 = vmul.f32 %v4071_v63, %v2809_v2 }
0x4354   :  { %v2818_v57 = vpack.c.bf16 %v4896_v62, %v4896_v62 }
0x4356   :  { %2820 = vrot.lane.b32.xlu0 %v2818_v57, %s4202_s20 }
0x43c8   :  { %v2821_v4 = vpop.permute.xlu0 %2820 }
0x43c9   :  { %3779 = vmatmul.mubr.msk.bf16.vlgmr.msra.gmra.mxu0 %vm204_vm3, %v2821_v4 }
0x43ca   :  { %3791 = vmatpush3.bf16.msra.mxu0 %v4781_v13  ;;  %3794 = vmatprep.mubr.msk.bf16.mxu0 %vm4200_vm2, %v4199_v14 }
0x43cb   :  { %3792 = vmatprep.subr.bf16.mxu0 %v4199_v14 }
0x43ce   :  { %3793 = vmatpush3.bf16.msra.mxu0 %v4786_v1 }
0x4489   :  { %v2859_v17 = vpop.f32.mrf.mxu0 }
0x448a   :  { %v2865_v45 = vadd.f32 %v2859_v17, %v2483_v5 }
0x448b   :  { %v3780_v12 = vpop.f32.mrf.mxu0 }
0x448c   :  { %4074 = vtanh.f32 %v2865_v45  ;;  %v3365_v33 = vmul.f32 -1.442695, %v2865_v45 }
0x448d   :  { %v2862_v18 = vpop.f32.mrf.mxu0 }
0x448e   :  { %4076 = vpow2.f32 %v3365_v33 }
0x448f   :  { %v3781_v39 = vpop.f32.mrf.mxu0 }
0x4490   :  { %v2486_v39 = vadd.f32 %v4870_v50, %v4811_v25 }
0x4499   :  { %v4075_v21 = vpop.eup %4074 }
0x449a   :  { %2875 = vrot.lane.b32.xlu1 %v4075_v21, %s4193_s27 }
0x449b   :  { %v4077_v10 = vpop.eup %4076 }
0x449c   :  { %v2869_v61 = vadd.f32 1.0, %v4077_v10 }
0x449e   :  { %4078 = vrcp.f32 %v2869_v61 }
0x44ab   :  { %v4079_v19 = vpop.eup %4078 }
0x44ac   :  { %v2873_v27 = vmul.f32 %v4079_v19, %v2805_v0 }
0x450c   :  { %v2876_v41 = vpop.permute.xlu1 %2875 }
0x450d   :  { %v2878_v47 = vmul.f32 %v4079_v19, %v2876_v41 }
0x450f   :  { %2880 = vrot.lane.b32.xlu0 %v2878_v47, %s4202_s20 }
0x4581   :  { %v2881_v55 = vpop.permute.xlu0 %2880 }
0x4582   :  { %v2883_v31 = vadd.f32 %v2881_v55, %v2873_v27 }
0x4584   :  { %4080 = vtanh.f32 %v2883_v31 }
0x4591   :  { %v4081_v29 = vpop.eup %4080 }
0x4592   :  { %2886 = vrot.lane.b32.xlu1 %v4081_v29, %s4193_s27 }
0x4604   :  { %v2887_v44 = vpop.permute.xlu1 %2886 }
0x4605   :  { %v4912_v34 = vmul.f32 %v4079_v19, %v2887_v44 }
0x4607   :  { %v2896_v32 = vpack.c.bf16 %v4912_v34, %v4912_v34 }
0x4609   :  { %2898 = vrot.lane.b32.xlu0 %v2896_v32, %s4202_s20 }
0x467b   :  { %v2899_v40 = vpop.permute.xlu0 %2898 }
0x467c   :  { %3787 = vmatmul.mubr.msk.bf16.vlgmr.msra.gmra.mxu1 %vm204_vm3, %v2899_v40 }
0x467d   :  { %3799 = vmatpush3.bf16.msra.mxu1 %v4781_v13  ;;  %3802 = vmatprep.mubr.msk.bf16.mxu1 %vm4200_vm2, %v4199_v14 }
0x467e   :  { %3800 = vmatprep.subr.bf16.mxu1 %v4199_v14 }
0x4681   :  { %3801 = vmatpush3.bf16.msra.mxu1 %v4786_v1 }
0x473c   :  { %v2937_v11 = vpop.f32.mrf.mxu1 }
0x473d   :  { %v2943_v15 = vadd.f32 %v2937_v11, %v2484_v23 }
0x473e   :  { %v3788_v16 = vpop.f32.mrf.mxu1 }
0x473f   :  { %4082 = vtanh.f32 %v2943_v15  ;;  %v3367_v13 = vmul.f32 -1.442695, %v2943_v15  ;;  %v3849_v15 = vld [vmem:[%s5000_s5] sm:$0xff]  }
0x4740   :  { %v2940_v42 = vpop.f32.mrf.mxu1 }
0x4741   :  { %4084 = vpow2.f32 %v3367_v13 }
0x4742   :  { %v3789_v8 = vpop.f32.mrf.mxu1 }
0x474c   :  { %v4083_v43 = vpop.eup %4082 }
0x474d   :  { %2953 = vrot.lane.b32.xlu1 %v4083_v43, %s4193_s27 }
0x474e   :  { %v4085_v46 = vpop.eup %4084 }
0x474f   :  { %v2947_v49 = vadd.f32 1.0, %v4085_v46 }
0x4751   :  { %4086 = vrcp.f32 %v2947_v49 }
0x475e   :  { %v4087_v14 = vpop.eup %4086 }
0x475f   :  { %v2951_v30 = vmul.f32 %v4087_v14, %v2883_v31 }
0x47bf   :  { %v2954_v51 = vpop.permute.xlu1 %2953 }
0x47c0   :  { %v2956_v1 = vmul.f32 %v4087_v14, %v2954_v51 }
0x47c2   :  { %2958 = vrot.lane.b32.xlu0 %v2956_v1, %s4202_s20 }
0x4834   :  { %v2959_v52 = vpop.permute.xlu0 %2958 }
0x4835   :  { %v2961_v54 = vadd.f32 %v2959_v52, %v2951_v30 }
0x4837   :  { %4088 = vtanh.f32 %v2961_v54 }
0x4844   :  { %v4089_v6 = vpop.eup %4088 }
0x4845   :  { %2964 = vrot.lane.b32.xlu1 %v4089_v6, %s4193_s27 }
0x48b7   :  { %v2965_v28 = vpop.permute.xlu1 %2964 }
0x48b8   :  { %v4928_v20 = vmul.f32 %v4087_v14, %v2965_v28 }
0x48ba   :  { %v2974_v60 = vpack.c.bf16 %v4928_v20, %v4928_v20 }
0x48bc   :  { %2976 = vrot.lane.b32.xlu0 %v2974_v60, %s4202_s20  ;;  %v3378_v60 = vld [vmem:[%s5001_s6] ss:$0 sm:$0xff]  ;;  %s4203_s6 = smov [#allocation10]  }
0x48bd   :  { %s3262_s8 = sshll.u32 %s4203_s6, 4  ;;  %s3263_s8 = int_to_ptr.vmem [resolvable:$true] %s3262_s8 }
0x48be   :  { %s4166_s9 = scalar_lea.vmem %s3263_s8, 1024  ;;  %p4171_p2 = scmp.lt.s32.totalorder %s3263_s8, %s3263_s8 }
0x48bf   :  { %p4167_p1 = scmp.ne.s32.totalorder %s3263_s8, %s4166_s9  ;;  %p4172_p3 = scmp.lt.s32.totalorder %s4166_s9, %s4166_s9 }
0x48c1   :  { %p4173_p4 = por %p4172_p3, %p4171_p2 }
0x48c3   :  { %p4174_p5 = pnand %p4173_p4, %p4167_p1 }
0x492e   :  { %v2977_v26 = vpop.permute.xlu0 %2976 }
0x492f   :  { %3795 = vmatmul.mubr.msk.bf16.vlgmr.msra.gmra.mxu0 %vm204_vm3, %v2977_v26 }
0x49ef   :  { %v3015_v7 = vpop.f32.mrf.mxu0 }
0x49f0   :  { %v3021_v3 = vadd.f32 %v3015_v7, %v2485_v35 }
0x49f1   :  { %v3796_v56 = vpop.f32.mrf.mxu0 }
0x49f2   :  { %4090 = vtanh.f32 %v3021_v3  ;;  %v3369_v53 = vmul.f32 -1.442695, %v3021_v3 }
0x49f3   :  { %v3018_v58 = vpop.f32.mrf.mxu0 }
0x49f4   :  { %4092 = vpow2.f32 %v3369_v53 }
0x49f5   :  { %v3797_v63 = vpop.f32.mrf.mxu0 }
0x49ff   :  { %v4091_v37 = vpop.eup %4090 }
0x4a00   :  { %3031 = vrot.lane.b32.xlu1 %v4091_v37, %s4193_s27 }
0x4a01   :  { %v4093_v22 = vpop.eup %4092 }
0x4a02   :  { %v3025_v48 = vadd.f32 1.0, %v4093_v22 }
0x4a04   :  { %4094 = vrcp.f32 %v3025_v48 }
0x4a11   :  { %v4095_v0 = vpop.eup %4094 }
0x4a12   :  { %v3029_v24 = vmul.f32 %v4095_v0, %v2961_v54 }
0x4a72   :  { %v3032_v59 = vpop.permute.xlu1 %3031 }
0x4a73   :  { %v3034_v2 = vmul.f32 %v4095_v0, %v3032_v59 }
0x4a75   :  { %3036 = vrot.lane.b32.xlu0 %v3034_v2, %s4202_s20 }
0x4ae7   :  { %v3037_v57 = vpop.permute.xlu0 %3036 }
0x4ae8   :  { %v3039_v4 = vadd.f32 %v3037_v57, %v3029_v24 }
0x4aea   :  { %4096 = vtanh.f32 %v3039_v4 }
0x4af7   :  { %v4097_v5 = vpop.eup %4096 }
0x4af8   :  { %3042 = vrot.lane.b32.xlu1 %v4097_v5, %s4193_s27 }
0x4b6a   :  { %v3043_v17 = vpop.permute.xlu1 %3042 }
0x4b6b   :  { %v3045_v45 = vmul.f32 %v4095_v0, %v3043_v17 }
0x4b6d   :  { %v3052_v12 = vpack.c.bf16 %v3045_v45, %v3045_v45 }
0x4b6f   :  { %3054 = vrot.lane.b32.xlu0 %v3052_v12, %s4202_s20 }
0x4be1   :  { %v3055_v18 = vpop.permute.xlu0 %3054 }
0x4be2   :  { %3803 = vmatmul.mubr.msk.bf16.vlgmr.msra.gmra.mxu1 %vm204_vm3, %v3055_v18 }
0x4ca2   :  { %v3093_v21 = vpop.f32.mrf.mxu1 }
0x4ca3   :  { %v3099_v33 = vadd.f32 %v3093_v21, %v2486_v39 }
0x4ca4   :  { %v3804_v10 = vpop.f32.mrf.mxu1 }
0x4ca5   :  { %4098 = vtanh.f32 %v3099_v33  ;;  %v3371_v47 = vmul.f32 -1.442695, %v3099_v33 }
0x4ca6   :  { %v3096_v61 = vpop.f32.mrf.mxu1 }
0x4ca7   :  { %4100 = vpow2.f32 %v3371_v47 }
0x4ca8   :  { %v3805_v19 = vpop.f32.mrf.mxu1 }
0x4cb2   :  { %v4099_v41 = vpop.eup %4098 }
0x4cb3   :  { %3109 = vrot.lane.b32.xlu1 %v4099_v41, %s4193_s27 }
0x4cb4   :  { %v4101_v27 = vpop.eup %4100 }
0x4cb5   :  { %v3103_v55 = vadd.f32 1.0, %v4101_v27 }
0x4cb7   :  { %4102 = vrcp.f32 %v3103_v55 }
0x4cc4   :  { %v4103_v31 = vpop.eup %4102 }
0x4cc5   :  { %v3107_v25 = vmul.f32 %v4103_v31, %v3039_v4 }
0x4d25   :  { %v3110_v29 = vpop.permute.xlu1 %3109 }
0x4d26   :  { %v3112_v44 = vmul.f32 %v4103_v31, %v3110_v29 }
0x4d28   :  { %3114 = vrot.lane.b32.xlu0 %v3112_v44, %s4202_s20 }
0x4d2c   :  { %2579 = vrot.lane.b32.xlu0 %v4818_v38, %s4202_s20  ;;  %v3848_v38 = vld [vmem:[%s5000_s5 + $0x8] sm:$0xff]  }
0x4d2d   :  { %3806 = vmatprep.subr.bf16.mxu0 %v3848_v38 }
0x4d2e   :  { %3807 = vmatpush3.bf16.msra.mxu0 %v3848_v38 }
0x4d2f   :  { %3808 = vmatprep.subr.bf16.mxu0 %v3849_v15 }
0x4d30   :  { %2735 = vrot.lane.b32.xlu0 %v4879_v36, %s4202_s20 }
0x4d32   :  { %3809 = vmatpush3.bf16.msra.mxu0 %v3849_v15 }
0x4d34   :  { %2891 = vrot.lane.b32.xlu0 %v4912_v34, %s4202_s20 }
0x4d38   :  { %3047 = vrot.lane.b32.xlu0 %v3045_v45, %s4202_s20 }
0x4d9a   :  { %v3115_v50 = vpop.permute.xlu0 %3114 }
0x4d9b   :  { %v3117_v32 = vadd.f32 %v3115_v50, %v3107_v25 }
0x4d9d   :  { %4104 = vtanh.f32 %v3117_v32 }
0x4d9e   :  { %v2580_v40 = vpop.permute.xlu0 %2579 }
0x4d9f   :  { %2582 = vst.msk [vmem:[#allocation2] sm:$0xff] %vm204_vm3, %v2580_v40 }
0x4da2   :  { %v2736_v23 = vpop.permute.xlu0 %2735 }
0x4da3   :  { %2738 = vst.msk [vmem:[#allocation2 + $0x10] sm:$0xff] %vm204_vm3, %v2736_v23 }
0x4da6   :  { %v2892_v11 = vpop.permute.xlu0 %2891  ;;  %v3129_v46 = vld [vmem:[#allocation2] sm:$0xff] }
0x4da7   :  { %2894 = vst.msk [vmem:[#allocation2 + $0x20] sm:$0xff] %vm204_vm3, %v2892_v11 }
0x4daa   :  { %v4105_v36 = vpop.eup %4104  ;;  %v3048_v34 = vpop.permute.xlu0 %3047 }
0x4dab   :  { %3050 = vst.msk [vmem:[#allocation2 + $0x30] sm:$0xff] %vm204_vm3, %v3048_v34  ;;  %3120 = vrot.lane.b32.xlu1 %v4105_v36, %s4193_s27 }
0x4dae   :  { %v3133_v1 = vld [vmem:[#allocation2 + $0x20] sm:$0xff] }
0x4daf   :  { %2657 = vrot.lane.b32.xlu1 %v4848_v9, %s4202_s20 }
0x4db2   :  { %v3135_v6 = vld [vmem:[#allocation2 + $0x30] sm:$0xff] }
0x4db3   :  { %2813 = vrot.lane.b32.xlu1 %v4896_v62, %s4202_s20  ;;  %v3131_v62 = vld [vmem:[#allocation2 + $0x10] sm:$0xff] }
0x4db7   :  { %2969 = vrot.lane.b32.xlu1 %v4928_v20, %s4202_s20 }
0x4e1d   :  { %v3121_v16 = vpop.permute.xlu1 %3120 }
0x4e1e   :  { %v3123_v42 = vmul.f32 %v4103_v31, %v3121_v16 }
0x4e20   :  { %3125 = vrot.lane.b32.xlu1 %v3123_v42, %s4202_s20 }
0x4e21   :  { %v2658_v8 = vpop.permute.xlu1 %2657 }
0x4e22   :  { %2660 = vst.msk [vmem:[#allocation2 + $0x8] sm:$0xff] %vm204_vm3, %v2658_v8 }
0x4e25   :  { %v2814_v43 = vpop.permute.xlu1 %2813 }
0x4e26   :  { %2816 = vst.msk [vmem:[#allocation2 + $0x18] sm:$0xff] %vm204_vm3, %v2814_v43 }
0x4e29   :  { %v2970_v13 = vpop.permute.xlu1 %2969  ;;  %v3130_v49 = vld [vmem:[#allocation2 + $0x8] sm:$0xff] }
0x4e2a   :  { %2972 = vst.msk [vmem:[#allocation2 + $0x28] sm:$0xff] %vm204_vm3, %v2970_v13  ;;  %v3137_v9 = vpack.c.bf16 %v3130_v49, %v3129_v46 }
0x4e2c   :  { %3810 = vmatprep.mubr.msk.bf16.mxu0 %vm204_vm3, %v3137_v9 }
0x4e2d   :  { %v3132_v14 = vld [vmem:[#allocation2 + $0x18] sm:$0xff] }
0x4e2e   :  { %v3138_v51 = vpack.c.bf16 %v3132_v14, %v3131_v62 }
0x4e30   :  { %3811 = vmatmul.mubr.msk.bf16.vlgmr.msra.gmra.mxu0 %vm204_vm3, %v3138_v51 }
0x4e31   :  { %v3134_v30 = vld [vmem:[#allocation2 + $0x28] sm:$0xff] }
0x4e32   :  { %v3139_v52 = vpack.c.bf16 %v3134_v30, %v3133_v1 }
0x4e34   :  { %3814 = vmatprep.mubr.msk.bf16.mxu0 %vm204_vm3, %v3139_v52 }
0x4e92   :  { %v3126_v54 = vpop.permute.xlu1 %3125 }
0x4e93   :  { %3128 = vst.msk [vmem:[#allocation2 + $0x38] sm:$0xff] %vm204_vm3, %v3126_v54 }
0x4e9a   :  { %v3136_v28 = vld [vmem:[#allocation2 + $0x38] sm:$0xff] }
0x4e9b   :  { %v3140_v20 = vpack.c.bf16 %v3136_v28, %v3135_v6 }
0x4e9d   :  { %3815 = vmatmul.mubr.msk.bf16.gmra.mxu0 %vm204_vm3, %v3140_v20 }
0x4ef0   :  { %v3812_v26 = vpop.f32.mrf.mxu0 }
0x4ef1   :  { %v3243_v35 = vadd.f32 %v3812_v26, %v3378_v60 }
0x4ef2   :  { %v3203_v7 = vpop.f32.mrf.mxu0 }
0x4ef3   :  { %3251 = vst.msk [vmem:[#allocation10 + $0x10] sm:$0xff] %vm82_vm1, %v3243_v35  ;;  %v3241_v3 = vadd.f32 %v3378_v60, %v3203_v7 }
0x4ef4   :  { %v3813_v56 = vpop.f32.mrf.mxu0 }
0x4ef5   :  { %3249 = vst.msk [vmem:[#allocation10] sm:$0xff] %vm82_vm1, %v3241_v3  ;;  %v3244_v58 = vadd.f32 %v3813_v56, %v3378_v60 }
0x4ef6   :  { %v3206_v63 = vpop.f32.mrf.mxu0 }
0x4ef7   :  { %3252 = vst.msk [vmem:[#allocation10 + $0x18] sm:$0xff] %vm82_vm1, %v3244_v58  ;;  %v3242_v37 = vadd.f32 %v3378_v60, %v3206_v63 }
0x4ef9   :  { %3250 = vst.msk [vmem:[#allocation10 + $0x8] sm:$0xff] %vm82_vm1, %v3242_v37 }
0x4f5d   :  { %v3816_v53 = vpop.f32.mrf.mxu0 }
0x4f5e   :  { %v3247_v22 = vadd.f32 %v3816_v53, %v3378_v60 }
0x4f5f   :  { %v3219_v48 = vpop.f32.mrf.mxu0 }
0x4f60   :  { %3255 = vst.msk [vmem:[#allocation10 + $0x30] sm:$0xff] %vm82_vm1, %v3247_v22  ;;  %v3245_v0 = vadd.f32 %v3378_v60, %v3219_v48 }
0x4f61   :  { %v3817_v59 = vpop.f32.mrf.mxu0 }
0x4f62   :  { %3253 = vst.msk [vmem:[#allocation10 + $0x20] sm:$0xff] %vm82_vm1, %v3245_v0  ;;  %v3248_v2 = vadd.f32 %v3817_v59, %v3378_v60 }
0x4f63   :  { %v3222_v24 = vpop.f32.mrf.mxu0 }
0x4f64   :  { %3256 = vst.msk [vmem:[#allocation10 + $0x38] sm:$0xff] %vm82_vm1, %v3248_v2  ;;  %v3246_v57 = vadd.f32 %v3378_v60, %v3222_v24 }
0x4f66   :  { %3254 = vst.msk [vmem:[#allocation10 + $0x28] sm:$0xff] %vm82_vm1, %v3246_v57 }
0x4f67   :  { %4177 = shalt.err (!%p4174_p5)
}
0x4f68   :  { %3268 = dma.vmem_to_hbm [thread:$0]  %s3263_s8, 1024, %s5002_s7, [#allocation6], %s4196_s11, %s4196_s11, %s4197_s12  }
0x4f69   :  { %4190 = dma.done.wait [#allocation6], 1024  }
0x4f6a   :  { %4191 = vsyncadd [#allocation6], 4294966272 }
0x4f6b   :  { %3272 = vsyncpa [#allocation5], 1 }
0x4f6c   :  { %3273 = vsyncpa [#allocation8], 1 }
0x4f6d   :  { %3274 = vsyncpa [#allocation6], 1 }

</bundles_post_ra>
